<compile_context>
chip_gen: v5e
topology: v5e:2x2
jax: 0.10.0
libtpu: 0.0.40
codegen_flags: <defaults>
</compile_context>

<pallas_src>
import functools

import jax
import jax.numpy as jnp
from jax.experimental import pallas as pl
from jax.experimental.pallas import tpu as pltpu


def _round_up(x, m):
    return ((x + m - 1) // m) * m


def _tpu_generation():
    """Best-effort TPU generation (5 = v5e/v5p, 6 = v6e, 7 = v7x, 0 = unknown)."""
    try:
        kind = jax.devices()[0].device_kind.lower()
    except Exception:
        return 0
    for g in (7, 6, 5, 4, 3, 2):
        if f"v{g}" in kind:
            return g
    return 0


# ----------------------------------------------------------------------------
# Pallas kernel: fused DeepSDF MLP over one (batch, tile-of-points) grid cell.
# ----------------------------------------------------------------------------
def deepsdf_mlp_kernel(xyz_ref, *refs, layer_kinds, bias_offsets, bias_sizes,
                       epilogue_dtype, compute_dtype):
    """xyz_ref: (1, KX, tm) feature-major xyz tile (compute_dtype, zero-padded).

    refs = [w_0 .. w_{n_w-1}, c_all_ref, out_ref]:
      w_*   : per-layer matmul weights, (out_rows, in_rows), compute_dtype.
              A skip layer contributes two pieces (h-part, xyz-part).
      c_all : (1, C_total, 1) packed per-batch effective biases (latent code
              folded in), epilogue_dtype, one 8-aligned segment per layer.
      out   : (1, out_dim, tm) lane-dense f32 output tile.
    """
    n_layers = len(layer_kinds)
    n_w = sum(len(k) for k in layer_kinds)
    ws = refs[:n_w]
    c_all = refs[n_w][0]                 # (C_total, 1): tiny, load once
    out_ref = refs[n_w + 1]

    x = xyz_ref[0]                       # (KX, tm), already compute_dtype
    h = x
    wi = 0
    for li, kinds in enumerate(layer_kinds):
        acc = None                       # f32 MXU accumulation
        for kind in kinds:
            operand = h if kind == "h" else x
            d = jnp.dot(ws[wi][...], operand, preferred_element_type=jnp.float32)
            acc = d if acc is None else acc + d
            wi += 1
        off, size = bias_offsets[li], bias_sizes[li]
        c = c_all[off:off + size]        # (size, 1), epilogue_dtype
        if li < n_layers - 1:
            # Hidden-layer epilogue: cast first, then bias-add + ReLU in
            # epilogue_dtype (bf16 on v6e/v7x -> 2x VALU density; f32 on v5e).
            # Dropout(0.2) -> identity (inference).
            h = jnp.maximum(acc.astype(epilogue_dtype) + c,
                            0.0).astype(compute_dtype)
        else:
            # Last layer: bias-add in f32, lane-dense (out_dim, tm) store.
            out_ref[0] = (acc + c.astype(jnp.float32)).astype(out_ref.dtype)


# ----------------------------------------------------------------------------
# Wrapper: layout plumbing + pallas_call.
# ----------------------------------------------------------------------------
def deepsdf_forward(lat, xyz, weights, biases, *, in_insert, input_dim=3,
                    tm=512, compute_dtype=jnp.bfloat16, epilogue_dtype=None,
                    row_align=None):
    """lat: (B, 1, L); xyz: (B, N, input_dim).
    weights[i]: (out_d, in_d) PyTorch nn.Linear layout; biases[i]: (out_d,).
    Returns (B, N, output_dim) float32."""
    assert tm % 128 == 0, "tm must be a multiple of 128 (lane-dense tiles)"
    KX = 8
    assert input_dim <= KX
    B, N, _ = xyz.shape
    L = lat.shape[-1]
    n_layers = len(weights)
    out_dim = weights[-1].shape[0]
    skip_layers = set(in_insert)

    gen = _tpu_generation()
    if epilogue_dtype is None:
        # bf16 bias-add/ReLU only where the VPU supports bf16 (v6e/v7x).
        epilogue_dtype = (jnp.bfloat16
                          if (compute_dtype == jnp.bfloat16 and gen >= 6)
                          else jnp.float32)
    if row_align is None:
        # 128-aligned activation rows -> clean passes on v5e's 4x128^2 MXU.
        row_align = 128 if gen == 5 else 8

    lat2 = lat.reshape(B, L).astype(jnp.float32)
    hi = jax.lax.Precision.HIGHEST

    n_tiles = pl.cdiv(N, tm)
    N_pad = n_tiles * tm
    # xyz in feature-major layout, compute dtype, zero-padded: (B, KX, N_pad).
    # Zero feature rows meet zero weight columns; padded point columns are
    # sliced off after the call.
    # TODO(synk): this transpose is an extra HBM pass; cache xyz_t across calls
    # when the same point set is evaluated repeatedly.
    xyz_t = jnp.transpose(xyz, (0, 2, 1)).astype(compute_dtype)
    xyz_t = jnp.pad(xyz_t, ((0, 0), (0, KX - input_dim), (0, N_pad - N)))

    def pad_rows(a, rows):
        return jnp.pad(a, ((0, rows - a.shape[0]),) + ((0, 0),) * (a.ndim - 1))

    def pad_cols(a, cols):
        return jnp.pad(a, ((0, 0), (0, cols - a.shape[1])))

    # Split per-layer weights; fold the latent columns into per-batch biases;
    # pad activation-row dims to `row_align` (zeros -> results unchanged).
    kern_ws, layer_kinds, cs, seg_rows = [], [], [], []
    prev_true = prev_pad = None
    for i in range(n_layers):
        w = weights[i].astype(jnp.float32)           # (out_d, in_d)
        b = biases[i].astype(jnp.float32)            # (out_d,)
        out_d = w.shape[0]
        last = i == n_layers - 1
        rows = out_d if last else _round_up(out_d, row_align)
        if i == 0:
            # layer-0 input = [lat | xyz]; lat contribution folded into bias.
            w_lat, w_x = w[:, :L], w[:, L:]
            c = jnp.matmul(lat2, w_lat.T, precision=hi) + b[None, :]
            kern_ws.append(pad_rows(pad_cols(w_x, KX), rows))
            layer_kinds.append(("x",))
        elif i in skip_layers:
            # skip-layer input = [h_prev | lat | xyz] (same order as concat)
            w_h = w[:, :prev_true]
            w_lat = w[:, prev_true:prev_true + L]
            w_x = w[:, prev_true + L:]
            c = jnp.matmul(lat2, w_lat.T, precision=hi) + b[None, :]
            kern_ws.append(pad_rows(pad_cols(w_h, prev_pad), rows))
            kern_ws.append(pad_rows(pad_cols(w_x, KX), rows))
            layer_kinds.append(("h", "x"))
        else:
            c = jnp.broadcast_to(b[None, :], (B, out_d))
            kern_ws.append(pad_rows(pad_cols(w, prev_pad), rows))
            layer_kinds.append(("h",))
        cs.append(jnp.pad(c, ((0, 0), (0, rows - out_d))))     # (B, rows)
        seg_rows.append(rows)
        prev_true, prev_pad = out_d, rows
    kern_ws = [w.astype(compute_dtype) for w in kern_ws]

    # Pack all per-batch effective biases into ONE (B, C_total, 1) array with
    # 8-aligned per-layer segments -> one ref instead of n_layers refs.
    bias_offsets, bias_sizes, packed, off = [], [], [], 0
    for rows, c in zip(seg_rows, cs):
        seg = _round_up(rows, 8)
        packed.append(jnp.pad(c, ((0, 0), (0, seg - rows))))
        bias_offsets.append(off)
        bias_sizes.append(rows)
        off += seg
    c_all = jnp.concatenate(packed, axis=1)[..., None].astype(epilogue_dtype)

    # Per-generation VMEM budget: v7x has 64 MiB physical per TensorCore.
    vmem_limit = (48 if gen >= 7 else 96 if gen in (5, 6) else 64) * 1024 * 1024

    kernel = functools.partial(
        deepsdf_mlp_kernel,
        layer_kinds=tuple(layer_kinds),
        bias_offsets=tuple(bias_offsets),
        bias_sizes=tuple(bias_sizes),
        epilogue_dtype=epilogue_dtype,
        compute_dtype=compute_dtype)

    grid = (B, n_tiles)
    out_specs = pl.BlockSpec((1, out_dim, tm), lambda b_, t: (b_, 0, t))

    def run(single_buffer_weights):
        in_specs = [pl.BlockSpec((1, KX, tm), lambda b_, t: (b_, 0, t))]
        for w in kern_ws:
            if single_buffer_weights:
                # Constant-index resident weights: single-buffer them (halves
                # their VMEM footprint; matters most on v7x's 64 MiB VMEM).
                in_specs.append(pl.BlockSpec(w.shape, lambda b_, t: (0, 0),
                                             pipeline_mode=pl.Buffered(1)))
            else:
                in_specs.append(pl.BlockSpec(w.shape, lambda b_, t: (0, 0)))
        # Packed biases are tiny and their block index changes per batch ->
        # keep default double-buffering so the next batch's biases prefetch.
        in_specs.append(pl.BlockSpec((1, c_all.shape[1], 1),
                                     lambda b_, t: (b_, 0, 0)))
        return pl.pallas_call(
            kernel,
            out_shape=jax.ShapeDtypeStruct((B, out_dim, N_pad), jnp.float32),
            grid_spec=pltpu.PrefetchScalarGridSpec(
                num_scalar_prefetch=0,
                grid=grid,
                in_specs=in_specs,
                out_specs=out_specs),
            compiler_params=pltpu.CompilerParams(
                dimension_semantics=("parallel", "parallel"),
                vmem_limit_bytes=vmem_limit),
        )(xyz_t, *kern_ws, c_all)

    try:
        out_t = run(True)
    except Exception:
        # pl.Buffered(1) not supported by this jax version -> default buffering.
        out_t = run(False)

    return jnp.transpose(out_t, (0, 2, 1))[:, :N, :]   # (B, N, out_dim) f32


# ----------------------------------------------------------------------------
# Deterministic parameter construction (mirrors DeepSDF.__init__ shapes).
# ----------------------------------------------------------------------------
def build_deepsdf_params(key, *, latent_dim, hidden_dim, n_layers, in_insert,
                         input_dim, output_dim):
    feats_dim = input_dim
    weights, biases = [], []
    for n in range(n_layers):
        in_d = out_d = hidden_dim
        if n == 0:
            in_d = latent_dim + feats_dim
        if n == n_layers - 1:
            out_d = output_dim
        elif (n + 1) in in_insert:
            out_d = hidden_dim - (latent_dim + feats_dim)
        key, kw, kb = jax.random.split(key, 3)
        bound = 1.0 / jnp.sqrt(in_d)
        v = jax.random.uniform(kw, (out_d, in_d), jnp.float32, -bound, bound)
        b = jax.random.uniform(kb, (out_d,), jnp.float32, -bound, bound)
        # weight_norm(dim=0): w = g * v / ||v||_row; at init g = ||v|| so w == v
        # (kept in this form so trained (g, v) pairs map identically).
        g = jnp.linalg.norm(v, axis=1, keepdims=True)
        w_eff = g * v / jnp.maximum(jnp.linalg.norm(v, axis=1, keepdims=True), 1e-12)
        weights.append(w_eff)          # (out_d, in_d) PyTorch layout
        biases.append(b)
    return weights, biases


# ----------------------------------------------------------------------------
# Pure-JAX reference (same semantics) for correctness checks.
# ----------------------------------------------------------------------------
def deepsdf_reference(lat, xyz, weights, biases, *, in_insert):
    B, N, _ = xyz.shape
    L = lat.shape[-1]
    x = jnp.concatenate(
        [jnp.broadcast_to(lat, (B, N, L)), xyz], axis=-1).astype(jnp.float32)
    h = x
    n_layers = len(weights)
    hi = jax.lax.Precision.HIGHEST
    for i in range(n_layers):
        h = jnp.matmul(h, weights[i].T, precision=hi) + biases[i]
        if i < n_layers - 1:
            h = jnp.maximum(h, 0.0)
        if (i + 1) in in_insert:
            h = jnp.concatenate([h, x], axis=-1)   # full-input re-insertion
    return h


if __name__ == "__main__":
    # Small, self-consistent configuration (scaled-down DeepSDF):
    LATENT, HIDDEN, N_LAYERS = 29, 64, 8
    IN_INSERT = [4]
    INPUT_DIM, OUTPUT_DIM = 3, 1
    B, N = 2, 500          # N deliberately NOT a multiple of tm (exercises padding)
    TM = 512               # point tile (multiple of 128); sweep 512/1024 at prod sizes

    key = jax.random.PRNGKey(0)
    key, klat, kxyz, kparam = jax.random.split(key, 4)
    lat = jax.random.normal(klat, (B, 1, LATENT), jnp.float32)
    xyz = jax.random.uniform(kxyz, (B, N, INPUT_DIM), jnp.float32, -1.0, 1.0)

    weights, biases = build_deepsdf_params(
        kparam, latent_dim=LATENT, hidden_dim=HIDDEN, n_layers=N_LAYERS,
        in_insert=IN_INSERT, input_dim=INPUT_DIM, output_dim=OUTPUT_DIM)

    ref = deepsdf_reference(lat, xyz, weights, biases, in_insert=IN_INSERT)

    # f32 compute path: the strict correctness gate vs the pure-JAX reference.
    out_f32 = deepsdf_forward(lat, xyz, weights, biases, in_insert=IN_INSERT,
                              input_dim=INPUT_DIM, tm=TM,
                              compute_dtype=jnp.float32)
    out_f32 = jax.block_until_ready(out_f32)
    assert out_f32.shape == (B, N, OUTPUT_DIM)
    assert jnp.allclose(out_f32, ref, atol=2e-3, rtol=2e-3), "f32 mismatch vs reference"

    # bf16-matmul (+ bf16 epilogue on v6e/v7x) performance path: looser bound,
    # since bf16 re-quantization compounds over 8 layers.
    out_bf16 = deepsdf_forward(lat, xyz, weights, biases, in_insert=IN_INSERT,
                               input_dim=INPUT_DIM, tm=TM,
                               compute_dtype=jnp.bfloat16)
    out_bf16 = jax.block_until_ready(out_bf16)
    assert out_bf16.shape == (B, N, OUTPUT_DIM)
    assert jnp.allclose(out_bf16, ref, atol=7.5e-2, rtol=7.5e-2), "bf16 mismatch vs reference"

    print("KERNEL_OK")
</pallas_src>

<mosaic_0001>
module attributes {stable_mosaic.version = 11 : i64} {
  func.func @deepsdf_mlp_kernel(%arg0: i32, %arg1: i32, %arg2: memref<1x8x512xf32, #tpu.memory_space<vmem>>, %arg3: memref<64x8xf32, #tpu.memory_space<vmem>>, %arg4: memref<64x64xf32, #tpu.memory_space<vmem>>, %arg5: memref<64x64xf32, #tpu.memory_space<vmem>>, %arg6: memref<32x64xf32, #tpu.memory_space<vmem>>, %arg7: memref<64x32xf32, #tpu.memory_space<vmem>>, %arg8: memref<64x8xf32, #tpu.memory_space<vmem>>, %arg9: memref<64x64xf32, #tpu.memory_space<vmem>>, %arg10: memref<64x64xf32, #tpu.memory_space<vmem>>, %arg11: memref<1x64xf32, #tpu.memory_space<vmem>>, %arg12: memref<1x424x1xf32, #tpu.memory_space<vmem>>, %arg13: memref<1x1x512xf32, #tpu.memory_space<vmem>>) attributes {dimension_semantics = [#tpu.dimension_semantics<parallel>, #tpu.dimension_semantics<parallel>], iteration_bounds = array<i64: 2, 1>, scalar_prefetch = 0 : i64, scratch_operands = 0 : i64, tpu.core_type = #tpu.core_type<tc>, window_params = [{transform_indices = @transform_0, window_bounds = array<i64: 1, 8, 512>}, {pipeline_mode = #tpu.pipeline_mode<synchronous>, transform_indices = @transform_1, window_bounds = array<i64: 64, 8>}, {pipeline_mode = #tpu.pipeline_mode<synchronous>, transform_indices = @transform_2, window_bounds = array<i64: 64, 64>}, {pipeline_mode = #tpu.pipeline_mode<synchronous>, transform_indices = @transform_3, window_bounds = array<i64: 64, 64>}, {pipeline_mode = #tpu.pipeline_mode<synchronous>, transform_indices = @transform_4, window_bounds = array<i64: 32, 64>}, {pipeline_mode = #tpu.pipeline_mode<synchronous>, transform_indices = @transform_5, window_bounds = array<i64: 64, 32>}, {pipeline_mode = #tpu.pipeline_mode<synchronous>, transform_indices = @transform_6, window_bounds = array<i64: 64, 8>}, {pipeline_mode = #tpu.pipeline_mode<synchronous>, transform_indices = @transform_7, window_bounds = array<i64: 64, 64>}, {pipeline_mode = #tpu.pipeline_mode<synchronous>, transform_indices = @transform_8, window_bounds = array<i64: 64, 64>}, {pipeline_mode = #tpu.pipeline_mode<synchronous>, transform_indices = @transform_9, window_bounds = array<i64: 1, 64>}, {transform_indices = @transform_10, window_bounds = array<i64: 1, 424, 1>}, {transform_indices = @transform_11, window_bounds = array<i64: 1, 1, 512>}]} {
    %c0 = arith.constant 0 : index
    %c0_0 = arith.constant 0 : index
    %c0_1 = arith.constant 0 : index
    %0 = vector.load %arg12[%c0, %c0_0, %c0_1] : memref<1x424x1xf32, #tpu.memory_space<vmem>>, vector<1x424x1xf32>
    %1 = vector.shape_cast %0 : vector<1x424x1xf32> to vector<424x1xf32>
    %c0_2 = arith.constant 0 : index
    %c0_3 = arith.constant 0 : index
    %c0_4 = arith.constant 0 : index
    %2 = vector.load %arg2[%c0_2, %c0_3, %c0_4] : memref<1x8x512xf32, #tpu.memory_space<vmem>>, vector<1x8x512xf32>
    %3 = vector.shape_cast %2 : vector<1x8x512xf32> to vector<8x512xf32>
    %c0_5 = arith.constant 0 : index
    %c0_6 = arith.constant 0 : index
    %4 = vector.load %arg3[%c0_5, %c0_6] : memref<64x8xf32, #tpu.memory_space<vmem>>, vector<64x8xf32>
    %cst = arith.constant dense<0.000000e+00> : vector<64x512xf32>
    %5 = tpu.matmul %4, %3, %cst {dimension_numbers = #tpu.dot_dimension_numbers<[1], [0], [0], [1], [0, 0, 1, 1], [], []>} : vector<64x8xf32>, vector<8x512xf32>, vector<64x512xf32> -> vector<64x512xf32>
    %6 = vector.extract_strided_slice %1 {offsets = [0, 0], sizes = [64, 1], strides = [1, 1]} : vector<424x1xf32> to vector<64x1xf32>
    %7 = vector.broadcast %6 : vector<64x1xf32> to vector<64x512xf32>
    %8 = arith.addf %5, %7 : vector<64x512xf32>
    %cst_7 = arith.constant 0.000000e+00 : f32
    %9 = vector.broadcast %cst_7 : f32 to vector<64x512xf32>
    %10 = arith.maximumf %8, %9 : vector<64x512xf32>
    %c0_8 = arith.constant 0 : index
    %c0_9 = arith.constant 0 : index
    %11 = vector.load %arg4[%c0_8, %c0_9] : memref<64x64xf32, #tpu.memory_space<vmem>>, vector<64x64xf32>
    %cst_10 = arith.constant dense<0.000000e+00> : vector<64x512xf32>
    %12 = tpu.matmul %11, %10, %cst_10 {dimension_numbers = #tpu.dot_dimension_numbers<[1], [0], [0], [1], [0, 0, 1, 1], [], []>} : vector<64x64xf32>, vector<64x512xf32>, vector<64x512xf32> -> vector<64x512xf32>
    %13 = vector.extract_strided_slice %1 {offsets = [64, 0], sizes = [64, 1], strides = [1, 1]} : vector<424x1xf32> to vector<64x1xf32>
    %14 = vector.broadcast %13 : vector<64x1xf32> to vector<64x512xf32>
    %15 = arith.addf %12, %14 : vector<64x512xf32>
    %cst_11 = arith.constant 0.000000e+00 : f32
    %16 = vector.broadcast %cst_11 : f32 to vector<64x512xf32>
    %17 = arith.maximumf %15, %16 : vector<64x512xf32>
    %c0_12 = arith.constant 0 : index
    %c0_13 = arith.constant 0 : index
    %18 = vector.load %arg5[%c0_12, %c0_13] : memref<64x64xf32, #tpu.memory_space<vmem>>, vector<64x64xf32>
    %cst_14 = arith.constant dense<0.000000e+00> : vector<64x512xf32>
    %19 = tpu.matmul %18, %17, %cst_14 {dimension_numbers = #tpu.dot_dimension_numbers<[1], [0], [0], [1], [0, 0, 1, 1], [], []>} : vector<64x64xf32>, vector<64x512xf32>, vector<64x512xf32> -> vector<64x512xf32>
    %20 = vector.extract_strided_slice %1 {offsets = [128, 0], sizes = [64, 1], strides = [1, 1]} : vector<424x1xf32> to vector<64x1xf32>
    %21 = vector.broadcast %20 : vector<64x1xf32> to vector<64x512xf32>
    %22 = arith.addf %19, %21 : vector<64x512xf32>
    %cst_15 = arith.constant 0.000000e+00 : f32
    %23 = vector.broadcast %cst_15 : f32 to vector<64x512xf32>
    %24 = arith.maximumf %22, %23 : vector<64x512xf32>
    %c0_16 = arith.constant 0 : index
    %c0_17 = arith.constant 0 : index
    %25 = vector.load %arg6[%c0_16, %c0_17] : memref<32x64xf32, #tpu.memory_space<vmem>>, vector<32x64xf32>
    %cst_18 = arith.constant dense<0.000000e+00> : vector<32x512xf32>
    %26 = tpu.matmul %25, %24, %cst_18 {dimension_numbers = #tpu.dot_dimension_numbers<[1], [0], [0], [1], [0, 0, 1, 1], [], []>} : vector<32x64xf32>, vector<64x512xf32>, vector<32x512xf32> -> vector<32x512xf32>
    %27 = vector.extract_strided_slice %1 {offsets = [192, 0], sizes = [32, 1], strides = [1, 1]} : vector<424x1xf32> to vector<32x1xf32>
    %28 = vector.broadcast %27 : vector<32x1xf32> to vector<32x512xf32>
    %29 = arith.addf %26, %28 : vector<32x512xf32>
    %cst_19 = arith.constant 0.000000e+00 : f32
    %30 = vector.broadcast %cst_19 : f32 to vector<32x512xf32>
    %31 = arith.maximumf %29, %30 : vector<32x512xf32>
    %c0_20 = arith.constant 0 : index
    %c0_21 = arith.constant 0 : index
    %32 = vector.load %arg7[%c0_20, %c0_21] : memref<64x32xf32, #tpu.memory_space<vmem>>, vector<64x32xf32>
    %cst_22 = arith.constant dense<0.000000e+00> : vector<64x512xf32>
    %33 = tpu.matmul %32, %31, %cst_22 {dimension_numbers = #tpu.dot_dimension_numbers<[1], [0], [0], [1], [0, 0, 1, 1], [], []>} : vector<64x32xf32>, vector<32x512xf32>, vector<64x512xf32> -> vector<64x512xf32>
    %c0_23 = arith.constant 0 : index
    %c0_24 = arith.constant 0 : index
    %34 = vector.load %arg8[%c0_23, %c0_24] : memref<64x8xf32, #tpu.memory_space<vmem>>, vector<64x8xf32>
    %cst_25 = arith.constant dense<0.000000e+00> : vector<64x512xf32>
    %35 = tpu.matmul %34, %3, %cst_25 {dimension_numbers = #tpu.dot_dimension_numbers<[1], [0], [0], [1], [0, 0, 1, 1], [], []>} : vector<64x8xf32>, vector<8x512xf32>, vector<64x512xf32> -> vector<64x512xf32>
    %36 = arith.addf %33, %35 : vector<64x512xf32>
    %37 = vector.extract_strided_slice %1 {offsets = [224, 0], sizes = [64, 1], strides = [1, 1]} : vector<424x1xf32> to vector<64x1xf32>
    %38 = vector.broadcast %37 : vector<64x1xf32> to vector<64x512xf32>
    %39 = arith.addf %36, %38 : vector<64x512xf32>
    %cst_26 = arith.constant 0.000000e+00 : f32
    %40 = vector.broadcast %cst_26 : f32 to vector<64x512xf32>
    %41 = arith.maximumf %39, %40 : vector<64x512xf32>
    %c0_27 = arith.constant 0 : index
    %c0_28 = arith.constant 0 : index
    %42 = vector.load %arg9[%c0_27, %c0_28] : memref<64x64xf32, #tpu.memory_space<vmem>>, vector<64x64xf32>
    %cst_29 = arith.constant dense<0.000000e+00> : vector<64x512xf32>
    %43 = tpu.matmul %42, %41, %cst_29 {dimension_numbers = #tpu.dot_dimension_numbers<[1], [0], [0], [1], [0, 0, 1, 1], [], []>} : vector<64x64xf32>, vector<64x512xf32>, vector<64x512xf32> -> vector<64x512xf32>
    %44 = vector.extract_strided_slice %1 {offsets = [288, 0], sizes = [64, 1], strides = [1, 1]} : vector<424x1xf32> to vector<64x1xf32>
    %45 = vector.broadcast %44 : vector<64x1xf32> to vector<64x512xf32>
    %46 = arith.addf %43, %45 : vector<64x512xf32>
    %cst_30 = arith.constant 0.000000e+00 : f32
    %47 = vector.broadcast %cst_30 : f32 to vector<64x512xf32>
    %48 = arith.maximumf %46, %47 : vector<64x512xf32>
    %c0_31 = arith.constant 0 : index
    %c0_32 = arith.constant 0 : index
    %49 = vector.load %arg10[%c0_31, %c0_32] : memref<64x64xf32, #tpu.memory_space<vmem>>, vector<64x64xf32>
    %cst_33 = arith.constant dense<0.000000e+00> : vector<64x512xf32>
    %50 = tpu.matmul %49, %48, %cst_33 {dimension_numbers = #tpu.dot_dimension_numbers<[1], [0], [0], [1], [0, 0, 1, 1], [], []>} : vector<64x64xf32>, vector<64x512xf32>, vector<64x512xf32> -> vector<64x512xf32>
    %51 = vector.extract_strided_slice %1 {offsets = [352, 0], sizes = [64, 1], strides = [1, 1]} : vector<424x1xf32> to vector<64x1xf32>
    %52 = vector.broadcast %51 : vector<64x1xf32> to vector<64x512xf32>
    %53 = arith.addf %50, %52 : vector<64x512xf32>
    %cst_34 = arith.constant 0.000000e+00 : f32
    %54 = vector.broadcast %cst_34 : f32 to vector<64x512xf32>
    %55 = arith.maximumf %53, %54 : vector<64x512xf32>
    %c0_35 = arith.constant 0 : index
    %c0_36 = arith.constant 0 : index
    %56 = vector.load %arg11[%c0_35, %c0_36] : memref<1x64xf32, #tpu.memory_space<vmem>>, vector<1x64xf32>
    %cst_37 = arith.constant dense<0.000000e+00> : vector<1x512xf32>
    %57 = tpu.matmul %56, %55, %cst_37 {dimension_numbers = #tpu.dot_dimension_numbers<[1], [0], [0], [1], [0, 0, 1, 1], [], []>} : vector<1x64xf32>, vector<64x512xf32>, vector<1x512xf32> -> vector<1x512xf32>
    %58 = vector.extract_strided_slice %1 {offsets = [416, 0], sizes = [1, 1], strides = [1, 1]} : vector<424x1xf32> to vector<1x1xf32>
    %59 = vector.broadcast %58 : vector<1x1xf32> to vector<1x512xf32>
    %60 = arith.addf %57, %59 : vector<1x512xf32>
    %c0_38 = arith.constant 0 : index
    %c0_39 = arith.constant 0 : index
    %c0_40 = arith.constant 0 : index
    %61 = vector.load %arg13[%c0_38, %c0_39, %c0_40] : memref<1x1x512xf32, #tpu.memory_space<vmem>>, vector<1x1x512xf32>
    %62 = vector.shape_cast %61 : vector<1x1x512xf32> to vector<1x512xf32>
    %63 = vector.shape_cast %60 : vector<1x512xf32> to vector<1x1x512xf32>
    tpu.vector_store %arg13[%c0_38, %c0_39, %c0_40], %63 {strides = array<i32>} : memref<1x1x512xf32, #tpu.memory_space<vmem>>, vector<1x1x512xf32>,
    return
  }
  func.func @transform_0(%arg0: i32, %arg1: i32) -> (i32, i32, i32) {
    %c0_i32 = arith.constant 0 : i32
    %c0_i32_0 = arith.constant 0 : i32
    return %arg0, %c0_i32, %arg1 : i32, i32, i32
  }
  func.func @transform_1(%arg0: i32, %arg1: i32) -> (i32, i32) {
    %c0_i32 = arith.constant 0 : i32
    %c0_i32_0 = arith.constant 0 : i32
    %c0_i32_1 = arith.constant 0 : i32
    return %c0_i32, %c0_i32_0 : i32, i32
  }
  func.func @transform_2(%arg0: i32, %arg1: i32) -> (i32, i32) {
    %c0_i32 = arith.constant 0 : i32
    %c0_i32_0 = arith.constant 0 : i32
    %c0_i32_1 = arith.constant 0 : i32
    return %c0_i32, %c0_i32_0 : i32, i32
  }
  func.func @transform_3(%arg0: i32, %arg1: i32) -> (i32, i32) {
    %c0_i32 = arith.constant 0 : i32
    %c0_i32_0 = arith.constant 0 : i32
    %c0_i32_1 = arith.constant 0 : i32
    return %c0_i32, %c0_i32_0 : i32, i32
  }
  func.func @transform_4(%arg0: i32, %arg1: i32) -> (i32, i32) {
    %c0_i32 = arith.constant 0 : i32
    %c0_i32_0 = arith.constant 0 : i32
    %c0_i32_1 = arith.constant 0 : i32
    return %c0_i32, %c0_i32_0 : i32, i32
  }
  func.func @transform_5(%arg0: i32, %arg1: i32) -> (i32, i32) {
    %c0_i32 = arith.constant 0 : i32
    %c0_i32_0 = arith.constant 0 : i32
    %c0_i32_1 = arith.constant 0 : i32
    return %c0_i32, %c0_i32_0 : i32, i32
  }
  func.func @transform_6(%arg0: i32, %arg1: i32) -> (i32, i32) {
    %c0_i32 = arith.constant 0 : i32
    %c0_i32_0 = arith.constant 0 : i32
    %c0_i32_1 = arith.constant 0 : i32
    return %c0_i32, %c0_i32_0 : i32, i32
  }
  func.func @transform_7(%arg0: i32, %arg1: i32) -> (i32, i32) {
    %c0_i32 = arith.constant 0 : i32
    %c0_i32_0 = arith.constant 0 : i32
    %c0_i32_1 = arith.constant 0 : i32
    return %c0_i32, %c0_i32_0 : i32, i32
  }
  func.func @transform_8(%arg0: i32, %arg1: i32) -> (i32, i32) {
    %c0_i32 = arith.constant 0 : i32
    %c0_i32_0 = arith.constant 0 : i32
    %c0_i32_1 = arith.constant 0 : i32
    return %c0_i32, %c0_i32_0 : i32, i32
  }
  func.func @transform_9(%arg0: i32, %arg1: i32) -> (i32, i32) {
    %c0_i32 = arith.constant 0 : i32
    %c0_i32_0 = arith.constant 0 : i32
    %c0_i32_1 = arith.constant 0 : i32
    return %c0_i32, %c0_i32_0 : i32, i32
  }
  func.func @transform_10(%arg0: i32, %arg1: i32) -> (i32, i32, i32) {
    %c0_i32 = arith.constant 0 : i32
    %c0_i32_0 = arith.constant 0 : i32
    %c0_i32_1 = arith.constant 0 : i32
    return %arg0, %c0_i32, %c0_i32_0 : i32, i32, i32
  }
  func.func @transform_11(%arg0: i32, %arg1: i32) -> (i32, i32, i32) {
    %c0_i32 = arith.constant 0 : i32
    %c0_i32_0 = arith.constant 0 : i32
    return %arg0, %c0_i32, %arg1 : i32, i32, i32
  }
}

module attributes {stable_mosaic.version = 11 : i64} {
  func.func @deepsdf_mlp_kernel(%arg0: i32, %arg1: i32, %arg2: memref<1x8x512xf32, #tpu.memory_space<vmem>>, %arg3: memref<64x8xf32, #tpu.memory_space<vmem>>, %arg4: memref<64x64xf32, #tpu.memory_space<vmem>>, %arg5: memref<64x64xf32, #tpu.memory_space<vmem>>, %arg6: memref<32x64xf32, #tpu.memory_space<vmem>>, %arg7: memref<64x32xf32, #tpu.memory_space<vmem>>, %arg8: memref<64x8xf32, #tpu.memory_space<vmem>>, %arg9: memref<64x64xf32, #tpu.memory_space<vmem>>, %arg10: memref<64x64xf32, #tpu.memory_space<vmem>>, %arg11: memref<1x64xf32, #tpu.memory_space<vmem>>, %arg12: memref<1x424x1xf32, #tpu.memory_space<vmem>>, %arg13: memref<1x1x512xf32, #tpu.memory_space<vmem>>) attributes {dimension_semantics = [#tpu.dimension_semantics<parallel>, #tpu.dimension_semantics<parallel>], iteration_bounds = array<i64: 2, 1>, scalar_prefetch = 0 : i64, scratch_operands = 0 : i64, tpu.core_type = #tpu.core_type<tc>, window_params = [{transform_indices = @transform_0, window_bounds = array<i64: 1, 8, 512>}, {pipeline_mode = #tpu.pipeline_mode<synchronous>, transform_indices = @transform_1, window_bounds = array<i64: 64, 8>}, {pipeline_mode = #tpu.pipeline_mode<synchronous>, transform_indices = @transform_2, window_bounds = array<i64: 64, 64>}, {pipeline_mode = #tpu.pipeline_mode<synchronous>, transform_indices = @transform_3, window_bounds = array<i64: 64, 64>}, {pipeline_mode = #tpu.pipeline_mode<synchronous>, transform_indices = @transform_4, window_bounds = array<i64: 32, 64>}, {pipeline_mode = #tpu.pipeline_mode<synchronous>, transform_indices = @transform_5, window_bounds = array<i64: 64, 32>}, {pipeline_mode = #tpu.pipeline_mode<synchronous>, transform_indices = @transform_6, window_bounds = array<i64: 64, 8>}, {pipeline_mode = #tpu.pipeline_mode<synchronous>, transform_indices = @transform_7, window_bounds = array<i64: 64, 64>}, {pipeline_mode = #tpu.pipeline_mode<synchronous>, transform_indices = @transform_8, window_bounds = array<i64: 64, 64>}, {pipeline_mode = #tpu.pipeline_mode<synchronous>, transform_indices = @transform_9, window_bounds = array<i64: 1, 64>}, {transform_indices = @transform_10, window_bounds = array<i64: 1, 424, 1>}, {transform_indices = @transform_11, window_bounds = array<i64: 1, 1, 512>}]} {
    %c0 = arith.constant 0 : index
    %c0_0 = arith.constant 0 : index
    %c0_1 = arith.constant 0 : index
    %0 = vector.load %arg12[%c0, %c0_0, %c0_1] : memref<1x424x1xf32, #tpu.memory_space<vmem>>, vector<1x424x1xf32>
    %1 = vector.shape_cast %0 : vector<1x424x1xf32> to vector<424x1xf32>
    %c0_2 = arith.constant 0 : index
    %c0_3 = arith.constant 0 : index
    %c0_4 = arith.constant 0 : index
    %2 = vector.load %arg2[%c0_2, %c0_3, %c0_4] : memref<1x8x512xf32, #tpu.memory_space<vmem>>, vector<1x8x512xf32>
    %3 = vector.shape_cast %2 : vector<1x8x512xf32> to vector<8x512xf32>
    %c0_5 = arith.constant 0 : index
    %c0_6 = arith.constant 0 : index
    %4 = vector.load %arg3[%c0_5, %c0_6] : memref<64x8xf32, #tpu.memory_space<vmem>>, vector<64x8xf32>
    %cst = arith.constant dense<0.000000e+00> : vector<64x512xf32>
    %5 = tpu.matmul %4, %3, %cst {dimension_numbers = #tpu.dot_dimension_numbers<[1], [0], [0], [1], [0, 0, 1, 1], [], []>} : vector<64x8xf32>, vector<8x512xf32>, vector<64x512xf32> -> vector<64x512xf32>
    %6 = vector.extract_strided_slice %1 {offsets = [0, 0], sizes = [64, 1], strides = [1, 1]} : vector<424x1xf32> to vector<64x1xf32>
    %7 = vector.broadcast %6 : vector<64x1xf32> to vector<64x512xf32>
    %8 = arith.addf %5, %7 : vector<64x512xf32>
    %cst_7 = arith.constant 0.000000e+00 : f32
    %9 = vector.broadcast %cst_7 : f32 to vector<64x512xf32>
    %10 = arith.maximumf %8, %9 : vector<64x512xf32>
    %c0_8 = arith.constant 0 : index
    %c0_9 = arith.constant 0 : index
    %11 = vector.load %arg4[%c0_8, %c0_9] : memref<64x64xf32, #tpu.memory_space<vmem>>, vector<64x64xf32>
    %cst_10 = arith.constant dense<0.000000e+00> : vector<64x512xf32>
    %12 = tpu.matmul %11, %10, %cst_10 {dimension_numbers = #tpu.dot_dimension_numbers<[1], [0], [0], [1], [0, 0, 1, 1], [], []>} : vector<64x64xf32>, vector<64x512xf32>, vector<64x512xf32> -> vector<64x512xf32>
    %13 = vector.extract_strided_slice %1 {offsets = [64, 0], sizes = [64, 1], strides = [1, 1]} : vector<424x1xf32> to vector<64x1xf32>
    %14 = vector.broadcast %13 : vector<64x1xf32> to vector<64x512xf32>
    %15 = arith.addf %12, %14 : vector<64x512xf32>
    %cst_11 = arith.constant 0.000000e+00 : f32
    %16 = vector.broadcast %cst_11 : f32 to vector<64x512xf32>
    %17 = arith.maximumf %15, %16 : vector<64x512xf32>
    %c0_12 = arith.constant 0 : index
    %c0_13 = arith.constant 0 : index
    %18 = vector.load %arg5[%c0_12, %c0_13] : memref<64x64xf32, #tpu.memory_space<vmem>>, vector<64x64xf32>
    %cst_14 = arith.constant dense<0.000000e+00> : vector<64x512xf32>
    %19 = tpu.matmul %18, %17, %cst_14 {dimension_numbers = #tpu.dot_dimension_numbers<[1], [0], [0], [1], [0, 0, 1, 1], [], []>} : vector<64x64xf32>, vector<64x512xf32>, vector<64x512xf32> -> vector<64x512xf32>
    %20 = vector.extract_strided_slice %1 {offsets = [128, 0], sizes = [64, 1], strides = [1, 1]} : vector<424x1xf32> to vector<64x1xf32>
    %21 = vector.broadcast %20 : vector<64x1xf32> to vector<64x512xf32>
    %22 = arith.addf %19, %21 : vector<64x512xf32>
    %cst_15 = arith.constant 0.000000e+00 : f32
    %23 = vector.broadcast %cst_15 : f32 to vector<64x512xf32>
    %24 = arith.maximumf %22, %23 : vector<64x512xf32>
    %c0_16 = arith.constant 0 : index
    %c0_17 = arith.constant 0 : index
    %25 = vector.load %arg6[%c0_16, %c0_17] : memref<32x64xf32, #tpu.memory_space<vmem>>, vector<32x64xf32>
    %cst_18 = arith.constant dense<0.000000e+00> : vector<32x512xf32>
    %26 = tpu.matmul %25, %24, %cst_18 {dimension_numbers = #tpu.dot_dimension_numbers<[1], [0], [0], [1], [0, 0, 1, 1], [], []>} : vector<32x64xf32>, vector<64x512xf32>, vector<32x512xf32> -> vector<32x512xf32>
    %27 = vector.extract_strided_slice %1 {offsets = [192, 0], sizes = [32, 1], strides = [1, 1]} : vector<424x1xf32> to vector<32x1xf32>
    %28 = vector.broadcast %27 : vector<32x1xf32> to vector<32x512xf32>
    %29 = arith.addf %26, %28 : vector<32x512xf32>
    %cst_19 = arith.constant 0.000000e+00 : f32
    %30 = vector.broadcast %cst_19 : f32 to vector<32x512xf32>
    %31 = arith.maximumf %29, %30 : vector<32x512xf32>
    %c0_20 = arith.constant 0 : index
    %c0_21 = arith.constant 0 : index
    %32 = vector.load %arg7[%c0_20, %c0_21] : memref<64x32xf32, #tpu.memory_space<vmem>>, vector<64x32xf32>
    %cst_22 = arith.constant dense<0.000000e+00> : vector<64x512xf32>
    %33 = tpu.matmul %32, %31, %cst_22 {dimension_numbers = #tpu.dot_dimension_numbers<[1], [0], [0], [1], [0, 0, 1, 1], [], []>} : vector<64x32xf32>, vector<32x512xf32>, vector<64x512xf32> -> vector<64x512xf32>
    %c0_23 = arith.constant 0 : index
    %c0_24 = arith.constant 0 : index
    %34 = vector.load %arg8[%c0_23, %c0_24] : memref<64x8xf32, #tpu.memory_space<vmem>>, vector<64x8xf32>
    %cst_25 = arith.constant dense<0.000000e+00> : vector<64x512xf32>
    %35 = tpu.matmul %34, %3, %cst_25 {dimension_numbers = #tpu.dot_dimension_numbers<[1], [0], [0], [1], [0, 0, 1, 1], [], []>} : vector<64x8xf32>, vector<8x512xf32>, vector<64x512xf32> -> vector<64x512xf32>
    %36 = arith.addf %33, %35 : vector<64x512xf32>
    %37 = vector.extract_strided_slice %1 {offsets = [224, 0], sizes = [64, 1], strides = [1, 1]} : vector<424x1xf32> to vector<64x1xf32>
    %38 = vector.broadcast %37 : vector<64x1xf32> to vector<64x512xf32>
    %39 = arith.addf %36, %38 : vector<64x512xf32>
    %cst_26 = arith.constant 0.000000e+00 : f32
    %40 = vector.broadcast %cst_26 : f32 to vector<64x512xf32>
    %41 = arith.maximumf %39, %40 : vector<64x512xf32>
    %c0_27 = arith.constant 0 : index
    %c0_28 = arith.constant 0 : index
    %42 = vector.load %arg9[%c0_27, %c0_28] : memref<64x64xf32, #tpu.memory_space<vmem>>, vector<64x64xf32>
    %cst_29 = arith.constant dense<0.000000e+00> : vector<64x512xf32>
    %43 = tpu.matmul %42, %41, %cst_29 {dimension_numbers = #tpu.dot_dimension_numbers<[1], [0], [0], [1], [0, 0, 1, 1], [], []>} : vector<64x64xf32>, vector<64x512xf32>, vector<64x512xf32> -> vector<64x512xf32>
    %44 = vector.extract_strided_slice %1 {offsets = [288, 0], sizes = [64, 1], strides = [1, 1]} : vector<424x1xf32> to vector<64x1xf32>
    %45 = vector.broadcast %44 : vector<64x1xf32> to vector<64x512xf32>
    %46 = arith.addf %43, %45 : vector<64x512xf32>
    %cst_30 = arith.constant 0.000000e+00 : f32
    %47 = vector.broadcast %cst_30 : f32 to vector<64x512xf32>
    %48 = arith.maximumf %46, %47 : vector<64x512xf32>
    %c0_31 = arith.constant 0 : index
    %c0_32 = arith.constant 0 : index
    %49 = vector.load %arg10[%c0_31, %c0_32] : memref<64x64xf32, #tpu.memory_space<vmem>>, vector<64x64xf32>
    %cst_33 = arith.constant dense<0.000000e+00> : vector<64x512xf32>
    %50 = tpu.matmul %49, %48, %cst_33 {dimension_numbers = #tpu.dot_dimension_numbers<[1], [0], [0], [1], [0, 0, 1, 1], [], []>} : vector<64x64xf32>, vector<64x512xf32>, vector<64x512xf32> -> vector<64x512xf32>
    %51 = vector.extract_strided_slice %1 {offsets = [352, 0], sizes = [64, 1], strides = [1, 1]} : vector<424x1xf32> to vector<64x1xf32>
    %52 = vector.broadcast %51 : vector<64x1xf32> to vector<64x512xf32>
    %53 = arith.addf %50, %52 : vector<64x512xf32>
    %cst_34 = arith.constant 0.000000e+00 : f32
    %54 = vector.broadcast %cst_34 : f32 to vector<64x512xf32>
    %55 = arith.maximumf %53, %54 : vector<64x512xf32>
    %c0_35 = arith.constant 0 : index
    %c0_36 = arith.constant 0 : index
    %56 = vector.load %arg11[%c0_35, %c0_36] : memref<1x64xf32, #tpu.memory_space<vmem>>, vector<1x64xf32>
    %cst_37 = arith.constant dense<0.000000e+00> : vector<1x512xf32>
    %57 = tpu.matmul %56, %55, %cst_37 {dimension_numbers = #tpu.dot_dimension_numbers<[1], [0], [0], [1], [0, 0, 1, 1], [], []>} : vector<1x64xf32>, vector<64x512xf32>, vector<1x512xf32> -> vector<1x512xf32>
    %58 = vector.extract_strided_slice %1 {offsets = [416, 0], sizes = [1, 1], strides = [1, 1]} : vector<424x1xf32> to vector<1x1xf32>
    %59 = vector.broadcast %58 : vector<1x1xf32> to vector<1x512xf32>
    %60 = arith.addf %57, %59 : vector<1x512xf32>
    %c0_38 = arith.constant 0 : index
    %c0_39 = arith.constant 0 : index
    %c0_40 = arith.constant 0 : index
    %61 = vector.load %arg13[%c0_38, %c0_39, %c0_40] : memref<1x1x512xf32, #tpu.memory_space<vmem>>, vector<1x1x512xf32>
    %62 = vector.shape_cast %61 : vector<1x1x512xf32> to vector<1x512xf32>
    %63 = vector.shape_cast %60 : vector<1x512xf32> to vector<1x1x512xf32>
    tpu.vector_store %arg13[%c0_38, %c0_39, %c0_40], %63 {strides = array<i32>} : memref<1x1x512xf32, #tpu.memory_space<vmem>>, vector<1x1x512xf32>,
    return
  }
  func.func @transform_0(%arg0: i32, %arg1: i32) -> (i32, i32, i32) {
    %c0_i32 = arith.constant 0 : i32
    %c0_i32_0 = arith.constant 0 : i32
    return %arg0, %c0_i32, %arg1 : i32, i32, i32
  }
  func.func @transform_1(%arg0: i32, %arg1: i32) -> (i32, i32) {
    %c0_i32 = arith.constant 0 : i32
    %c0_i32_0 = arith.constant 0 : i32
    %c0_i32_1 = arith.constant 0 : i32
    return %c0_i32, %c0_i32_0 : i32, i32
  }
  func.func @transform_2(%arg0: i32, %arg1: i32) -> (i32, i32) {
    %c0_i32 = arith.constant 0 : i32
    %c0_i32_0 = arith.constant 0 : i32
    %c0_i32_1 = arith.constant 0 : i32
    return %c0_i32, %c0_i32_0 : i32, i32
  }
  func.func @transform_3(%arg0: i32, %arg1: i32) -> (i32, i32) {
    %c0_i32 = arith.constant 0 : i32
    %c0_i32_0 = arith.constant 0 : i32
    %c0_i32_1 = arith.constant 0 : i32
    return %c0_i32, %c0_i32_0 : i32, i32
  }
  func.func @transform_4(%arg0: i32, %arg1: i32) -> (i32, i32) {
    %c0_i32 = arith.constant 0 : i32
    %c0_i32_0 = arith.constant 0 : i32
    %c0_i32_1 = arith.constant 0 : i32
    return %c0_i32, %c0_i32_0 : i32, i32
  }
  func.func @transform_5(%arg0: i32, %arg1: i32) -> (i32, i32) {
    %c0_i32 = arith.constant 0 : i32
    %c0_i32_0 = arith.constant 0 : i32
    %c0_i32_1 = arith.constant 0 : i32
    return %c0_i32, %c0_i32_0 : i32, i32
  }
  func.func @transform_6(%arg0: i32, %arg1: i32) -> (i32, i32) {
    %c0_i32 = arith.constant 0 : i32
    %c0_i32_0 = arith.constant 0 : i32
    %c0_i32_1 = arith.constant 0 : i32
    return %c0_i32, %c0_i32_0 : i32, i32
  }
  func.func @transform_7(%arg0: i32, %arg1: i32) -> (i32, i32) {
    %c0_i32 = arith.constant 0 : i32
    %c0_i32_0 = arith.constant 0 : i32
    %c0_i32_1 = arith.constant 0 : i32
    return %c0_i32, %c0_i32_0 : i32, i32
  }
  func.func @transform_8(%arg0: i32, %arg1: i32) -> (i32, i32) {
    %c0_i32 = arith.constant 0 : i32
    %c0_i32_0 = arith.constant 0 : i32
    %c0_i32_1 = arith.constant 0 : i32
    return %c0_i32, %c0_i32_0 : i32, i32
  }
  func.func @transform_9(%arg0: i32, %arg1: i32) -> (i32, i32) {
    %c0_i32 = arith.constant 0 : i32
    %c0_i32_0 = arith.constant 0 : i32
    %c0_i32_1 = arith.constant 0 : i32
    return %c0_i32, %c0_i32_0 : i32, i32
  }
  func.func @transform_10(%arg0: i32, %arg1: i32) -> (i32, i32, i32) {
    %c0_i32 = arith.constant 0 : i32
    %c0_i32_0 = arith.constant 0 : i32
    %c0_i32_1 = arith.constant 0 : i32
    return %arg0, %c0_i32, %c0_i32_0 : i32, i32, i32
  }
  func.func @transform_11(%arg0: i32, %arg1: i32) -> (i32, i32, i32) {
    %c0_i32 = arith.constant 0 : i32
    %c0_i32_0 = arith.constant 0 : i32
    return %arg0, %c0_i32, %arg1 : i32, i32, i32
  }
}

</mosaic_0001>

<bundles_post_ra>
// kernel: tpu_custom_call.1
= control target key start
LH: loop header
LB: loop body
LE: loop exit
PB: predicated region body
PF: predicated region fallthrough
CT: control target
= control target key end

     0   :  { %16 = vsyncpa [#allocation3], 0  ;;  %s4288_s0 = inlined_call_operand.vmem [shape: f32[2,8,512], index: 0, kind: input, shape index: {}]   ;;  %s4289_s1 = inlined_call_operand.vmem [shape: f32[64,8], index: 1, kind: input, shape index: {}]   ;;  %s4290_s2 = inlined_call_operand.vmem [shape: f32[64,64], index: 2, kind: input, shape index: {}]   ;;  %s4291_s3 = inlined_call_operand.vmem [shape: f32[64,64], index: 3, kind: input, shape index: {}]   ;;  %s4292_s4 = inlined_call_operand.vmem [shape: f32[32,64], index: 4, kind: input, shape index: {}]   ;;  %s4293_s5 = inlined_call_operand.vmem [shape: f32[64,32], index: 5, kind: input, shape index: {}]   ;;  %s4294_s6 = inlined_call_operand.vmem [shape: f32[64,8], index: 6, kind: input, shape index: {}]   ;;  %s4295_s7 = inlined_call_operand.vmem [shape: f32[64,64], index: 7, kind: input, shape index: {}]   ;;  %s4296_s8 = inlined_call_operand.vmem [shape: f32[64,64], index: 8, kind: input, shape index: {}]   ;;  %s4297_s9 = inlined_call_operand.vmem [shape: f32[1,64], index: 9, kind: input, shape index: {}]   ;;  %s4298_s10 = inlined_call_operand.vmem [shape: f32[2,424,1], index: 10, kind: input, shape index: {}]   ;;  %s4299_s11 = inlined_call_operand.hbm [shape: f32[2,1,512], index: 11, kind: output, shape index: {}]  }
   0x1   :  { %18 = vsyncpa [#allocation3 + $0x1], 0  ;;  %s3176_s17 = smov 0   ;;  %s3178_s18 = smov 0  }
   0x2   :  { %s3180_s19 = smov 0   ;;  %s3182_s20 = smov 0  }
   0x3   :  { %s3184_s21 = smov 0   ;;  %s3186_s22 = smov 0  }
   0x4 LB: > { %4302 = sst [smem:[#allocation5_spill]] %s3109_s21  ;;  %s2713_s23 = sadd.s32 4294967295, %s3113_s22   ;;  %s3113_s22 = sphi %s3186_s22, %s24_s22   ;;  %s3109_s21 = sphi %s3184_s21, %s4319_s21   ;;  %s3105_s20 = sphi %s3182_s20, %s4318_s20   ;;  %s3101_s19 = sphi %s3180_s19, %s4322_s19   ;;  %s3097_s18 = sphi %s3178_s18, %s4321_s18   ;;  %s3093_s17 = sphi %s3176_s17, %s4320_s17  }
   0x5   : > { %s2714_s24 = sadd.s32 4294967294, %s3113_s22   ;;  %s36_s25 = sadd.s32 1, %s3109_s21 }
   0x6   : > { %s288_s26 = sadd.s32 1, %s3101_s19  ;;  %p38_p0 = scmp.ge.s32.totalorder %s36_s25, 2 }
   0x7   : > { %p298_p1 = scmp.ne.s32.totalorder %s3101_s19, %s3097_s18  ;;  %p299_p2 = scmp.eq.s32.totalorder %s2713_s23, 1 }
   0x8   : > { %p304_p3 = scmp.ne.s32.totalorder %s3097_s18, %s3093_s17  ;;  %s4324_s25 = smov (%p38_p0, %s36_s25), 0 }
   0x9   : > { %4303 = sst [smem:[#allocation6_spill]] %s4324_s25  ;;  %p3216_p4 = por %p299_p2, %p298_p1 }
   0xa   : > { %p305_p5 = scmp.eq.s32.totalorder %s2714_s24, 1  ;;  %s283_s28 = ssub.s32 %s3109_s21, %s4324_s25 }
   0xb   : > { %p2717_p6 = scmp.ge.s32.totalorder %s3113_s22, 1  ;;  %p286_p7 = scmp.eq.s32.totalorder %s283_s28, 0 }
   0xc   : > { %p3223_p8 = por %p305_p5, %p304_p3  ;;  %p371_p9 = scmp.lt.s32.totalorder %s3113_s22, 3 }
   0xd   : > { %s3229_s30 = scalar_select %p286_p7, %s3101_s19, %s288_s26  }
   0xe   : > { %p372_p10 = pnand %p2717_p6, %p371_p9 }
  0x10   : > { %375 = sbr.rel (%p372_p10) target bundleno = 1587 (0x633), region = 64 }
  0x15   : > { %p421_p11 = scmp.lt.s32.totalorder %s3105_s20, 1  ;;  %v3115_v0 = vmov 0   ;;  %v493_v1 = vld [vmem:[%s4289_s1] sm:$0xff]  ;;  %vm541_vm0 = vcmask 64512   ;;  %v494_v12 = vld [vmem:[%s4289_s1 + $0x8] sm:$0xff]  ;;  %v495_v16 = vld [vmem:[%s4289_s1 + $0x10] sm:$0xff] }
  0x16   : > { %3030 = vset.pattern.permute.xlu2 %v3115_v0  ;;  %3029 = vset.pattern.permute.xlu1 %v3115_v0  ;;  %v496_v20 = vld [vmem:[%s4289_s1 + $0x18] sm:$0xff]  ;;  %v497_v24 = vld [vmem:[%s4289_s1 + $0x20] sm:$0xff]  ;;  %v498_v28 = vld [vmem:[%s4289_s1 + $0x28] sm:$0xff]  ;;  %vm810_vm1 = vcmask 523264   ;;  %vm1671_vm2 = vcmask 261120   ;;  %vm2596_vm3 = vcmask 1040384  }
  0x17   : > { %3028 = vset.pattern.permute.xlu0 %v3115_v0  ;;  %s422_s12 = scalar_select %p421_p11, %s3105_s20, 1  ;;  %v499_v32 = vld [vmem:[%s4289_s1 + $0x30] sm:$0xff]  ;;  %v500_v36 = vld [vmem:[%s4289_s1 + $0x38] sm:$0xff]  ;;  %vm2598_vm4 = vcmask 1042434   ;;  %vm2600_vm5 = vcmask 1041408  }
  0x18   : > { %s3055_s24 = scalar_lea.hbm %s4299_s11, 8 }
  0x19   : > { %s2970_s13 = sshll.u32 %s422_s12, 5  ;;  %s2971_s14 = smul.u32 424, %s422_s12 }
  0x1a   : > { %s3236_s23 = scalar_lea.vmem %s4288_s0, %s2970_s13 }
  0x1b   : > { %s3244_s21 = scalar_lea.vmem %s4298_s10, %s2971_s14  ;;  %v489_v2 = vld [vmem:[%s3236_s23] sm:$0xff]  ;;  %v490_v3 = vld [vmem:[%s3236_s23 + $0x8] sm:$0xff]  ;;  %v491_v4 = vld [vmem:[%s3236_s23 + $0x10] sm:$0xff] }
  0x1c   : > { %581 = vmatpush.msra.mxu0 %v489_v2  ;;  %622 = vmatpush.msra.mxu1 %v490_v3  ;;  %v492_v5 = vld [vmem:[%s3236_s23 + $0x18] sm:$0xff]  ;;  %v441_v7 = vld [vmem:[%s3244_s21 + $0x28] sm:$0xff]  ;;  %v442_v9 = vld [vmem:[%s3244_s21 + $0x30] sm:$0xff] }
  0x1d   : > { %v443_v6 = vld [vmem:[%s3244_s21 + $0x38] sm:$0xff]  ;;  %663 = vmatpush.msra.mxu2 %v491_v4  ;;  %704 = vmatpush.msra.mxu3 %v492_v5  ;;  %v440_v10 = vld [vmem:[%s3244_s21 + $0x20] sm:$0xff]  ;;  %v438_v11 = vld [vmem:[%s3244_s21 + $0x10] sm:$0xff] }
  0x1e   : > { %v439_v8 = vld [vmem:[%s3244_s21 + $0x18] sm:$0xff]  ;;  %538 = vperm.xlu0 %3028, %v443_v6   ;;  %528 = vperm.xlu1 %3029, %v441_v7   ;;  %v437_v13 = vld [vmem:[%s3244_s21 + $0x8] sm:$0xff]  ;;  %v436_v14 = vld [vmem:[%s3244_s21] sm:$0xff] }
  0x1f   : > { %518 = vperm.xlu2 %3030, %v439_v8   ;;  %2722 = vmatmul.msk.f32.vlgmr.msra.gmra.mxu0 %vm541_vm0, %v493_v1  ;;  %v451_v15 = vld [vmem:[%s3244_s21 + $0x78] sm:$0xff]  ;;  %v450_v17 = vld [vmem:[%s3244_s21 + $0x70] sm:$0xff]  ;;  %v449_v18 = vld [vmem:[%s3244_s21 + $0x68] sm:$0xff] }
  0x20   : > { %2730 = vmatmul.msk.f32.vlgmr.msra.gmra.mxu1 %vm541_vm0, %v493_v1  ;;  %2738 = vmatmul.msk.f32.vlgmr.msra.gmra.mxu2 %vm541_vm0, %v493_v1  ;;  %v448_v19 = vld [vmem:[%s3244_s21 + $0x60] sm:$0xff]  ;;  %v447_v21 = vld [vmem:[%s3244_s21 + $0x58] sm:$0xff]  ;;  %v446_v22 = vld [vmem:[%s3244_s21 + $0x50] sm:$0xff] }
  0x21   : > { %2746 = vmatmul.msk.f32.vlgmr.msra.gmra.mxu3 %vm541_vm0, %v493_v1  ;;  %v445_v23 = vld [vmem:[%s3244_s21 + $0x48] sm:$0xff]  ;;  %v444_v25 = vld [vmem:[%s3244_s21 + $0x40] sm:$0xff]  ;;  %v459_v26 = vld [vmem:[%s3244_s21 + $0xb8] sm:$0xff] }
  0x22   : > { %v458_v27 = vld [vmem:[%s3244_s21 + $0xb0] sm:$0xff]  ;;  %v457_v29 = vld [vmem:[%s3244_s21 + $0xa8] sm:$0xff]  ;;  %v456_v30 = vld [vmem:[%s3244_s21 + $0xa0] sm:$0xff] }
  0x23   : > { %v455_v31 = vld [vmem:[%s3244_s21 + $0x98] sm:$0xff]  ;;  %v454_v33 = vld [vmem:[%s3244_s21 + $0x90] sm:$0xff]  ;;  %v453_v34 = vld [vmem:[%s3244_s21 + $0x88] sm:$0xff] }
  0x24   : > { %v452_v35 = vld [vmem:[%s3244_s21 + $0x80] sm:$0xff]  ;;  %v463_v37 = vld [vmem:[%s3244_s21 + $0xd8] sm:$0xff]  ;;  %v462_v38 = vld [vmem:[%s3244_s21 + $0xd0] sm:$0xff] }
  0x25   : > { %v461_v39 = vld [vmem:[%s3244_s21 + $0xc8] sm:$0xff]  ;;  %v460_v40 = vld [vmem:[%s3244_s21 + $0xc0] sm:$0xff]  ;;  %v471_v41 = vld [vmem:[%s3244_s21 + $0x118] sm:$0xff] }
  0x26   : > { %533 = vperm.xlu0 %3028, %v442_v9   ;;  %523 = vperm.xlu1 %3029, %v440_v10   ;;  %v470_v42 = vld [vmem:[%s3244_s21 + $0x110] sm:$0xff]  ;;  %v469_v43 = vld [vmem:[%s3244_s21 + $0x108] sm:$0xff]  ;;  %v468_v44 = vld [vmem:[%s3244_s21 + $0x100] sm:$0xff] }
  0x27   : > { %513 = vperm.xlu2 %3030, %v438_v11   ;;  %2723 = vmatmul.msk.f32.gmra.mxu0 %vm541_vm0, %v494_v12  ;;  %v467_v45 = vld [vmem:[%s3244_s21 + $0xf8] sm:$0xff]  ;;  %v466_v46 = vld [vmem:[%s3244_s21 + $0xf0] sm:$0xff]  ;;  %v465_v47 = vld [vmem:[%s3244_s21 + $0xe8] sm:$0xff] }
  0x28   : > { %2731 = vmatmul.msk.f32.gmra.mxu1 %vm541_vm0, %v494_v12  ;;  %2739 = vmatmul.msk.f32.gmra.mxu2 %vm541_vm0, %v494_v12  ;;  %v464_v48 = vld [vmem:[%s3244_s21 + $0xe0] sm:$0xff]  ;;  %v479_v49 = vld [vmem:[%s3244_s21 + $0x158] sm:$0xff]  ;;  %v478_v50 = vld [vmem:[%s3244_s21 + $0x150] sm:$0xff] }
  0x29   : > { %2747 = vmatmul.msk.f32.gmra.mxu3 %vm541_vm0, %v494_v12  ;;  %v477_v51 = vld [vmem:[%s3244_s21 + $0x148] sm:$0xff]  ;;  %v476_v52 = vld [vmem:[%s3244_s21 + $0x140] sm:$0xff]  ;;  %v475_v53 = vld [vmem:[%s3244_s21 + $0x138] sm:$0xff] }
  0x2a   : > { %v474_v54 = vld [vmem:[%s3244_s21 + $0x130] sm:$0xff]  ;;  %v473_v55 = vld [vmem:[%s3244_s21 + $0x128] sm:$0xff]  ;;  %v472_v56 = vld [vmem:[%s3244_s21 + $0x120] sm:$0xff] }
  0x2b   : > { %v487_v57 = vld [vmem:[%s3244_s21 + $0x198] sm:$0xff]  ;;  %v486_v58 = vld [vmem:[%s3244_s21 + $0x190] sm:$0xff]  ;;  %v485_v59 = vld [vmem:[%s3244_s21 + $0x188] sm:$0xff] }
  0x2c   : > { %v484_v60 = vld [vmem:[%s3244_s21 + $0x180] sm:$0xff]  ;;  %v483_v61 = vld [vmem:[%s3244_s21 + $0x178] sm:$0xff]  ;;  %v482_v62 = vld [vmem:[%s3244_s21 + $0x170] sm:$0xff] }
  0x2d   : > { %v481_v0 = vld [vmem:[%s3244_s21 + $0x168] sm:$0xff]  ;;  %v480_v3 = vld [vmem:[%s3244_s21 + $0x160] sm:$0xff] }
  0x2e   : > { %508 = vperm.xlu0 %3028, %v437_v13   ;;  %503 = vperm.xlu1 %3029, %v436_v14   ;;  %v488_v4 = vld [vmem:[%s3244_s21 + $0x1a0] sm:$0xff]  ;;  %s417_s21 = sand.u32 1, %s3097_s18  }
  0x2f   : > { %807 = vperm.xlu2 %3030, %v451_v15   ;;  %2724 = vmatmul.msk.f32.gmra.mxu0 %vm541_vm0, %v495_v16  ;;  %s2718_s16 = sshll.u32 %s417_s21, 2 }
  0x30   : > { %2732 = vmatmul.msk.f32.gmra.mxu1 %vm541_vm0, %v495_v16  ;;  %2740 = vmatmul.msk.f32.gmra.mxu2 %vm541_vm0, %v495_v16  ;;  %s419_s25 = scalar_lea.vmem [#allocation2], %s2718_s16 }
  0x31   : > { %2748 = vmatmul.msk.f32.gmra.mxu3 %vm541_vm0, %v495_v16  ;;  %s2623_s12 = sshll.u32 %s419_s25, 4  ;;  %s2624_s12 = int_to_ptr.vmem [resolvable:$true] %s2623_s12 }
  0x36   : > { %802 = vperm.xlu0 %3028, %v450_v17   ;;  %797 = vperm.xlu1 %3029, %v449_v18  }
  0x37   : > { %792 = vperm.xlu2 %3030, %v448_v19   ;;  %2725 = vmatmul.msk.f32.gmra.mxu0 %vm541_vm0, %v496_v20 }
  0x38   : > { %2733 = vmatmul.msk.f32.gmra.mxu1 %vm541_vm0, %v496_v20  ;;  %2741 = vmatmul.msk.f32.gmra.mxu2 %vm541_vm0, %v496_v20 }
  0x39   : > { %2749 = vmatmul.msk.f32.gmra.mxu3 %vm541_vm0, %v496_v20 }
  0x3e   : > { %787 = vperm.xlu0 %3028, %v447_v21   ;;  %782 = vperm.xlu1 %3029, %v446_v22  }
  0x3f   : > { %777 = vperm.xlu2 %3030, %v445_v23   ;;  %2726 = vmatmul.msk.f32.gmra.mxu0 %vm541_vm0, %v497_v24 }
  0x40   : > { %2734 = vmatmul.msk.f32.gmra.mxu1 %vm541_vm0, %v497_v24  ;;  %2742 = vmatmul.msk.f32.gmra.mxu2 %vm541_vm0, %v497_v24 }
  0x41   : > { %2750 = vmatmul.msk.f32.gmra.mxu3 %vm541_vm0, %v497_v24 }
  0x46   : > { %772 = vperm.xlu0 %3028, %v444_v25   ;;  %1076 = vperm.xlu1 %3029, %v459_v26  }
  0x47   : > { %1071 = vperm.xlu2 %3030, %v458_v27   ;;  %2727 = vmatmul.msk.f32.gmra.mxu0 %vm541_vm0, %v498_v28 }
  0x48   : > { %2735 = vmatmul.msk.f32.gmra.mxu1 %vm541_vm0, %v498_v28  ;;  %2743 = vmatmul.msk.f32.gmra.mxu2 %vm541_vm0, %v498_v28 }
  0x49   : > { %2751 = vmatmul.msk.f32.gmra.mxu3 %vm541_vm0, %v498_v28 }
  0x4e   : > { %1066 = vperm.xlu0 %3028, %v457_v29   ;;  %1061 = vperm.xlu1 %3029, %v456_v30  }
  0x4f   : > { %1056 = vperm.xlu2 %3030, %v455_v31   ;;  %2728 = vmatmul.msk.f32.gmra.mxu0 %vm541_vm0, %v499_v32 }
  0x50   : > { %2736 = vmatmul.msk.f32.gmra.mxu1 %vm541_vm0, %v499_v32  ;;  %2744 = vmatmul.msk.f32.gmra.mxu2 %vm541_vm0, %v499_v32 }
  0x51   : > { %2752 = vmatmul.msk.f32.gmra.mxu3 %vm541_vm0, %v499_v32 }
  0x56   : > { %1051 = vperm.xlu0 %3028, %v454_v33   ;;  %1046 = vperm.xlu1 %3029, %v453_v34  }
  0x57   : > { %1041 = vperm.xlu2 %3030, %v452_v35   ;;  %2729 = vmatmul.msk.f32.gmra.mxu0 %vm541_vm0, %v500_v36 }
  0x58   : > { %2737 = vmatmul.msk.f32.gmra.mxu1 %vm541_vm0, %v500_v36  ;;  %2745 = vmatmul.msk.f32.gmra.mxu2 %vm541_vm0, %v500_v36 }
  0x59   : > { %2753 = vmatmul.msk.f32.gmra.mxu3 %vm541_vm0, %v500_v36 }
  0x5e   : > { %1320 = vperm.xlu0 %3028, %v463_v37   ;;  %1315 = vperm.xlu1 %3029, %v462_v38  }
  0x5f   : > { %1310 = vperm.xlu2 %3030, %v461_v39  }
  0x66   : > { %1305 = vperm.xlu0 %3028, %v460_v40   ;;  %1897 = vperm.xlu1 %3029, %v471_v41  }
  0x67   : > { %1892 = vperm.xlu2 %3030, %v470_v42  }
  0x6e   : > { %1887 = vperm.xlu0 %3028, %v469_v43   ;;  %1882 = vperm.xlu1 %3029, %v468_v44  }
  0x6f   : > { %1877 = vperm.xlu2 %3030, %v467_v45  }
  0x76   : > { %1872 = vperm.xlu0 %3028, %v466_v46   ;;  %1867 = vperm.xlu1 %3029, %v465_v47  }
  0x77   : > { %1862 = vperm.xlu2 %3030, %v464_v48  }
  0x79   : > { %v3382_v30 = vpop.permute.xlu2 %518 }
  0x7e   : > { %2009 = vperm.xlu0 %3028, %v479_v49   ;;  %2004 = vperm.xlu1 %3029, %v478_v50  }
  0x7f   : > { %1999 = vperm.xlu2 %3030, %v477_v51  }
  0x86   : > { %1994 = vperm.xlu0 %3028, %v476_v52   ;;  %1989 = vperm.xlu1 %3029, %v475_v53   ;;  %v514_v53 = vpop.permute.xlu2 %513 }
  0x87   : > { %1984 = vperm.xlu2 %3030, %v474_v54  }
  0x8e   : > { %1979 = vperm.xlu0 %3028, %v473_v55   ;;  %1974 = vperm.xlu1 %3029, %v472_v56  }
  0x8f   : > { %2277 = vperm.xlu2 %3030, %v487_v57  }
  0x90   : > { %v539_v24 = vpop.permute.xlu0 %538  ;;  %v529_v25 = vpop.permute.xlu1 %528 }
  0x96   : > { %2272 = vperm.xlu0 %3028, %v486_v58   ;;  %2267 = vperm.xlu1 %3029, %v485_v59  }
  0x97   : > { %2262 = vperm.xlu2 %3030, %v484_v60  }
  0x98   : > { %v534_v31 = vpop.permute.xlu0 %533  ;;  %v524_v39 = vpop.permute.xlu1 %523 }
  0x9c   : > { %v3353_v63 = vpop.f32.mrf.mxu0 }
  0x9d   : > { %v3356_v1 = vpop.f32.mrf.mxu1 }
  0x9e   : > { %2257 = vperm.xlu0 %3028, %v483_v61   ;;  %2252 = vperm.xlu1 %3029, %v482_v62  }
  0x9f   : > { %2247 = vperm.xlu2 %3030, %v481_v0  }
  0xa3   : > { %v3358_v2 = vpop.f32.mrf.mxu2 }
  0xa4   : > { %v3362_v5 = vpop.f32.mrf.mxu3  ;;  %v3364_v6 = vpop.f32.mrf.mxu0 }
  0xa5   : > { %v3366_v7 = vpop.f32.mrf.mxu1 }
  0xa6   : > { %2242 = vperm.xlu0 %3028, %v480_v3   ;;  %2503 = vperm.xlu1 %3029, %v488_v4   ;;  %v509_v3 = vpop.permute.xlu0 %508 }
  0xab   : > { %v3368_v8 = vpop.f32.mrf.mxu2 }
  0xac   : > { %v3370_v9 = vpop.f32.mrf.mxu3  ;;  %v589_v10 = vpop.f32.mrf.mxu0 }
  0xad   : > { %v630_v11 = vpop.f32.mrf.mxu1  ;;  %v590_v55 = vadd.f32 %v589_v10, %v514_v53 }
  0xae   : > { %v631_v56 = vadd.f32 %v630_v11, %v514_v53  ;;  %v504_v11 = vpop.permute.xlu1 %503 }
  0xb3   : > { %v3372_v12 = vpop.f32.mrf.mxu2 }
  0xb4   : > { %v3374_v13 = vpop.f32.mrf.mxu3  ;;  %v592_v14 = vpop.f32.mrf.mxu0 }
  0xb5   : > { %v633_v15 = vpop.f32.mrf.mxu1  ;;  %v593_v45 = vadd.f32 %v592_v14, %v3382_v30 }
  0xb6   : > { %v634_v49 = vadd.f32 %v633_v15, %v3382_v30 }
  0xb7   : > { %v742_v0 = vmax.f32 %v593_v45, 0.0  ;;  %v765_v45 = vld [vmem:[%s4290_s2 + $0x18] sm:$0xff] }
  0xbb   : > { %v3376_v16 = vpop.f32.mrf.mxu2 }
  0xbc   : > { %v3378_v17 = vpop.f32.mrf.mxu3  ;;  %v595_v18 = vpop.f32.mrf.mxu0 }
  0xbd   : > { %v636_v19 = vpop.f32.mrf.mxu1  ;;  %v596_v46 = vadd.f32 %v595_v18, %v524_v39  ;;  %v743_v18 = vmax.f32 %v634_v49, 0.0  ;;  %v769_v49 = vld [vmem:[%s4290_s2 + $0x38] sm:$0xff] }
  0xbe   : > { %v637_v50 = vadd.f32 %v636_v19, %v524_v39  ;;  %v587_v19 = vadd.f32 %v3364_v6, %v509_v3  ;;  %v675_v6 = vadd.f32 %v3376_v16, %v3382_v30  ;;  %v713_v16 = vadd.f32 %v3374_v13, %v514_v53 }
  0xbf   : > { %v746_v62 = vmax.f32 %v596_v46, 0.0  ;;  %v766_v46 = vld [vmem:[%s4290_s2 + $0x20] sm:$0xff] }
  0xc0   : > { %v747_v14 = vmax.f32 %v637_v50, 0.0 }
  0xc3   : > { %v677_v20 = vpop.f32.mrf.mxu2 }
  0xc4   : > { %v3380_v21 = vpop.f32.mrf.mxu3  ;;  %v598_v22 = vpop.f32.mrf.mxu0 }
  0xc5   : > { %v639_v23 = vpop.f32.mrf.mxu1  ;;  %v599_v35 = vadd.f32 %v598_v22, %v529_v25 }
  0xc6   : > { %v640_v40 = vadd.f32 %v639_v23, %v529_v25  ;;  %v628_v23 = vadd.f32 %v3366_v7, %v509_v3  ;;  %v625_v7 = vadd.f32 %v3356_v1, %v504_v11  ;;  %v669_v1 = vadd.f32 %v3368_v8, %v509_v3 }
  0xc7   : > { %v750_v48 = vmax.f32 %v599_v35, 0.0  ;;  %v707_v8 = vadd.f32 %v3362_v5, %v504_v11  ;;  %v764_v5 = vld [vmem:[%s4290_s2 + $0x10] sm:$0xff] }
  0xc8   : > { %v751_v52 = vmax.f32 %v640_v40, 0.0 }
  0xcb   : > { %v680_v26 = vpop.f32.mrf.mxu2 }
  0xcc   : > { %v721_v27 = vpop.f32.mrf.mxu3  ;;  %v601_v28 = vpop.f32.mrf.mxu0  ;;  %v681_v4 = vadd.f32 %v680_v26, %v529_v25 }
  0xcd   : > { %v642_v29 = vpop.f32.mrf.mxu1  ;;  %v602_v36 = vadd.f32 %v601_v28, %v534_v31  ;;  %v722_v22 = vadd.f32 %v721_v27, %v529_v25  ;;  %v678_v28 = vadd.f32 %v677_v20, %v524_v39  ;;  %v739_v25 = vmax.f32 %v631_v56, 0.0 }
  0xce   : > { %v643_v41 = vadd.f32 %v642_v29, %v534_v31  ;;  %v719_v29 = vadd.f32 %v3380_v21, %v524_v39  ;;  %v752_v27 = vmax.f32 %v681_v4, 0.0  ;;  %v716_v20 = vadd.f32 %v3378_v17, %v3382_v30 }
  0xcf   : > { %v754_v47 = vmax.f32 %v602_v36, 0.0  ;;  %v753_v21 = vmax.f32 %v722_v22, 0.0  ;;  %v748_v35 = vmax.f32 %v678_v28, 0.0  ;;  %v731_v17 = vmax.f32 %v625_v7, 0.0 }
  0xd0   : > { %v755_v51 = vmax.f32 %v643_v41, 0.0  ;;  %v749_v36 = vmax.f32 %v719_v29, 0.0  ;;  %v744_v30 = vmax.f32 %v675_v6, 0.0  ;;  %v745_v13 = vmax.f32 %v716_v20, 0.0 }
  0xd1   : > { %v666_v39 = vadd.f32 %v3358_v2, %v504_v11  ;;  %v741_v41 = vmax.f32 %v713_v16, 0.0  ;;  %v763_v2 = vld [vmem:[%s4290_s2 + $0x8] sm:$0xff] }
  0xd3   : > { %v683_v32 = vpop.f32.mrf.mxu2 }
  0xd4   : > { %v724_v33 = vpop.f32.mrf.mxu3  ;;  %v604_v34 = vpop.f32.mrf.mxu0  ;;  %v684_v57 = vadd.f32 %v683_v32, %v534_v31  ;;  %v584_v32 = vadd.f32 %v3353_v63, %v504_v11  ;;  %v735_v63 = vmax.f32 %v628_v23, 0.0 }
  0xd5   : > { %v605_v37 = vadd.f32 %v604_v34, %v539_v24  ;;  %v645_v38 = vpop.f32.mrf.mxu1  ;;  %v725_v60 = vadd.f32 %v724_v33, %v534_v31  ;;  %v738_v31 = vmax.f32 %v590_v55, 0.0  ;;  %v734_v33 = vmax.f32 %v587_v19, 0.0  ;;  %v808_v11 = vpop.permute.xlu2 %807 }
  0xd6   : > { %v646_v42 = vadd.f32 %v645_v38, %v539_v24  ;;  %v672_v34 = vadd.f32 %v3372_v12, %v514_v53  ;;  %v762_v12 = vld [vmem:[%s4290_s2] sm:$0xff]  ;;  %v710_v38 = vadd.f32 %v3370_v9, %v509_v3  ;;  %v803_v23 = vpop.permute.xlu0 %802 }
  0xd7   : > { %v758_v43 = vmax.f32 %v605_v37, 0.0  ;;  %v757_v26 = vmax.f32 %v725_v60, 0.0  ;;  %v730_v37 = vmax.f32 %v584_v32, 0.0 }
  0xd8   : > { %v759_v44 = vmax.f32 %v646_v42, 0.0  ;;  %v740_v40 = vmax.f32 %v672_v34, 0.0  ;;  %v736_v42 = vmax.f32 %v669_v1, 0.0  ;;  %v737_v9 = vmax.f32 %v710_v38, 0.0 }
  0xd9   : > { %843 = vmatpush.msrb.mxu0 %v758_v43  ;;  %v732_v43 = vmax.f32 %v666_v39, 0.0 }
  0xda   : > { %884 = vmatpush.msrb.mxu1 %v759_v44  ;;  %v733_v44 = vmax.f32 %v707_v8, 0.0 }
  0xdb   : > { %v686_v54 = vpop.f32.mrf.mxu2  ;;  %844 = vmatpush.msrb.mxu0 %v754_v47  ;;  %v767_v47 = vld [vmem:[%s4290_s2 + $0x28] sm:$0xff] }
  0xdc   : > { %v687_v58 = vadd.f32 %v686_v54, %v539_v24  ;;  %v727_v59 = vpop.f32.mrf.mxu3  ;;  %885 = vmatpush.msrb.mxu1 %v755_v51 }
  0xdd   : > { %v728_v61 = vadd.f32 %v727_v59, %v539_v24  ;;  %845 = vmatpush.msrb.mxu0 %v750_v48  ;;  %v756_v24 = vmax.f32 %v684_v57, 0.0  ;;  %v768_v48 = vld [vmem:[%s4290_s2 + $0x30] sm:$0xff]  ;;  %v3483_v32 = vpop.permute.xlu2 %792 }
  0xde   : > { %886 = vmatpush.msrb.mxu1 %v751_v52  ;;  %v760_v15 = vmax.f32 %v687_v58, 0.0  ;;  %v3485_v20 = vpop.permute.xlu0 %787 }
  0xdf   : > { %846 = vmatpush.msrb.mxu0 %v746_v62  ;;  %v761_v10 = vmax.f32 %v728_v61, 0.0 }
  0xe0   : > { %887 = vmatpush.msrb.mxu1 %v747_v14  ;;  %925 = vmatpush.msrb.mxu2 %v760_v15 }
  0xe1   : > { %966 = vmatpush.msrb.mxu3 %v761_v10  ;;  %847 = vmatpush.msrb.mxu0 %v742_v0 }
  0xe2   : > { %888 = vmatpush.msrb.mxu1 %v743_v18  ;;  %926 = vmatpush.msrb.mxu2 %v756_v24 }
  0xe3   : > { %967 = vmatpush.msrb.mxu3 %v757_v26  ;;  %848 = vmatpush.msrb.mxu0 %v738_v31  ;;  %v798_v31 = vpop.permute.xlu1 %797 }
  0xe4   : > { %889 = vmatpush.msrb.mxu1 %v739_v25  ;;  %927 = vmatpush.msrb.mxu2 %v752_v27 }
  0xe5   : > { %968 = vmatpush.msrb.mxu3 %v753_v21  ;;  %849 = vmatpush.msrb.mxu0 %v734_v33 }
  0xe6   : > { %890 = vmatpush.msrb.mxu1 %v735_v63  ;;  %928 = vmatpush.msrb.mxu2 %v748_v35 }
  0xe7   : > { %969 = vmatpush.msrb.mxu3 %v749_v36  ;;  %850 = vmatpush.msrb.mxu0 %v730_v37 }
  0xe8   : > { %891 = vmatpush.msrb.mxu1 %v731_v17  ;;  %929 = vmatpush.msrb.mxu2 %v744_v30 }
  0xe9   : > { %970 = vmatpush.msrb.mxu3 %v745_v13  ;;  %2754 = vmatmul.msk.f32.vlgmr.msrb.gmra.mxu0 %vm810_vm1, %v762_v12 }
  0xea   : > { %2762 = vmatmul.msk.f32.vlgmr.msrb.gmra.mxu1 %vm810_vm1, %v762_v12  ;;  %930 = vmatpush.msrb.mxu2 %v740_v40 }
  0xeb   : > { %971 = vmatpush.msrb.mxu3 %v741_v41  ;;  %v783_v39 = vpop.permute.xlu1 %782 }
  0xec   : > { %931 = vmatpush.msrb.mxu2 %v736_v42 }
  0xed   : > { %972 = vmatpush.msrb.mxu3 %v737_v9  ;;  %v778_v9 = vpop.permute.xlu2 %777 }
  0xee   : > { %932 = vmatpush.msrb.mxu2 %v732_v43 }
  0xef   : > { %973 = vmatpush.msrb.mxu3 %v733_v44  ;;  %2770 = vmatmul.msk.f32.vlgmr.msrb.gmra.mxu2 %vm810_vm1, %v762_v12 }
  0xf0   : > { %2778 = vmatmul.msk.f32.vlgmr.msrb.gmra.mxu3 %vm810_vm1, %v762_v12 }
  0xf1   : > { %2755 = vmatmul.msk.f32.gmra.mxu0 %vm810_vm1, %v763_v2 }
  0xf2   : > { %2763 = vmatmul.msk.f32.gmra.mxu1 %vm810_vm1, %v763_v2 }
  0xf7   : > { %2771 = vmatmul.msk.f32.gmra.mxu2 %vm810_vm1, %v763_v2 }
  0xf8   : > { %2779 = vmatmul.msk.f32.gmra.mxu3 %vm810_vm1, %v763_v2 }
  0xf9   : > { %2756 = vmatmul.msk.f32.gmra.mxu0 %vm810_vm1, %v764_v5 }
  0xfa   : > { %2764 = vmatmul.msk.f32.gmra.mxu1 %vm810_vm1, %v764_v5 }
  0xff   : > { %2772 = vmatmul.msk.f32.gmra.mxu2 %vm810_vm1, %v764_v5 }
 0x100   : > { %2780 = vmatmul.msk.f32.gmra.mxu3 %vm810_vm1, %v764_v5 }
 0x101   : > { %2757 = vmatmul.msk.f32.gmra.mxu0 %vm810_vm1, %v765_v45 }
 0x102   : > { %2765 = vmatmul.msk.f32.gmra.mxu1 %vm810_vm1, %v765_v45 }
 0x107   : > { %2773 = vmatmul.msk.f32.gmra.mxu2 %vm810_vm1, %v765_v45 }
 0x108   : > { %2781 = vmatmul.msk.f32.gmra.mxu3 %vm810_vm1, %v765_v45  ;;  %v773_v45 = vpop.permute.xlu0 %772 }
 0x109   : > { %2758 = vmatmul.msk.f32.gmra.mxu0 %vm810_vm1, %v766_v46 }
 0x10a   : > { %2766 = vmatmul.msk.f32.gmra.mxu1 %vm810_vm1, %v766_v46 }
 0x10f   : > { %2774 = vmatmul.msk.f32.gmra.mxu2 %vm810_vm1, %v766_v46 }
 0x110   : > { %2782 = vmatmul.msk.f32.gmra.mxu3 %vm810_vm1, %v766_v46 }
 0x111   : > { %2759 = vmatmul.msk.f32.gmra.mxu0 %vm810_vm1, %v767_v47 }
 0x112   : > { %2767 = vmatmul.msk.f32.gmra.mxu1 %vm810_vm1, %v767_v47 }
 0x117   : > { %2775 = vmatmul.msk.f32.gmra.mxu2 %vm810_vm1, %v767_v47 }
 0x118   : > { %2783 = vmatmul.msk.f32.gmra.mxu3 %vm810_vm1, %v767_v47 }
 0x119   : > { %2760 = vmatmul.msk.f32.gmra.mxu0 %vm810_vm1, %v768_v48 }
 0x11a   : > { %2768 = vmatmul.msk.f32.gmra.mxu1 %vm810_vm1, %v768_v48 }
 0x11f   : > { %2776 = vmatmul.msk.f32.gmra.mxu2 %vm810_vm1, %v768_v48 }
 0x120   : > { %2784 = vmatmul.msk.f32.gmra.mxu3 %vm810_vm1, %v768_v48 }
 0x121   : > { %2761 = vmatmul.msk.f32.gmra.mxu0 %vm810_vm1, %v769_v49 }
 0x122   : > { %2769 = vmatmul.msk.f32.gmra.mxu1 %vm810_vm1, %v769_v49 }
 0x127   : > { %2777 = vmatmul.msk.f32.gmra.mxu2 %vm810_vm1, %v769_v49 }
 0x128   : > { %2785 = vmatmul.msk.f32.gmra.mxu3 %vm810_vm1, %v769_v49 }
 0x166   : > { %v3457_v50 = vpop.f32.mrf.mxu0 }
 0x167   : > { %v3459_v51 = vpop.f32.mrf.mxu1  ;;  %v853_v49 = vadd.f32 %v3457_v50, %v773_v45 }
 0x169   : > { %v999_v50 = vmax.f32 %v853_v49, 0.0 }
 0x16e   : > { %v855_v52 = vpop.f32.mrf.mxu0 }
 0x16f   : > { %v3461_v53 = vpop.f32.mrf.mxu1  ;;  %v856_v2 = vadd.f32 %v855_v52, %v778_v9 }
 0x170   : > { %v897_v46 = vadd.f32 %v3461_v53, %v778_v9 }
 0x172   : > { %v3463_v54 = vpop.f32.mrf.mxu2  ;;  %v1004_v53 = vmax.f32 %v897_v46, 0.0 }
 0x173   : > { %v3465_v55 = vpop.f32.mrf.mxu3 }
 0x176   : > { %v858_v56 = vpop.f32.mrf.mxu0 }
 0x177   : > { %v899_v57 = vpop.f32.mrf.mxu1  ;;  %v859_v41 = vadd.f32 %v858_v56, %v783_v39 }
 0x178   : > { %v900_v43 = vadd.f32 %v899_v57, %v783_v39  ;;  %v894_v57 = vadd.f32 %v3459_v51, %v773_v45 }
 0x17a   : > { %v3467_v58 = vpop.f32.mrf.mxu2 }
 0x17b   : > { %v3469_v59 = vpop.f32.mrf.mxu3 }
 0x17e   : > { %v861_v60 = vpop.f32.mrf.mxu0 }
 0x17f   : > { %v902_v61 = vpop.f32.mrf.mxu1  ;;  %v862_v38 = vadd.f32 %v861_v60, %v3485_v20  ;;  %v1007_v60 = vmax.f32 %v859_v41, 0.0 }
 0x180   : > { %v903_v40 = vadd.f32 %v902_v61, %v3485_v20 }
 0x181   : > { %v1011_v5 = vmax.f32 %v862_v38, 0.0  ;;  %v1038_v38 = vld [vmem:[%s4291_s3 + $0x38] sm:$0xff] }
 0x182   : > { %v3471_v62 = vpop.f32.mrf.mxu2  ;;  %v1012_v47 = vmax.f32 %v903_v40, 0.0 }
 0x183   : > { %v3473_v0 = vpop.f32.mrf.mxu3 }
 0x186   : > { %v864_v3 = vpop.f32.mrf.mxu0 }
 0x187   : > { %v905_v4 = vpop.f32.mrf.mxu1  ;;  %v865_v37 = vadd.f32 %v864_v3, %v3483_v32 }
 0x188   : > { %v906_v30 = vadd.f32 %v905_v4, %v3483_v32  ;;  %v1008_v4 = vmax.f32 %v900_v43, 0.0 }
 0x189   : > { %v1015_v42 = vmax.f32 %v865_v37, 0.0 }
 0x18a   : > { %v3475_v14 = vpop.f32.mrf.mxu2  ;;  %v1016_v44 = vmax.f32 %v906_v30, 0.0  ;;  %v1036_v30 = vld [vmem:[%s4291_s3 + $0x28] sm:$0xff] }
 0x18b   : > { %v3477_v15 = vpop.f32.mrf.mxu3 }
 0x18e   : > { %v867_v18 = vpop.f32.mrf.mxu0 }
 0x18f   : > { %v908_v19 = vpop.f32.mrf.mxu1  ;;  %v868_v34 = vadd.f32 %v867_v18, %v798_v31 }
 0x190   : > { %v909_v35 = vadd.f32 %v908_v19, %v798_v31  ;;  %v1003_v19 = vmax.f32 %v856_v2, 0.0 }
 0x191   : > { %v1019_v13 = vmax.f32 %v868_v34, 0.0 }
 0x192   : > { %v3479_v22 = vpop.f32.mrf.mxu2  ;;  %v1020_v8 = vmax.f32 %v909_v35, 0.0  ;;  %v935_v35 = vadd.f32 %v3463_v54, %v773_v45 }
 0x193   : > { %v3481_v10 = vpop.f32.mrf.mxu3  ;;  %v947_v51 = vadd.f32 %v3479_v22, %v3483_v32 }
 0x196   : > { %v870_v28 = vpop.f32.mrf.mxu0 }
 0x197   : > { %v911_v24 = vpop.f32.mrf.mxu1  ;;  %v871_v25 = vadd.f32 %v870_v28, %v803_v23 }
 0x198   : > { %v912_v21 = vadd.f32 %v911_v24, %v803_v23 }
 0x199   : > { %v1023_v1 = vmax.f32 %v871_v25, 0.0 }
 0x19a   : > { %v949_v29 = vpop.f32.mrf.mxu2  ;;  %v1024_v12 = vmax.f32 %v912_v21, 0.0 }
 0x19b   : > { %v990_v26 = vpop.f32.mrf.mxu3  ;;  %v950_v24 = vadd.f32 %v949_v29, %v798_v31  ;;  %v1031_v29 = vld [vmem:[%s4291_s3] sm:$0xff] }
 0x19d   : > { %v1021_v21 = vmax.f32 %v950_v24, 0.0 }
 0x19e   : > { %v873_v6 = vpop.f32.mrf.mxu0 }
 0x19f   : > { %v874_v27 = vadd.f32 %v873_v6, %v808_v11  ;;  %v914_v7 = vpop.f32.mrf.mxu1  ;;  %v991_v6 = vadd.f32 %v990_v26, %v798_v31  ;;  %v944_v26 = vadd.f32 %v3475_v14, %v3485_v20  ;;  %v985_v31 = vadd.f32 %v3477_v15, %v3485_v20 }
 0x1a0   : > { %v915_v33 = vadd.f32 %v914_v7, %v808_v11  ;;  %v1000_v7 = vmax.f32 %v894_v57, 0.0  ;;  %v938_v14 = vadd.f32 %v3467_v58, %v778_v9  ;;  %v979_v15 = vadd.f32 %v3469_v59, %v778_v9  ;;  %v3584_v57 = vpop.permute.xlu1 %1076 }
 0x1a1   : > { %v1027_v63 = vmax.f32 %v874_v27, 0.0  ;;  %v1022_v22 = vmax.f32 %v991_v6, 0.0  ;;  %v1013_v20 = vmax.f32 %v944_v26, 0.0  ;;  %v1001_v59 = vmax.f32 %v935_v35, 0.0 }
 0x1a2   : > { %v1028_v16 = vmax.f32 %v915_v33, 0.0  ;;  %v952_v36 = vpop.f32.mrf.mxu2  ;;  %v1017_v33 = vmax.f32 %v947_v51, 0.0  ;;  %v1005_v37 = vmax.f32 %v938_v14, 0.0  ;;  %v1006_v58 = vmax.f32 %v979_v15, 0.0 }
 0x1a3   : > { %v993_v17 = vpop.f32.mrf.mxu3  ;;  %1111 = vmatpush.msra.mxu0 %v1027_v63  ;;  %v953_v61 = vadd.f32 %v952_v36, %v803_v23  ;;  %v1014_v63 = vmax.f32 %v985_v31, 0.0 }
 0x1a4   : > { %1152 = vmatpush.msra.mxu1 %v1028_v16  ;;  %v994_v18 = vadd.f32 %v993_v17, %v803_v23  ;;  %v976_v16 = vadd.f32 %v3465_v55, %v773_v45  ;;  %v1033_v55 = vld [vmem:[%s4291_s3 + $0x10] sm:$0xff]  ;;  %v1035_v17 = vld [vmem:[%s4291_s3 + $0x20] sm:$0xff] }
 0x1a5   : > { %1112 = vmatpush.msra.mxu0 %v1023_v1  ;;  %v1025_v27 = vmax.f32 %v953_v61, 0.0  ;;  %v1034_v1 = vld [vmem:[%s4291_s3 + $0x18] sm:$0xff] }
 0x1a6   : > { %1153 = vmatpush.msra.mxu1 %v1024_v12  ;;  %v1026_v23 = vmax.f32 %v994_v18, 0.0  ;;  %v1002_v54 = vmax.f32 %v976_v16, 0.0  ;;  %v1037_v12 = vld [vmem:[%s4291_s3 + $0x30] sm:$0xff] }
 0x1a7   : > { %1113 = vmatpush.msra.mxu0 %v1019_v13 }
 0x1a8   : > { %1154 = vmatpush.msra.mxu1 %v1020_v8  ;;  %v3594_v24 = vpop.permute.xlu1 %1061 }
 0x1a9   : > { %1114 = vmatpush.msra.mxu0 %v1015_v42 }
 0x1aa   : > { %1155 = vmatpush.msra.mxu1 %v1016_v44  ;;  %v955_v48 = vpop.f32.mrf.mxu2 }
 0x1ab   : > { %v956_v56 = vadd.f32 %v955_v48, %v808_v11  ;;  %v996_v3 = vpop.f32.mrf.mxu3  ;;  %1115 = vmatpush.msra.mxu0 %v1011_v5 }
 0x1ac   : > { %v997_v52 = vadd.f32 %v996_v3, %v808_v11  ;;  %1156 = vmatpush.msra.mxu1 %v1012_v47  ;;  %v988_v11 = vadd.f32 %v3481_v10, %v3483_v32  ;;  %v941_v10 = vadd.f32 %v3471_v62, %v783_v39  ;;  %v982_v32 = vadd.f32 %v3473_v0, %v783_v39  ;;  %v1032_v0 = vld [vmem:[%s4291_s3 + $0x8] sm:$0xff] }
 0x1ad   : > { %v1029_v28 = vmax.f32 %v956_v56, 0.0  ;;  %1116 = vmatpush.msra.mxu0 %v1007_v60 }
 0x1ae   : > { %v1030_v25 = vmax.f32 %v997_v52, 0.0  ;;  %1157 = vmatpush.msra.mxu1 %v1008_v4  ;;  %v1018_v34 = vmax.f32 %v988_v11, 0.0  ;;  %v1009_v36 = vmax.f32 %v941_v10, 0.0  ;;  %v1010_v62 = vmax.f32 %v982_v32, 0.0  ;;  %v3586_v4 = vpop.permute.xlu2 %1071 }
 0x1af   : > { %1117 = vmatpush.msra.mxu0 %v1003_v19  ;;  %1193 = vmatpush.msra.mxu2 %v1029_v28 }
 0x1b0   : > { %1158 = vmatpush.msra.mxu1 %v1004_v53  ;;  %1234 = vmatpush.msra.mxu3 %v1030_v25  ;;  %v3592_v53 = vpop.permute.xlu0 %1066  ;;  %v3610_v16 = vpop.permute.xlu1 %1046 }
 0x1b1   : > { %1118 = vmatpush.msra.mxu0 %v999_v50  ;;  %1194 = vmatpush.msra.mxu2 %v1025_v27 }
 0x1b2   : > { %1159 = vmatpush.msra.mxu1 %v1000_v7  ;;  %1235 = vmatpush.msra.mxu3 %v1026_v23 }
 0x1b3   : > { %2786 = vmatmul.msk.f32.vlgmr.msra.gmra.mxu0 %vm810_vm1, %v1031_v29  ;;  %2794 = vmatmul.msk.f32.vlgmr.msra.gmra.mxu1 %vm810_vm1, %v1031_v29 }
 0x1b4   : > { %1195 = vmatpush.msra.mxu2 %v1021_v21  ;;  %1236 = vmatpush.msra.mxu3 %v1022_v22 }
 0x1b6   : > { %1196 = vmatpush.msra.mxu2 %v1017_v33  ;;  %1237 = vmatpush.msra.mxu3 %v1018_v34  ;;  %v3596_v50 = vpop.permute.xlu2 %1056 }
 0x1b8   : > { %1197 = vmatpush.msra.mxu2 %v1013_v20  ;;  %1238 = vmatpush.msra.mxu3 %v1014_v63  ;;  %v3608_v35 = vpop.permute.xlu0 %1051 }
 0x1ba   : > { %1198 = vmatpush.msra.mxu2 %v1009_v36  ;;  %1239 = vmatpush.msra.mxu3 %v1010_v62 }
 0x1bb   : > { %2787 = vmatmul.msk.f32.gmra.mxu0 %vm810_vm1, %v1032_v0  ;;  %2795 = vmatmul.msk.f32.gmra.mxu1 %vm810_vm1, %v1032_v0 }
 0x1bc   : > { %1199 = vmatpush.msra.mxu2 %v1005_v37  ;;  %1240 = vmatpush.msra.mxu3 %v1006_v58 }
 0x1be   : > { %1200 = vmatpush.msra.mxu2 %v1001_v59  ;;  %1241 = vmatpush.msra.mxu3 %v1002_v54 }
 0x1bf   : > { %2802 = vmatmul.msk.f32.vlgmr.msra.gmra.mxu2 %vm810_vm1, %v1031_v29  ;;  %2810 = vmatmul.msk.f32.vlgmr.msra.gmra.mxu3 %vm810_vm1, %v1031_v29 }
 0x1c3   : > { %2788 = vmatmul.msk.f32.gmra.mxu0 %vm810_vm1, %v1033_v55  ;;  %2796 = vmatmul.msk.f32.gmra.mxu1 %vm810_vm1, %v1033_v55 }
 0x1c7   : > { %2803 = vmatmul.msk.f32.gmra.mxu2 %vm810_vm1, %v1032_v0  ;;  %2811 = vmatmul.msk.f32.gmra.mxu3 %vm810_vm1, %v1032_v0 }
 0x1cb   : > { %2789 = vmatmul.msk.f32.gmra.mxu0 %vm810_vm1, %v1034_v1  ;;  %2797 = vmatmul.msk.f32.gmra.mxu1 %vm810_vm1, %v1034_v1 }
 0x1cf   : > { %2804 = vmatmul.msk.f32.gmra.mxu2 %vm810_vm1, %v1033_v55  ;;  %2812 = vmatmul.msk.f32.gmra.mxu3 %vm810_vm1, %v1033_v55 }
 0x1d3   : > { %2790 = vmatmul.msk.f32.gmra.mxu0 %vm810_vm1, %v1035_v17  ;;  %2798 = vmatmul.msk.f32.gmra.mxu1 %vm810_vm1, %v1035_v17 }
 0x1d7   : > { %2805 = vmatmul.msk.f32.gmra.mxu2 %vm810_vm1, %v1034_v1  ;;  %2813 = vmatmul.msk.f32.gmra.mxu3 %vm810_vm1, %v1034_v1 }
 0x1db   : > { %2791 = vmatmul.msk.f32.gmra.mxu0 %vm810_vm1, %v1036_v30  ;;  %2799 = vmatmul.msk.f32.gmra.mxu1 %vm810_vm1, %v1036_v30 }
 0x1df   : > { %2806 = vmatmul.msk.f32.gmra.mxu2 %vm810_vm1, %v1035_v17  ;;  %2814 = vmatmul.msk.f32.gmra.mxu3 %vm810_vm1, %v1035_v17 }
 0x1e3   : > { %2792 = vmatmul.msk.f32.gmra.mxu0 %vm810_vm1, %v1037_v12  ;;  %2800 = vmatmul.msk.f32.gmra.mxu1 %vm810_vm1, %v1037_v12 }
 0x1e7   : > { %2807 = vmatmul.msk.f32.gmra.mxu2 %vm810_vm1, %v1036_v30  ;;  %2815 = vmatmul.msk.f32.gmra.mxu3 %vm810_vm1, %v1036_v30  ;;  %v1042_v30 = vpop.permute.xlu2 %1041 }
 0x1eb   : > { %2793 = vmatmul.msk.f32.gmra.mxu0 %vm810_vm1, %v1038_v38  ;;  %2801 = vmatmul.msk.f32.gmra.mxu1 %vm810_vm1, %v1038_v38 }
 0x1ef   : > { %2808 = vmatmul.msk.f32.gmra.mxu2 %vm810_vm1, %v1037_v12  ;;  %2816 = vmatmul.msk.f32.gmra.mxu3 %vm810_vm1, %v1037_v12 }
 0x1f7   : > { %2809 = vmatmul.msk.f32.gmra.mxu2 %vm810_vm1, %v1038_v38  ;;  %2817 = vmatmul.msk.f32.gmra.mxu3 %vm810_vm1, %v1038_v38 }
 0x230   : > { %v3564_v13 = vpop.f32.mrf.mxu0  ;;  %v3566_v39 = vpop.f32.mrf.mxu1 }
 0x231   : > { %v1121_v12 = vadd.f32 %v3564_v13, %v1042_v30  ;;  %v1162_v38 = vadd.f32 %v3566_v39, %v1042_v30 }
 0x238   : > { %v1123_v40 = vpop.f32.mrf.mxu0  ;;  %v1164_v8 = vpop.f32.mrf.mxu1 }
 0x239   : > { %v1124_v54 = vadd.f32 %v1123_v40, %v3610_v16  ;;  %v1165_v55 = vadd.f32 %v1164_v8, %v3610_v16  ;;  %v1267_v40 = vmax.f32 %v1121_v12, 0.0  ;;  %v3621_v8 = vld [vmem:[%s4292_s4] sm:$0xff]  ;;  %v1321_v12 = vpop.permute.xlu0 %1320 }
 0x240   : > { %v1126_v41 = vpop.f32.mrf.mxu0  ;;  %v1167_v42 = vpop.f32.mrf.mxu1 }
 0x241   : > { %v1127_v36 = vadd.f32 %v1126_v41, %v3608_v35  ;;  %v1168_v62 = vadd.f32 %v1167_v42, %v3608_v35 }
 0x242   : > { %v3568_v9 = vpop.f32.mrf.mxu2  ;;  %v3570_v43 = vpop.f32.mrf.mxu3 }
 0x243   : > { %v1275_v41 = vmax.f32 %v1127_v36, 0.0  ;;  %v1276_v42 = vmax.f32 %v1168_v62, 0.0  ;;  %v1478_v36 = vld [vmem:[%s4294_s6 + $0x18] sm:$0xff]  ;;  %v1479_v62 = vld [vmem:[%s4294_s6 + $0x20] sm:$0xff] }
 0x248   : > { %v1129_v44 = vpop.f32.mrf.mxu0  ;;  %v1170_v2 = vpop.f32.mrf.mxu1 }
 0x249   : > { %v1130_v14 = vadd.f32 %v1129_v44, %v3596_v50  ;;  %v1171_v15 = vadd.f32 %v1170_v2, %v3596_v50  ;;  %v1271_v44 = vmax.f32 %v1124_v54, 0.0  ;;  %v1272_v2 = vmax.f32 %v1165_v55, 0.0 }
 0x24a   : > { %v3572_v5 = vpop.f32.mrf.mxu2  ;;  %v3574_v45 = vpop.f32.mrf.mxu3 }
 0x24b   : > { %v1279_v1 = vmax.f32 %v1130_v14, 0.0  ;;  %v1280_v17 = vmax.f32 %v1171_v15, 0.0 }
 0x250   : > { %v1132_v46 = vpop.f32.mrf.mxu0  ;;  %v1173_v47 = vpop.f32.mrf.mxu1 }
 0x251   : > { %v1133_v10 = vadd.f32 %v1132_v46, %v3594_v24  ;;  %v1174_v32 = vadd.f32 %v1173_v47, %v3594_v24  ;;  %v1268_v46 = vmax.f32 %v1162_v38, 0.0  ;;  %v1316_v38 = vpop.permute.xlu1 %1315 }
 0x252   : > { %v3576_v48 = vpop.f32.mrf.mxu2  ;;  %v3578_v49 = vpop.f32.mrf.mxu3 }
 0x253   : > { %v1283_v0 = vmax.f32 %v1133_v10, 0.0  ;;  %v1284_v37 = vmax.f32 %v1174_v32, 0.0 }
 0x258   : > { %v1135_v60 = vpop.f32.mrf.mxu0  ;;  %v1176_v61 = vpop.f32.mrf.mxu1 }
 0x259   : > { %v1136_v26 = vadd.f32 %v1135_v60, %v3592_v53  ;;  %v1177_v31 = vadd.f32 %v1176_v61, %v3592_v53 }
 0x25a   : > { %v3580_v56 = vpop.f32.mrf.mxu2  ;;  %v3582_v3 = vpop.f32.mrf.mxu3 }
 0x25b   : > { %v1287_v20 = vmax.f32 %v1136_v26, 0.0  ;;  %v1288_v63 = vmax.f32 %v1177_v31, 0.0 }
 0x260   : > { %v1138_v18 = vpop.f32.mrf.mxu0  ;;  %v1179_v52 = vpop.f32.mrf.mxu1 }
 0x261   : > { %v1139_v27 = vadd.f32 %v1138_v18, %v3586_v4  ;;  %v1180_v7 = vadd.f32 %v1179_v52, %v3586_v4 }
 0x262   : > { %v3588_v19 = vpop.f32.mrf.mxu2  ;;  %v3590_v28 = vpop.f32.mrf.mxu3 }
 0x263   : > { %v1291_v33 = vmax.f32 %v1139_v27, 0.0  ;;  %v1292_v34 = vmax.f32 %v1180_v7, 0.0  ;;  %v3031_v7 = vld [vmem:[%s3236_s23] sm:$0xff] }
 0x268   : > { %v1141_v6 = vpop.f32.mrf.mxu0  ;;  %v1182_v25 = vpop.f32.mrf.mxu1 }
 0x269   : > { %v1142_v51 = vadd.f32 %v1141_v6, %v3584_v57  ;;  %v1183_v11 = vadd.f32 %v1182_v25, %v3584_v57 }
 0x26a   : > { %v1217_v23 = vpop.f32.mrf.mxu2  ;;  %v1258_v29 = vpop.f32.mrf.mxu3 }
 0x26b   : > { %v1295_v21 = vmax.f32 %v1142_v51, 0.0  ;;  %v1296_v22 = vmax.f32 %v1183_v11, 0.0  ;;  %v1218_v52 = vadd.f32 %v1217_v23, %v3592_v53  ;;  %v1259_v6 = vadd.f32 %v1258_v29, %v3592_v53 }
 0x26c   : > { %v1256_v51 = vadd.f32 %v3590_v28, %v3594_v24  ;;  %v1212_v23 = vadd.f32 %v3580_v56, %v3596_v50  ;;  %v1253_v53 = vadd.f32 %v3582_v3, %v3596_v50  ;;  %v1209_v28 = vadd.f32 %v3576_v48, %v3608_v35 }
 0x26d   : > { %1343 = vmatpush.msrb.mxu0 %v1295_v21  ;;  %1372 = vmatpush.msrb.mxu1 %v1296_v22  ;;  %v1289_v29 = vmax.f32 %v1218_v52, 0.0  ;;  %v1290_v31 = vmax.f32 %v1259_v6, 0.0  ;;  %v1206_v56 = vadd.f32 %v3572_v5, %v3610_v16  ;;  %v1247_v3 = vadd.f32 %v3574_v45, %v3610_v16  ;;  %v1301_v5 = vld [vmem:[%s4292_s4 + $0x10] sm:$0xff]  ;;  %v1306_v52 = vpop.permute.xlu0 %1305 }
 0x26e   : > { %v1286_v22 = vmax.f32 %v1256_v51, 0.0  ;;  %v1281_v50 = vmax.f32 %v1212_v23, 0.0  ;;  %v1282_v10 = vmax.f32 %v1253_v53, 0.0  ;;  %v1203_v48 = vadd.f32 %v3568_v9, %v1042_v30  ;;  %v3033_v9 = vld [vmem:[%s3236_s23 + $0x10] sm:$0xff]  ;;  %v1467_v53 = vld [vmem:[%s4293_s5] sm:$0xff] }
 0x26f   : > { %1344 = vmatpush.msrb.mxu0 %v1291_v33  ;;  %1373 = vmatpush.msrb.mxu1 %v1292_v34  ;;  %v1277_v32 = vmax.f32 %v1209_v28, 0.0  ;;  %v1273_v34 = vmax.f32 %v1206_v56, 0.0  ;;  %v1274_v14 = vmax.f32 %v1247_v3, 0.0  ;;  %v1477_v16 = vld [vmem:[%s4294_s6 + $0x10] sm:$0xff] }
 0x270   : > { %v1269_v45 = vmax.f32 %v1203_v48, 0.0 }
 0x271   : > { %1345 = vmatpush.msrb.mxu0 %v1287_v20  ;;  %1374 = vmatpush.msrb.mxu1 %v1288_v63  ;;  %v1302_v20 = vld [vmem:[%s4292_s4 + $0x18] sm:$0xff]  ;;  %v1475_v63 = vld [vmem:[%s4294_s6] sm:$0xff] }
 0x272   : > { %v1220_v58 = vpop.f32.mrf.mxu2  ;;  %v1261_v59 = vpop.f32.mrf.mxu3 }
 0x273   : > { %1346 = vmatpush.msrb.mxu0 %v1283_v0  ;;  %1375 = vmatpush.msrb.mxu1 %v1284_v37  ;;  %v1221_v13 = vadd.f32 %v1220_v58, %v3586_v4  ;;  %v1262_v60 = vadd.f32 %v1261_v59, %v3586_v4  ;;  %v3032_v4 = vld [vmem:[%s3236_s23 + $0x8] sm:$0xff]  ;;  %v1481_v37 = vld [vmem:[%s4294_s6 + $0x30] sm:$0xff]  ;;  %v1482_v58 = vld [vmem:[%s4294_s6 + $0x38] sm:$0xff] }
 0x274   : > { %v1480_v0 = vld [vmem:[%s4294_s6 + $0x28] sm:$0xff] }
 0x275   : > { %1347 = vmatpush.msrb.mxu0 %v1279_v1  ;;  %1376 = vmatpush.msrb.mxu1 %v1280_v17  ;;  %v1293_v11 = vmax.f32 %v1221_v13, 0.0  ;;  %v1294_v26 = vmax.f32 %v1262_v60, 0.0 }
 0x277   : > { %1348 = vmatpush.msrb.mxu0 %v1275_v41  ;;  %1377 = vmatpush.msrb.mxu1 %v1276_v42 }
 0x279   : > { %1349 = vmatpush.msrb.mxu0 %v1271_v44  ;;  %1378 = vmatpush.msrb.mxu1 %v1272_v2 }
 0x27a   : > { %v1223_v39 = vpop.f32.mrf.mxu2  ;;  %v1264_v47 = vpop.f32.mrf.mxu3 }
 0x27b   : > { %v1224_v61 = vadd.f32 %v1223_v39, %v3584_v57  ;;  %v1265_v18 = vadd.f32 %v1264_v47, %v3584_v57  ;;  %1350 = vmatpush.msrb.mxu0 %v1267_v40  ;;  %1379 = vmatpush.msrb.mxu1 %v1268_v46  ;;  %v1215_v57 = vadd.f32 %v3588_v19, %v3594_v24  ;;  %v1300_v19 = vld [vmem:[%s4292_s4 + $0x8] sm:$0xff]  ;;  %v1311_v39 = vpop.permute.xlu2 %1310 }
 0x27c   : > { %2818 = vmatmul.msk.f32.vlgmr.msrb.gmra.mxu0 %vm810_vm1, %v3621_v8  ;;  %2822 = vmatmul.msk.f32.vlgmr.msrb.gmra.mxu1 %vm810_vm1, %v3621_v8  ;;  %v1250_v24 = vadd.f32 %v3578_v49, %v3608_v35  ;;  %v1244_v49 = vadd.f32 %v3570_v43, %v1042_v30  ;;  %v3034_v43 = vld [vmem:[%s3236_s23 + $0x18] sm:$0xff]  ;;  %v1476_v35 = vld [vmem:[%s4294_s6 + $0x8] sm:$0xff]  ;;  %s2967_s23 = sshll.u32 %s3105_s20, 2  ;;  %s2609_s20 = scalar_lea.sflag [#allocation3], %s417_s21 }
 0x27d   : > { %v1297_v25 = vmax.f32 %v1224_v61, 0.0  ;;  %v1298_v27 = vmax.f32 %v1265_v18, 0.0  ;;  %1522 = vmatpush.msra.mxu0 %v3031_v7  ;;  %1563 = vmatpush.msra.mxu1 %v3032_v4  ;;  %v1285_v21 = vmax.f32 %v1215_v57, 0.0  ;;  %s2621_s28 = scalar_lea.hbm %s4299_s11, %s2967_s23 }
 0x27e   : > { %v1278_v33 = vmax.f32 %v1250_v24, 0.0  ;;  %v1270_v15 = vmax.f32 %v1244_v49, 0.0  ;;  %s2625_s13 = sshll.u32 %s2621_s28, 4  ;;  %s2626_s13 = int_to_ptr.hbm [resolvable:$true] %s2625_s13 }
 0x27f   : > { %1401 = vmatpush.msrb.mxu2 %v1297_v25  ;;  %1430 = vmatpush.msrb.mxu3 %v1298_v27  ;;  %s3049_s14 = sshra.s32 %s2626_s13, 4  ;;  %s3050_s14 = int_to_ptr.hbm [resolvable:$true] %s3049_s14 }
 0x280   : > { %s3051_s15 = scalar_lea.hbm %s3050_s14, 4  ;;  %p3056_p1 = scmp.lt.s32.totalorder %s3050_s14, %s4299_s11 }
 0x281   : > { %1402 = vmatpush.msrb.mxu2 %v1293_v11  ;;  %1431 = vmatpush.msrb.mxu3 %v1294_v26  ;;  %p3052_p12 = scmp.ne.s32.totalorder %s3050_s14, %s3051_s15  ;;  %p3057_p2 = scmp.lt.s32.totalorder %s3055_s24, %s3051_s15 }
 0x283   : > { %1403 = vmatpush.msrb.mxu2 %v1289_v29  ;;  %1432 = vmatpush.msrb.mxu3 %v1290_v31  ;;  %p3053_p13 = pnand %p3052_p12, %p3216_p4  ;;  %p3058_p3 = por %p3057_p2, %p3056_p1 }
 0x284   : > { %2819 = vmatmul.msk.f32.gmra.mxu0 %vm810_vm1, %v1300_v19  ;;  %2823 = vmatmul.msk.f32.gmra.mxu1 %vm810_vm1, %v1300_v19 }
 0x285   : > { %1404 = vmatpush.msrb.mxu2 %v1285_v21  ;;  %1433 = vmatpush.msrb.mxu3 %v1286_v22  ;;  %v1469_v21 = vld [vmem:[%s4293_s5 + $0x10] sm:$0xff]  ;;  %p3054_p0 = pneg %p3053_p13 }
 0x287   : > { %1405 = vmatpush.msrb.mxu2 %v1281_v50  ;;  %1434 = vmatpush.msrb.mxu3 %v1282_v10  ;;  %p3059_p5 = pnand %p3058_p3, %p3054_p0 }
 0x289   : > { %1406 = vmatpush.msrb.mxu2 %v1277_v32  ;;  %1435 = vmatpush.msrb.mxu3 %v1278_v33 }
 0x28b   : > { %1407 = vmatpush.msrb.mxu2 %v1273_v34  ;;  %1436 = vmatpush.msrb.mxu3 %v1274_v14 }
 0x28c   : > { %2820 = vmatmul.msk.f32.gmra.mxu0 %vm810_vm1, %v1301_v5  ;;  %2824 = vmatmul.msk.f32.gmra.mxu1 %vm810_vm1, %v1301_v5 }
 0x28d   : > { %1408 = vmatpush.msrb.mxu2 %v1269_v45  ;;  %1437 = vmatpush.msrb.mxu3 %v1270_v15 }
 0x28e   : > { %2826 = vmatmul.msk.f32.vlgmr.msrb.gmra.mxu2 %vm810_vm1, %v3621_v8  ;;  %2830 = vmatmul.msk.f32.vlgmr.msrb.gmra.mxu3 %vm810_vm1, %v3621_v8 }
 0x28f   : > { %1604 = vmatpush.msra.mxu2 %v3033_v9  ;;  %1645 = vmatpush.msra.mxu3 %v3034_v43 }
 0x294   : > { %2821 = vmatmul.msk.f32.gmra.mxu0 %vm810_vm1, %v1302_v20  ;;  %2825 = vmatmul.msk.f32.gmra.mxu1 %vm810_vm1, %v1302_v20 }
 0x296   : > { %2827 = vmatmul.msk.f32.gmra.mxu2 %vm810_vm1, %v1300_v19  ;;  %2831 = vmatmul.msk.f32.gmra.mxu3 %vm810_vm1, %v1300_v19  ;;  %v1468_v19 = vld [vmem:[%s4293_s5 + $0x8] sm:$0xff] }
 0x29c   : > { %2834 = vmatmul.msk.f32.vlgmr.msra.gmra.mxu0 %vm541_vm0, %v1475_v63  ;;  %2842 = vmatmul.msk.f32.vlgmr.msra.gmra.mxu1 %vm541_vm0, %v1475_v63 }
 0x29e   : > { %2828 = vmatmul.msk.f32.gmra.mxu2 %vm810_vm1, %v1301_v5  ;;  %2832 = vmatmul.msk.f32.gmra.mxu3 %vm810_vm1, %v1301_v5 }
 0x2a4   : > { %2835 = vmatmul.msk.f32.gmra.mxu0 %vm541_vm0, %v1476_v35  ;;  %2843 = vmatmul.msk.f32.gmra.mxu1 %vm541_vm0, %v1476_v35 }
 0x2a6   : > { %2829 = vmatmul.msk.f32.gmra.mxu2 %vm810_vm1, %v1302_v20  ;;  %2833 = vmatmul.msk.f32.gmra.mxu3 %vm810_vm1, %v1302_v20  ;;  %v1470_v20 = vld [vmem:[%s4293_s5 + $0x18] sm:$0xff] }
 0x2ac   : > { %2836 = vmatmul.msk.f32.gmra.mxu0 %vm541_vm0, %v1477_v16  ;;  %2844 = vmatmul.msk.f32.gmra.mxu1 %vm541_vm0, %v1477_v16 }
 0x2ae   : > { %2850 = vmatmul.msk.f32.vlgmr.msra.gmra.mxu2 %vm541_vm0, %v1475_v63  ;;  %2858 = vmatmul.msk.f32.vlgmr.msra.gmra.mxu3 %vm541_vm0, %v1475_v63  ;;  %v1471_v63 = vld [vmem:[%s4293_s5 + $0x20] sm:$0xff] }
 0x2b4   : > { %2837 = vmatmul.msk.f32.gmra.mxu0 %vm541_vm0, %v1478_v36  ;;  %2845 = vmatmul.msk.f32.gmra.mxu1 %vm541_vm0, %v1478_v36 }
 0x2b6   : > { %2851 = vmatmul.msk.f32.gmra.mxu2 %vm541_vm0, %v1476_v35  ;;  %2859 = vmatmul.msk.f32.gmra.mxu3 %vm541_vm0, %v1476_v35  ;;  %v1472_v35 = vld [vmem:[%s4293_s5 + $0x28] sm:$0xff] }
 0x2bc   : > { %2838 = vmatmul.msk.f32.gmra.mxu0 %vm541_vm0, %v1479_v62  ;;  %2846 = vmatmul.msk.f32.gmra.mxu1 %vm541_vm0, %v1479_v62 }
 0x2be   : > { %2852 = vmatmul.msk.f32.gmra.mxu2 %vm541_vm0, %v1477_v16  ;;  %2860 = vmatmul.msk.f32.gmra.mxu3 %vm541_vm0, %v1477_v16 }
 0x2c4   : > { %2839 = vmatmul.msk.f32.gmra.mxu0 %vm541_vm0, %v1480_v0  ;;  %2847 = vmatmul.msk.f32.gmra.mxu1 %vm541_vm0, %v1480_v0 }
 0x2c6   : > { %2853 = vmatmul.msk.f32.gmra.mxu2 %vm541_vm0, %v1478_v36  ;;  %2861 = vmatmul.msk.f32.gmra.mxu3 %vm541_vm0, %v1478_v36 }
 0x2cc   : > { %2840 = vmatmul.msk.f32.gmra.mxu0 %vm541_vm0, %v1481_v37  ;;  %2848 = vmatmul.msk.f32.gmra.mxu1 %vm541_vm0, %v1481_v37 }
 0x2ce   : > { %2854 = vmatmul.msk.f32.gmra.mxu2 %vm541_vm0, %v1479_v62  ;;  %2862 = vmatmul.msk.f32.gmra.mxu3 %vm541_vm0, %v1479_v62  ;;  %v1473_v62 = vld [vmem:[%s4293_s5 + $0x30] sm:$0xff] }
 0x2d4   : > { %2841 = vmatmul.msk.f32.gmra.mxu0 %vm541_vm0, %v1482_v58  ;;  %2849 = vmatmul.msk.f32.gmra.mxu1 %vm541_vm0, %v1482_v58 }
 0x2d6   : > { %2855 = vmatmul.msk.f32.gmra.mxu2 %vm541_vm0, %v1480_v0  ;;  %2863 = vmatmul.msk.f32.gmra.mxu3 %vm541_vm0, %v1480_v0  ;;  %v1474_v0 = vld [vmem:[%s4293_s5 + $0x38] sm:$0xff] }
 0x2de   : > { %2856 = vmatmul.msk.f32.gmra.mxu2 %vm541_vm0, %v1481_v37  ;;  %2864 = vmatmul.msk.f32.gmra.mxu3 %vm541_vm0, %v1481_v37 }
 0x2e6   : > { %2857 = vmatmul.msk.f32.gmra.mxu2 %vm541_vm0, %v1482_v58  ;;  %2865 = vmatmul.msk.f32.gmra.mxu3 %vm541_vm0, %v1482_v58 }
 0x2f9   : > { %v1352_v59 = vpop.f32.mrf.mxu0  ;;  %v1381_v54 = vpop.f32.mrf.mxu1 }
 0x2fa   : > { %v1353_v6 = vadd.f32 %v1352_v59, %v1306_v52  ;;  %v1382_v25 = vadd.f32 %v1381_v54, %v1306_v52 }
 0x2fc   : > { %v1451_v51 = vmax.f32 %v1353_v6, 0.0  ;;  %v1452_v11 = vmax.f32 %v1382_v25, 0.0 }
 0x301   : > { %v1355_v55 = vpop.f32.mrf.mxu0  ;;  %v1384_v1 = vpop.f32.mrf.mxu1 }
 0x302   : > { %v1356_v47 = vadd.f32 %v1355_v55, %v1311_v39  ;;  %v1385_v60 = vadd.f32 %v1384_v1, %v1311_v39 }
 0x304   : > { %v1455_v4 = vmax.f32 %v1356_v47, 0.0  ;;  %v1456_v57 = vmax.f32 %v1385_v60, 0.0 }
 0x309   : > { %v1358_v17 = vpop.f32.mrf.mxu0  ;;  %v1387_v30 = vpop.f32.mrf.mxu1 }
 0x30a   : > { %v1359_v44 = vadd.f32 %v1358_v17, %v1316_v38  ;;  %v1388_v2 = vadd.f32 %v1387_v30, %v1316_v38 }
 0x30c   : > { %v1459_v27 = vmax.f32 %v1359_v44, 0.0  ;;  %v1460_v7 = vmax.f32 %v1388_v2, 0.0 }
 0x311   : > { %v1361_v41 = vpop.f32.mrf.mxu0  ;;  %v1390_v42 = vpop.f32.mrf.mxu1 }
 0x312   : > { %v1362_v40 = vadd.f32 %v1361_v41, %v1321_v12  ;;  %v1391_v46 = vadd.f32 %v1390_v42, %v1321_v12  ;;  %v1410_v8 = vpop.f32.mrf.mxu2  ;;  %v1439_v13 = vpop.f32.mrf.mxu3 }
 0x313   : > { %v1411_v33 = vadd.f32 %v1410_v8, %v1306_v52  ;;  %v1440_v34 = vadd.f32 %v1439_v13, %v1306_v52 }
 0x314   : > { %v1463_v61 = vmax.f32 %v1362_v40, 0.0  ;;  %v1464_v18 = vmax.f32 %v1391_v46, 0.0 }
 0x315   : > { %v1453_v9 = vmax.f32 %v1411_v33, 0.0  ;;  %v1454_v43 = vmax.f32 %v1440_v34, 0.0 }
 0x316   : > { %1708 = vmatpush.msrb.mxu0 %v1463_v61  ;;  %1749 = vmatpush.msrb.mxu1 %v1464_v18 }
 0x318   : > { %1709 = vmatpush.msrb.mxu0 %v1459_v27  ;;  %1750 = vmatpush.msrb.mxu1 %v1460_v7 }
 0x319   : > { %v3772_v16 = vpop.f32.mrf.mxu0  ;;  %v3774_v36 = vpop.f32.mrf.mxu1 }
 0x31a   : > { %v1413_v26 = vpop.f32.mrf.mxu2  ;;  %v1442_v23 = vpop.f32.mrf.mxu3  ;;  %1710 = vmatpush.msrb.mxu0 %v1455_v4  ;;  %1751 = vmatpush.msrb.mxu1 %v1456_v57 }
 0x31b   : > { %v1414_v10 = vadd.f32 %v1413_v26, %v1311_v39  ;;  %v1443_v48 = vadd.f32 %v1442_v23, %v1311_v39 }
 0x31c   : > { %1711 = vmatpush.msrb.mxu0 %v1451_v51  ;;  %1752 = vmatpush.msrb.mxu1 %v1452_v11 }
 0x31d   : > { %2866 = vmatmul.msk.f32.vlgmr.msrb.gmra.mxu0 %vm1671_vm2, %v1467_v53  ;;  %2874 = vmatmul.msk.f32.vlgmr.msrb.gmra.mxu1 %vm1671_vm2, %v1467_v53  ;;  %v1457_v45 = vmax.f32 %v1414_v10, 0.0  ;;  %v1458_v15 = vmax.f32 %v1443_v48, 0.0  ;;  %v3852_v48 = vpop.permute.xlu1 %1897 }
 0x321   : > { %v3786_v37 = vpop.f32.mrf.mxu0  ;;  %v3788_v58 = vpop.f32.mrf.mxu1 }
 0x322   : > { %v1416_v29 = vpop.f32.mrf.mxu2  ;;  %v1445_v31 = vpop.f32.mrf.mxu3 }
 0x323   : > { %v1417_v22 = vadd.f32 %v1416_v29, %v1316_v38  ;;  %v1446_v56 = vadd.f32 %v1445_v31, %v1316_v38 }
 0x325   : > { %2867 = vmatmul.msk.f32.gmra.mxu0 %vm1671_vm2, %v1468_v19  ;;  %2875 = vmatmul.msk.f32.gmra.mxu1 %vm1671_vm2, %v1468_v19  ;;  %v1461_v14 = vmax.f32 %v1417_v22, 0.0  ;;  %v1462_v5 = vmax.f32 %v1446_v56, 0.0 }
 0x329   : > { %v3794_v59 = vpop.f32.mrf.mxu0  ;;  %v3796_v54 = vpop.f32.mrf.mxu1 }
 0x32a   : > { %v1419_v28 = vpop.f32.mrf.mxu2  ;;  %v1448_v24 = vpop.f32.mrf.mxu3 }
 0x32b   : > { %v1420_v3 = vadd.f32 %v1419_v28, %v1321_v12  ;;  %v1449_v50 = vadd.f32 %v1448_v24, %v1321_v12 }
 0x32d   : > { %v1465_v49 = vmax.f32 %v1420_v3, 0.0  ;;  %v1466_v32 = vmax.f32 %v1449_v50, 0.0  ;;  %2868 = vmatmul.msk.f32.gmra.mxu0 %vm1671_vm2, %v1469_v21  ;;  %2876 = vmatmul.msk.f32.gmra.mxu1 %vm1671_vm2, %v1469_v21 }
 0x32f   : > { %1790 = vmatpush.msrb.mxu2 %v1465_v49  ;;  %1831 = vmatpush.msrb.mxu3 %v1466_v32 }
 0x331   : > { %1791 = vmatpush.msrb.mxu2 %v1461_v14  ;;  %1832 = vmatpush.msrb.mxu3 %v1462_v5  ;;  %v3802_v55 = vpop.f32.mrf.mxu0  ;;  %v3804_v1 = vpop.f32.mrf.mxu1 }
 0x332   : > { %v3806_v17 = vpop.f32.mrf.mxu2  ;;  %v3808_v30 = vpop.f32.mrf.mxu3 }
 0x333   : > { %1792 = vmatpush.msrb.mxu2 %v1457_v45  ;;  %1833 = vmatpush.msrb.mxu3 %v1458_v15  ;;  %4306 = vst [vmem:[#allocation7_spill] sm:$0xff] %v3806_v17  ;;  %v3858_v14 = vpop.permute.xlu2 %1892  ;;  %v3860_v5 = vpop.permute.xlu0 %1887 }
 0x334   : > { %4307 = vst [vmem:[#allocation8_spill] sm:$0xff] %v3808_v30  ;;  %v3866_v30 = vpop.permute.xlu1 %1882 }
 0x335   : > { %1793 = vmatpush.msrb.mxu2 %v1453_v9  ;;  %1834 = vmatpush.msrb.mxu3 %v1454_v43 }
 0x336   : > { %2869 = vmatmul.msk.f32.gmra.mxu0 %vm1671_vm2, %v1470_v20  ;;  %2877 = vmatmul.msk.f32.gmra.mxu1 %vm1671_vm2, %v1470_v20 }
 0x337   : > { %2882 = vmatmul.msk.f32.vlgmr.msrb.gmra.mxu2 %vm1671_vm2, %v1467_v53  ;;  %2890 = vmatmul.msk.f32.vlgmr.msrb.gmra.mxu3 %vm1671_vm2, %v1467_v53 }
 0x339   : > { %v1536_v12 = vpop.f32.mrf.mxu0  ;;  %v1577_v38 = vpop.f32.mrf.mxu1 }
 0x33a   : > { %v3812_v41 = vpop.f32.mrf.mxu2  ;;  %v3814_v42 = vpop.f32.mrf.mxu3 }
 0x33b   : > { %4308 = vst [vmem:[#allocation9_spill] sm:$0xff] %v3814_v42 }
 0x33e   : > { %2870 = vmatmul.msk.f32.gmra.mxu0 %vm1671_vm2, %v1471_v63  ;;  %2878 = vmatmul.msk.f32.gmra.mxu1 %vm1671_vm2, %v1471_v63 }
 0x33f   : > { %2883 = vmatmul.msk.f32.gmra.mxu2 %vm1671_vm2, %v1468_v19  ;;  %2891 = vmatmul.msk.f32.gmra.mxu3 %vm1671_vm2, %v1468_v19 }
 0x341   : > { %v1539_v44 = vpop.f32.mrf.mxu0  ;;  %v1580_v2 = vpop.f32.mrf.mxu1 }
 0x342   : > { %v3816_v40 = vpop.f32.mrf.mxu2  ;;  %v3818_v46 = vpop.f32.mrf.mxu3 }
 0x346   : > { %2871 = vmatmul.msk.f32.gmra.mxu0 %vm1671_vm2, %v1472_v35  ;;  %2879 = vmatmul.msk.f32.gmra.mxu1 %vm1671_vm2, %v1472_v35 }
 0x347   : > { %2884 = vmatmul.msk.f32.gmra.mxu2 %vm1671_vm2, %v1469_v21  ;;  %2892 = vmatmul.msk.f32.gmra.mxu3 %vm1671_vm2, %v1469_v21 }
 0x349   : > { %v1542_v8 = vpop.f32.mrf.mxu0  ;;  %v1583_v13 = vpop.f32.mrf.mxu1 }
 0x34a   : > { %v3820_v39 = vpop.f32.mrf.mxu2  ;;  %v3822_v47 = vpop.f32.mrf.mxu3 }
 0x34e   : > { %2872 = vmatmul.msk.f32.gmra.mxu0 %vm1671_vm2, %v1473_v62  ;;  %2880 = vmatmul.msk.f32.gmra.mxu1 %vm1671_vm2, %v1473_v62 }
 0x34f   : > { %2885 = vmatmul.msk.f32.gmra.mxu2 %vm1671_vm2, %v1470_v20  ;;  %2893 = vmatmul.msk.f32.gmra.mxu3 %vm1671_vm2, %v1470_v20 }
 0x351   : > { %v1545_v60 = vpop.f32.mrf.mxu0  ;;  %v1586_v61 = vpop.f32.mrf.mxu1 }
 0x352   : > { %v3824_v18 = vpop.f32.mrf.mxu2  ;;  %v3826_v52 = vpop.f32.mrf.mxu3 }
 0x356   : > { %2873 = vmatmul.msk.f32.gmra.mxu0 %vm1671_vm2, %v1474_v0  ;;  %2881 = vmatmul.msk.f32.gmra.mxu1 %vm1671_vm2, %v1474_v0 }
 0x357   : > { %2886 = vmatmul.msk.f32.gmra.mxu2 %vm1671_vm2, %v1471_v63  ;;  %2894 = vmatmul.msk.f32.gmra.mxu3 %vm1671_vm2, %v1471_v63 }
 0x35a   : > { %v3832_v27 = vpop.f32.mrf.mxu2  ;;  %v3834_v7 = vpop.f32.mrf.mxu3 }
 0x35f   : > { %2887 = vmatmul.msk.f32.gmra.mxu2 %vm1671_vm2, %v1472_v35  ;;  %2895 = vmatmul.msk.f32.gmra.mxu3 %vm1671_vm2, %v1472_v35 }
 0x362   : > { %v3836_v51 = vpop.f32.mrf.mxu2  ;;  %v3838_v11 = vpop.f32.mrf.mxu3 }
 0x367   : > { %2888 = vmatmul.msk.f32.gmra.mxu2 %vm1671_vm2, %v1473_v62  ;;  %2896 = vmatmul.msk.f32.gmra.mxu3 %vm1671_vm2, %v1473_v62 }
 0x36a   : > { %v3840_v53 = vpop.f32.mrf.mxu2  ;;  %v3842_v29 = vpop.f32.mrf.mxu3 }
 0x36f   : > { %2889 = vmatmul.msk.f32.gmra.mxu2 %vm1671_vm2, %v1474_v0  ;;  %2897 = vmatmul.msk.f32.gmra.mxu3 %vm1671_vm2, %v1474_v0 }
 0x39a   : > { %v3828_v6 = vpop.f32.mrf.mxu0  ;;  %v3830_v25 = vpop.f32.mrf.mxu1 }
 0x3a2   : > { %v1716_v4 = vpop.f32.mrf.mxu0  ;;  %v1757_v57 = vpop.f32.mrf.mxu1 }
 0x3aa   : > { %v1719_v26 = vpop.f32.mrf.mxu0  ;;  %v1760_v23 = vpop.f32.mrf.mxu1 }
 0x3b3   : > { %v1722_v31 = vpop.f32.mrf.mxu0  ;;  %v1763_v19 = vpop.f32.mrf.mxu1 }
 0x3ba   : > { %v3844_v28 = vpop.f32.mrf.mxu2  ;;  %v3846_v24 = vpop.f32.mrf.mxu3 }
 0x3bb   : > { %4309 = vst [vmem:[#allocation10_spill] sm:$0xff] %v3844_v28  ;;  %v1725_v21 = vpop.f32.mrf.mxu0  ;;  %v1766_v22 = vpop.f32.mrf.mxu1 }
 0x3bc   : > { %4310 = vst [vmem:[#allocation11_spill] sm:$0xff] %v3846_v24  ;;  %v1726_v28 = vadd.f32 %v1725_v21, %v1536_v12  ;;  %v1767_v17 = vadd.f32 %v1766_v22, %v1577_v38  ;;  %v1761_v21 = vadd.f32 %v1760_v23, %v3796_v54 }
 0x3be   : > { %v1916_v22 = vadd.f32 %v3866_v30, %v1726_v28  ;;  %v3898_v28 = vpop.permute.xlu1 %1867 }
 0x3c2   : > { %v3848_v56 = vpop.f32.mrf.mxu2  ;;  %v3850_v3 = vpop.f32.mrf.mxu3 }
 0x3c3   : > { %4311 = vst [vmem:[#allocation12_spill] sm:$0xff] %v3850_v3  ;;  %v1728_v50 = vpop.f32.mrf.mxu0  ;;  %v1769_v10 = vpop.f32.mrf.mxu1 }
 0x3c4   : > { %v1729_v35 = vadd.f32 %v1728_v50, %v1539_v44  ;;  %v1770_v62 = vadd.f32 %v1769_v10, %v1580_v2  ;;  %v1764_v44 = vadd.f32 %v1763_v19, %v3804_v1  ;;  %v1717_v1 = vadd.f32 %v1716_v4, %v3786_v37 }
 0x3c5   : > { %v1755_v19 = vadd.f32 %v3830_v25, %v3774_v36  ;;  %v1948_v4 = vmax.f32 %v1916_v22, 0.0 }
 0x3c6   : > { %v1920_v2 = vadd.f32 %v3860_v5, %v1729_v35 }
 0x3ca   : > { %v3854_v49 = vpop.f32.mrf.mxu2  ;;  %v3856_v32 = vpop.f32.mrf.mxu3 }
 0x3cb   : > { %v1731_v33 = vpop.f32.mrf.mxu0  ;;  %v1772_v34 = vpop.f32.mrf.mxu1 }
 0x3cc   : > { %v1732_v45 = vadd.f32 %v1731_v33, %v1542_v8  ;;  %v1773_v15 = vadd.f32 %v1772_v34, %v1583_v13  ;;  %v3872_v33 = vpop.permute.xlu2 %1877  ;;  %v1723_v34 = vadd.f32 %v1722_v31, %v3802_v55  ;;  %v1758_v31 = vadd.f32 %v1757_v57, %v3788_v58 }
 0x3cd   : > { %v1913_v54 = vadd.f32 %v3872_v33, %v1764_v44 }
 0x3ce   : > { %v1924_v3 = vadd.f32 %v3858_v14, %v1732_v45  ;;  %v1925_v42 = vadd.f32 %v3858_v14, %v1773_v15  ;;  %v1905_v15 = vadd.f32 %v3898_v28, %v1758_v31 }
 0x3d0   : > { %v1956_v50 = vmax.f32 %v1924_v3, 0.0  ;;  %v1957_v10 = vmax.f32 %v1925_v42, 0.0  ;;  %v1714_v42 = vadd.f32 %v3828_v6, %v3772_v16  ;;  %v1904_v3 = vadd.f32 %v3898_v28, %v1717_v1 }
 0x3d2   : > { %v3862_v9 = vpop.f32.mrf.mxu2  ;;  %v3864_v43 = vpop.f32.mrf.mxu3 }
 0x3d3   : > { %v1734_v20 = vpop.f32.mrf.mxu0  ;;  %v1775_v63 = vpop.f32.mrf.mxu1 }
 0x3d4   : > { %v1735_v0 = vadd.f32 %v1734_v20, %v1545_v60  ;;  %v1776_v24 = vadd.f32 %v1775_v63, %v1586_v61  ;;  %v1921_v60 = vadd.f32 %v3860_v5, %v1770_v62  ;;  %v1720_v61 = vadd.f32 %v1719_v26, %v3794_v59  ;;  %v3902_v16 = vpop.permute.xlu2 %1862 }
 0x3d5   : > { %v1912_v59 = vadd.f32 %v3872_v33, %v1723_v34  ;;  %v1952_v26 = vmax.f32 %v1920_v2, 0.0  ;;  %v1945_v63 = vmax.f32 %v1913_v54, 0.0  ;;  %v1900_v36 = vadd.f32 %v3902_v16, %v1714_v42  ;;  %v3909_v2 = vld [vmem:[%s4295_s7] sm:$0xff]  ;;  %v4313_v42 = vld [vmem:[#allocation12_spill] sm:$0xff] }
 0x3d6   : > { %v1928_v8 = vadd.f32 %v3852_v48, %v1735_v0  ;;  %v1929_v13 = vadd.f32 %v3852_v48, %v1776_v24  ;;  %v1917_v24 = vadd.f32 %v3866_v30, %v1767_v17  ;;  %v1953_v23 = vmax.f32 %v1921_v60, 0.0  ;;  %v3890_v17 = vpop.permute.xlu0 %1872 }
 0x3d7   : > { %v1908_v37 = vadd.f32 %v3890_v17, %v1720_v61  ;;  %v1909_v58 = vadd.f32 %v3890_v17, %v1761_v21  ;;  %v1944_v20 = vmax.f32 %v1912_v59, 0.0  ;;  %v1901_v6 = vadd.f32 %v3902_v16, %v1755_v19 }
 0x3d8   : > { %v1960_v12 = vmax.f32 %v1928_v8, 0.0  ;;  %v1961_v38 = vmax.f32 %v1929_v13, 0.0  ;;  %v1949_v57 = vmax.f32 %v1917_v24, 0.0  ;;  %v1936_v8 = vmax.f32 %v1904_v3, 0.0 }
 0x3d9   : > { %v1940_v25 = vmax.f32 %v1908_v37, 0.0  ;;  %v1941_v35 = vmax.f32 %v1909_v58, 0.0  ;;  %v1937_v13 = vmax.f32 %v1905_v15, 0.0  ;;  %v1932_v34 = vmax.f32 %v1900_v36, 0.0  ;;  %v4315_v37 = vld [vmem:[#allocation10_spill] sm:$0xff]  ;;  %v4317_v58 = vld [vmem:[#allocation11_spill] sm:$0xff] }
 0x3da   : > { %v3882_v45 = vpop.f32.mrf.mxu2  ;;  %v3884_v55 = vpop.f32.mrf.mxu3  ;;  %2044 = vmatpush.msra.mxu0 %v1960_v12  ;;  %2085 = vmatpush.msra.mxu1 %v1961_v38  ;;  %v1933_v44 = vmax.f32 %v1901_v6, 0.0  ;;  %v3918_v38 = vld [vmem:[%s4295_s7 + $0x8] sm:$0xff] }
 0x3dc   : > { %2045 = vmatpush.msra.mxu0 %v1956_v50  ;;  %2086 = vmatpush.msra.mxu1 %v1957_v10 }
 0x3de   : > { %2046 = vmatpush.msra.mxu0 %v1952_v26  ;;  %2087 = vmatpush.msra.mxu1 %v1953_v23  ;;  %v4312_v23 = vld [vmem:[#allocation9_spill] sm:$0xff] }
 0x3df   : > { %v1840_v19 = vadd.f32 %v4313_v42, %v4312_v23 }
 0x3e0   : > { %2047 = vmatpush.msra.mxu0 %v1948_v4  ;;  %2088 = vmatpush.msra.mxu1 %v1949_v57 }
 0x3e2   : > { %v1810_v62 = vpop.f32.mrf.mxu2  ;;  %v1851_v0 = vpop.f32.mrf.mxu3  ;;  %2048 = vmatpush.msra.mxu0 %v1944_v20  ;;  %2089 = vmatpush.msra.mxu1 %v1945_v63  ;;  %v1907_v63 = vadd.f32 %v3898_v28, %v1840_v19 }
 0x3e3   : > { %v1811_v50 = vadd.f32 %v1810_v62, %v3832_v27  ;;  %v1852_v10 = vadd.f32 %v1851_v0, %v3834_v7  ;;  %v1805_v7 = vadd.f32 %v3862_v9, %v3820_v39  ;;  %v1843_v39 = vadd.f32 %v3856_v32, %v3818_v46  ;;  %v4314_v32 = vld [vmem:[#allocation7_spill] sm:$0xff] }
 0x3e4   : > { %2049 = vmatpush.msra.mxu0 %v1940_v25  ;;  %2090 = vmatpush.msra.mxu1 %v1941_v35  ;;  %v1967_v25 = vld [vmem:[%s4295_s7 + $0x18] sm:$0xff] }
 0x3e5   : > { %v1911_v3 = vadd.f32 %v3890_v17, %v1843_v39 }
 0x3e6   : > { %2050 = vmatpush.msra.mxu0 %v1936_v8  ;;  %2091 = vmatpush.msra.mxu1 %v1937_v13  ;;  %v1939_v8 = vmax.f32 %v1907_v63, 0.0 }
 0x3e7   : > { %v1943_v0 = vmax.f32 %v1911_v3, 0.0 }
 0x3e8   : > { %2051 = vmatpush.msra.mxu0 %v1932_v34  ;;  %2092 = vmatpush.msra.mxu1 %v1933_v44  ;;  %v1969_v44 = vld [vmem:[%s4295_s7 + $0x28] sm:$0xff] }
 0x3e9   : > { %2898 = vmatmul.msk.f32.vlgmr.msra.gmra.mxu0 %vm810_vm1, %v3909_v2  ;;  %2906 = vmatmul.msk.f32.vlgmr.msra.gmra.mxu1 %vm810_vm1, %v3909_v2 }
 0x3ea   : > { %v1813_v60 = vpop.f32.mrf.mxu2  ;;  %v1854_v12 = vpop.f32.mrf.mxu3 }
 0x3eb   : > { %v1814_v61 = vadd.f32 %v1813_v60, %v3836_v51  ;;  %v1855_v21 = vadd.f32 %v1854_v12, %v3838_v11  ;;  %v1808_v51 = vadd.f32 %v3882_v45, %v3824_v18  ;;  %v1849_v11 = vadd.f32 %v3884_v55, %v3826_v52  ;;  %v1971_v60 = vld [vmem:[%s4295_s7 + $0x38] sm:$0xff] }
 0x3ec   : > { %v1923_v18 = vadd.f32 %v3860_v5, %v1852_v10 }
 0x3ed   : > { %v1926_v59 = vadd.f32 %v3858_v14, %v1814_v61  ;;  %v1927_v54 = vadd.f32 %v3858_v14, %v1855_v21  ;;  %v3947_v14 = vld [vmem:[%s4295_s7 + $0x10] sm:$0xff]  ;;  %v1918_v9 = vadd.f32 %v3866_v30, %v1808_v51 }
 0x3ef   : > { %v1959_v55 = vmax.f32 %v1927_v54, 0.0  ;;  %v1950_v15 = vmax.f32 %v1918_v9, 0.0 }
 0x3f1   : > { %2899 = vmatmul.msk.f32.gmra.mxu0 %vm810_vm1, %v3918_v38  ;;  %2907 = vmatmul.msk.f32.gmra.mxu1 %vm810_vm1, %v3918_v38 }
 0x3f2   : > { %v1816_v22 = vpop.f32.mrf.mxu2  ;;  %v1857_v24 = vpop.f32.mrf.mxu3 }
 0x3f3   : > { %v1817_v1 = vadd.f32 %v1816_v22, %v3840_v53  ;;  %v1858_v31 = vadd.f32 %v1857_v24, %v3842_v29  ;;  %v1846_v53 = vadd.f32 %v3864_v43, %v3822_v47  ;;  %v1922_v29 = vadd.f32 %v3860_v5, %v1811_v50 }
 0x3f4   : > { %v1919_v47 = vadd.f32 %v3866_v30, %v1849_v11  ;;  %v1958_v43 = vmax.f32 %v1926_v59, 0.0  ;;  %v1799_v5 = vadd.f32 %v3848_v56, %v3812_v41  ;;  %v1796_v41 = vadd.f32 %v4315_v37, %v4314_v32  ;;  %v4316_v56 = vld [vmem:[#allocation8_spill] sm:$0xff] }
 0x3f5   : > { %v1930_v26 = vadd.f32 %v3852_v48, %v1817_v1  ;;  %v1931_v27 = vadd.f32 %v3852_v48, %v1858_v31  ;;  %v1802_v48 = vadd.f32 %v3854_v49, %v3816_v40  ;;  %v1914_v40 = vadd.f32 %v3872_v33, %v1805_v7  ;;  %v4034_v7 = vpop.permute.xlu0 %2009 }
 0x3f6   : > { %v1915_v30 = vadd.f32 %v3872_v33, %v1846_v53  ;;  %v1954_v46 = vmax.f32 %v1922_v29, 0.0  ;;  %v1955_v49 = vmax.f32 %v1923_v18, 0.0  ;;  %v1837_v4 = vadd.f32 %v4317_v58, %v4316_v56  ;;  %v4036_v53 = vpop.permute.xlu1 %2004 }
 0x3f7   : > { %v1962_v45 = vmax.f32 %v1930_v26, 0.0  ;;  %v1963_v52 = vmax.f32 %v1931_v27, 0.0  ;;  %v1910_v57 = vadd.f32 %v3890_v17, %v1802_v48  ;;  %v1951_v20 = vmax.f32 %v1919_v47, 0.0 }
 0x3f8   : > { %v1906_v33 = vadd.f32 %v3898_v28, %v1799_v5  ;;  %v1946_v36 = vmax.f32 %v1914_v40, 0.0  ;;  %v1947_v6 = vmax.f32 %v1915_v30, 0.0  ;;  %v1902_v35 = vadd.f32 %v3902_v16, %v1796_v41 }
 0x3f9   : > { %2126 = vmatpush.msra.mxu2 %v1962_v45  ;;  %2167 = vmatpush.msra.mxu3 %v1963_v52  ;;  %v1903_v17 = vadd.f32 %v3902_v16, %v1837_v4  ;;  %v1942_v62 = vmax.f32 %v1910_v57, 0.0  ;;  %v1968_v16 = vld [vmem:[%s4295_s7 + $0x20] sm:$0xff] }
 0x3fa   : > { %2900 = vmatmul.msk.f32.gmra.mxu0 %vm810_vm1, %v3947_v14  ;;  %2908 = vmatmul.msk.f32.gmra.mxu1 %vm810_vm1, %v3947_v14  ;;  %v1938_v28 = vmax.f32 %v1906_v33, 0.0  ;;  %v1934_v13 = vmax.f32 %v1902_v35, 0.0 }
 0x3fb   : > { %2127 = vmatpush.msra.mxu2 %v1958_v43  ;;  %2168 = vmatpush.msra.mxu3 %v1959_v55  ;;  %v1935_v34 = vmax.f32 %v1903_v17, 0.0 }
 0x3fd   : > { %2128 = vmatpush.msra.mxu2 %v1954_v46  ;;  %2169 = vmatpush.msra.mxu3 %v1955_v49  ;;  %v4044_v48 = vpop.permute.xlu0 %1994 }
 0x3fe   : > { %v4046_v47 = vpop.permute.xlu1 %1989 }
 0x3ff   : > { %2129 = vmatpush.msra.mxu2 %v1950_v15  ;;  %2170 = vmatpush.msra.mxu3 %v1951_v20 }
 0x401   : > { %2130 = vmatpush.msra.mxu2 %v1946_v36  ;;  %2171 = vmatpush.msra.mxu3 %v1947_v6 }
 0x402   : > { %2901 = vmatmul.msk.f32.gmra.mxu0 %vm810_vm1, %v1967_v25  ;;  %2909 = vmatmul.msk.f32.gmra.mxu1 %vm810_vm1, %v1967_v25 }
 0x403   : > { %2131 = vmatpush.msra.mxu2 %v1942_v62  ;;  %2172 = vmatpush.msra.mxu3 %v1943_v0 }
 0x405   : > { %2132 = vmatpush.msra.mxu2 %v1938_v28  ;;  %2173 = vmatpush.msra.mxu3 %v1939_v8  ;;  %v4066_v6 = vpop.permute.xlu0 %1979 }
 0x407   : > { %2133 = vmatpush.msra.mxu2 %v1934_v13  ;;  %2174 = vmatpush.msra.mxu3 %v1935_v34 }
 0x408   : > { %2914 = vmatmul.msk.f32.vlgmr.msra.gmra.mxu2 %vm810_vm1, %v3909_v2  ;;  %2922 = vmatmul.msk.f32.vlgmr.msra.gmra.mxu3 %vm810_vm1, %v3909_v2  ;;  %v1970_v2 = vld [vmem:[%s4295_s7 + $0x30] sm:$0xff] }
 0x40a   : > { %2902 = vmatmul.msk.f32.gmra.mxu0 %vm810_vm1, %v1968_v16  ;;  %2910 = vmatmul.msk.f32.gmra.mxu1 %vm810_vm1, %v1968_v16 }
 0x410   : > { %2915 = vmatmul.msk.f32.gmra.mxu2 %vm810_vm1, %v3918_v38  ;;  %2923 = vmatmul.msk.f32.gmra.mxu3 %vm810_vm1, %v3918_v38 }
 0x412   : > { %2903 = vmatmul.msk.f32.gmra.mxu0 %vm810_vm1, %v1969_v44  ;;  %2911 = vmatmul.msk.f32.gmra.mxu1 %vm810_vm1, %v1969_v44 }
 0x418   : > { %2916 = vmatmul.msk.f32.gmra.mxu2 %vm810_vm1, %v3947_v14  ;;  %2924 = vmatmul.msk.f32.gmra.mxu3 %vm810_vm1, %v3947_v14  ;;  %v4042_v14 = vpop.permute.xlu2 %1999 }
 0x41a   : > { %2904 = vmatmul.msk.f32.gmra.mxu0 %vm810_vm1, %v1970_v2  ;;  %2912 = vmatmul.msk.f32.gmra.mxu1 %vm810_vm1, %v1970_v2 }
 0x420   : > { %2917 = vmatmul.msk.f32.gmra.mxu2 %vm810_vm1, %v1967_v25  ;;  %2925 = vmatmul.msk.f32.gmra.mxu3 %vm810_vm1, %v1967_v25  ;;  %v4062_v15 = vpop.permute.xlu2 %1984  ;;  %v4068_v25 = vpop.permute.xlu1 %1974 }
 0x422   : > { %2905 = vmatmul.msk.f32.gmra.mxu0 %vm810_vm1, %v1971_v60  ;;  %2913 = vmatmul.msk.f32.gmra.mxu1 %vm810_vm1, %v1971_v60 }
 0x428   : > { %2918 = vmatmul.msk.f32.gmra.mxu2 %vm810_vm1, %v1968_v16  ;;  %2926 = vmatmul.msk.f32.gmra.mxu3 %vm810_vm1, %v1968_v16 }
 0x430   : > { %2919 = vmatmul.msk.f32.gmra.mxu2 %vm810_vm1, %v1969_v44  ;;  %2927 = vmatmul.msk.f32.gmra.mxu3 %vm810_vm1, %v1969_v44 }
 0x438   : > { %2920 = vmatmul.msk.f32.gmra.mxu2 %vm810_vm1, %v1970_v2  ;;  %2928 = vmatmul.msk.f32.gmra.mxu3 %vm810_vm1, %v1970_v2 }
 0x440   : > { %2921 = vmatmul.msk.f32.gmra.mxu2 %vm810_vm1, %v1971_v60  ;;  %2929 = vmatmul.msk.f32.gmra.mxu3 %vm810_vm1, %v1971_v60 }
 0x466   : > { %v4022_v12 = vpop.f32.mrf.mxu0  ;;  %v4024_v38 = vpop.f32.mrf.mxu1 }
 0x467   : > { %v2054_v13 = vadd.f32 %v4022_v12, %v4068_v25  ;;  %v2095_v34 = vadd.f32 %v4024_v38, %v4068_v25 }
 0x46e   : > { %v2056_v61 = vpop.f32.mrf.mxu0  ;;  %v2097_v21 = vpop.f32.mrf.mxu1 }
 0x46f   : > { %v2057_v35 = vadd.f32 %v2056_v61, %v4066_v6  ;;  %v2098_v17 = vadd.f32 %v2097_v21, %v4066_v6  ;;  %v2200_v61 = vmax.f32 %v2054_v13, 0.0  ;;  %v2201_v21 = vmax.f32 %v2095_v34, 0.0 }
 0x471   : > { %v2204_v2 = vmax.f32 %v2057_v35, 0.0  ;;  %v2205_v60 = vmax.f32 %v2098_v17, 0.0 }
 0x477   : > { %v2059_v22 = vpop.f32.mrf.mxu0  ;;  %v2100_v24 = vpop.f32.mrf.mxu1 }
 0x478   : > { %v2060_v20 = vadd.f32 %v2059_v22, %v4062_v15  ;;  %v2101_v33 = vadd.f32 %v2100_v24, %v4062_v15  ;;  %v4079_v22 = vld [vmem:[%s4296_s8] sm:$0xff]  ;;  %v4088_v24 = vld [vmem:[%s4296_s8 + $0x8] sm:$0xff] }
 0x47a   : > { %v2208_v16 = vmax.f32 %v2060_v20, 0.0  ;;  %v2209_v44 = vmax.f32 %v2101_v33, 0.0  ;;  %v2238_v20 = vld [vmem:[%s4296_s8 + $0x30] sm:$0xff]  ;;  %v2239_v33 = vld [vmem:[%s4296_s8 + $0x38] sm:$0xff] }
 0x47f   : > { %v2062_v50 = vpop.f32.mrf.mxu0  ;;  %v2103_v10 = vpop.f32.mrf.mxu1 }
 0x480   : > { %v2063_v58 = vadd.f32 %v2062_v50, %v4046_v47  ;;  %v2104_v4 = vadd.f32 %v2103_v10, %v4046_v47 }
 0x482   : > { %v2212_v62 = vmax.f32 %v2063_v58, 0.0  ;;  %v2213_v0 = vmax.f32 %v2104_v4, 0.0 }
 0x487   : > { %v2065_v1 = vpop.f32.mrf.mxu0  ;;  %v2106_v31 = vpop.f32.mrf.mxu1 }
 0x488   : > { %v2066_v32 = vadd.f32 %v2065_v1, %v4044_v48  ;;  %v2107_v37 = vadd.f32 %v2106_v31, %v4044_v48  ;;  %v4097_v1 = vld [vmem:[%s4296_s8 + $0x10] sm:$0xff] }
 0x48a   : > { %v2216_v63 = vmax.f32 %v2066_v32, 0.0  ;;  %v2217_v36 = vmax.f32 %v2107_v37, 0.0 }
 0x48b   : > { %v4026_v51 = vpop.f32.mrf.mxu2  ;;  %v4028_v11 = vpop.f32.mrf.mxu3 }
 0x48f   : > { %v2068_v59 = vpop.f32.mrf.mxu0  ;;  %v2109_v54 = vpop.f32.mrf.mxu1 }
 0x490   : > { %v2069_v42 = vadd.f32 %v2068_v59, %v4042_v14  ;;  %v2110_v19 = vadd.f32 %v2109_v54, %v4042_v14 }
 0x492   : > { %v2220_v57 = vmax.f32 %v2069_v42, 0.0  ;;  %v2221_v3 = vmax.f32 %v2110_v19, 0.0 }
 0x493   : > { %v4030_v26 = vpop.f32.mrf.mxu2  ;;  %v4032_v27 = vpop.f32.mrf.mxu3 }
 0x497   : > { %v2071_v29 = vpop.f32.mrf.mxu0  ;;  %v2112_v18 = vpop.f32.mrf.mxu1 }
 0x498   : > { %v2072_v43 = vadd.f32 %v2071_v29, %v4036_v53  ;;  %v2113_v55 = vadd.f32 %v2112_v18, %v4036_v53 }
 0x49a   : > { %v2224_v41 = vmax.f32 %v2072_v43, 0.0  ;;  %v2225_v56 = vmax.f32 %v2113_v55, 0.0 }
 0x49b   : > { %v4038_v45 = vpop.f32.mrf.mxu2  ;;  %v4040_v52 = vpop.f32.mrf.mxu3 }
 0x49c   : > { %v2183_v37 = vadd.f32 %v4040_v52, %v4062_v15  ;;  %v2177_v52 = vadd.f32 %v4028_v11, %v4068_v25  ;;  %v2237_v11 = vld [vmem:[%s4296_s8 + $0x28] sm:$0xff] }
 0x49f   : > { %v2074_v39 = vpop.f32.mrf.mxu0  ;;  %v2115_v9 = vpop.f32.mrf.mxu1 }
 0x4a0   : > { %v2075_v5 = vadd.f32 %v2074_v39, %v4034_v7  ;;  %v2116_v23 = vadd.f32 %v2115_v9, %v4034_v7 }
 0x4a2   : > { %v2228_v40 = vmax.f32 %v2075_v5, 0.0  ;;  %v2229_v30 = vmax.f32 %v2116_v23, 0.0 }
 0x4a3   : > { %v4054_v46 = vpop.f32.mrf.mxu2  ;;  %v4056_v49 = vpop.f32.mrf.mxu3 }
 0x4a4   : > { %2312 = vmatpush.msrb.mxu0 %v2228_v40  ;;  %2353 = vmatpush.msrb.mxu1 %v2229_v30 }
 0x4a6   : > { %2313 = vmatpush.msrb.mxu0 %v2224_v41  ;;  %2354 = vmatpush.msrb.mxu1 %v2225_v56 }
 0x4a8   : > { %2314 = vmatpush.msrb.mxu0 %v2220_v57  ;;  %2355 = vmatpush.msrb.mxu1 %v2221_v3  ;;  %v2211_v57 = vmax.f32 %v2183_v37, 0.0 }
 0x4aa   : > { %2315 = vmatpush.msrb.mxu0 %v2216_v63  ;;  %2356 = vmatpush.msrb.mxu1 %v2217_v36 }
 0x4ab   : > { %v2147_v28 = vpop.f32.mrf.mxu2  ;;  %v2188_v8 = vpop.f32.mrf.mxu3 }
 0x4ac   : > { %2316 = vmatpush.msrb.mxu0 %v2212_v62  ;;  %2357 = vmatpush.msrb.mxu1 %v2213_v0  ;;  %v2148_v23 = vadd.f32 %v2147_v28, %v4044_v48  ;;  %v2189_v42 = vadd.f32 %v2188_v8, %v4044_v48  ;;  %v2142_v48 = vadd.f32 %v4038_v45, %v4062_v15  ;;  %v2203_v15 = vmax.f32 %v2177_v52, 0.0 }
 0x4ad   : > { %v2136_v45 = vadd.f32 %v4026_v51, %v4068_v25 }
 0x4ae   : > { %2317 = vmatpush.msrb.mxu0 %v2208_v16  ;;  %2358 = vmatpush.msrb.mxu1 %v2209_v44  ;;  %v2218_v41 = vmax.f32 %v2148_v23, 0.0  ;;  %v2219_v56 = vmax.f32 %v2189_v42, 0.0  ;;  %v2210_v4 = vmax.f32 %v2142_v48, 0.0 }
 0x4af   : > { %v2202_v51 = vmax.f32 %v2136_v45, 0.0 }
 0x4b0   : > { %2318 = vmatpush.msrb.mxu0 %v2204_v2  ;;  %2359 = vmatpush.msrb.mxu1 %v2205_v60  ;;  %v4182_v2 = vpop.permute.xlu2 %2277  ;;  %v4184_v60 = vpop.permute.xlu0 %2272 }
 0x4b2   : > { %2319 = vmatpush.msrb.mxu0 %v2200_v61  ;;  %2360 = vmatpush.msrb.mxu1 %v2201_v21 }
 0x4b3   : > { %v2150_v12 = vpop.f32.mrf.mxu2  ;;  %v2191_v38 = vpop.f32.mrf.mxu3  ;;  %2930 = vmatmul.msk.f32.vlgmr.msrb.gmra.mxu0 %vm810_vm1, %v4079_v22  ;;  %2938 = vmatmul.msk.f32.vlgmr.msrb.gmra.mxu1 %vm810_vm1, %v4079_v22 }
 0x4b4   : > { %v2151_v9 = vadd.f32 %v2150_v12, %v4042_v14  ;;  %v2192_v43 = vadd.f32 %v2191_v38, %v4042_v14  ;;  %v2186_v14 = vadd.f32 %v4056_v49, %v4046_v47  ;;  %v4190_v38 = vpop.permute.xlu1 %2267 }
 0x4b6   : > { %v2222_v30 = vmax.f32 %v2151_v9, 0.0  ;;  %v2223_v32 = vmax.f32 %v2192_v43, 0.0  ;;  %v2215_v58 = vmax.f32 %v2186_v14, 0.0 }
 0x4bb   : > { %v2153_v50 = vpop.f32.mrf.mxu2  ;;  %v2194_v10 = vpop.f32.mrf.mxu3  ;;  %2931 = vmatmul.msk.f32.gmra.mxu0 %vm810_vm1, %v4088_v24  ;;  %2939 = vmatmul.msk.f32.gmra.mxu1 %vm810_vm1, %v4088_v24 }
 0x4bc   : > { %v2154_v54 = vadd.f32 %v2153_v50, %v4036_v53  ;;  %v2195_v29 = vadd.f32 %v2194_v10, %v4036_v53  ;;  %v2235_v53 = vld [vmem:[%s4296_s8 + $0x18] sm:$0xff] }
 0x4be   : > { %v2226_v19 = vmax.f32 %v2154_v54, 0.0  ;;  %v2227_v40 = vmax.f32 %v2195_v29, 0.0 }
 0x4c3   : > { %v2156_v31 = vpop.f32.mrf.mxu2  ;;  %v2197_v59 = vpop.f32.mrf.mxu3  ;;  %2932 = vmatmul.msk.f32.gmra.mxu0 %vm810_vm1, %v4097_v1  ;;  %2940 = vmatmul.msk.f32.gmra.mxu1 %vm810_vm1, %v4097_v1 }
 0x4c4   : > { %v2157_v18 = vadd.f32 %v2156_v31, %v4034_v7  ;;  %v2198_v39 = vadd.f32 %v2197_v59, %v4034_v7  ;;  %v2145_v7 = vadd.f32 %v4054_v46, %v4046_v47  ;;  %v2139_v47 = vadd.f32 %v4030_v26, %v4066_v6  ;;  %v2236_v26 = vld [vmem:[%s4296_s8 + $0x20] sm:$0xff] }
 0x4c5   : > { %v2180_v46 = vadd.f32 %v4032_v27, %v4066_v6 }
 0x4c6   : > { %v2230_v55 = vmax.f32 %v2157_v18, 0.0  ;;  %v2231_v5 = vmax.f32 %v2198_v39, 0.0  ;;  %v2214_v49 = vmax.f32 %v2145_v7, 0.0  ;;  %v2206_v3 = vmax.f32 %v2139_v47, 0.0 }
 0x4c7   : > { %v2207_v27 = vmax.f32 %v2180_v46, 0.0 }
 0x4c8   : > { %2394 = vmatpush.msrb.mxu2 %v2230_v55  ;;  %2435 = vmatpush.msrb.mxu3 %v2231_v5 }
 0x4ca   : > { %2395 = vmatpush.msrb.mxu2 %v2226_v19  ;;  %2436 = vmatpush.msrb.mxu3 %v2227_v40 }
 0x4cb   : > { %2933 = vmatmul.msk.f32.gmra.mxu0 %vm810_vm1, %v2235_v53  ;;  %2941 = vmatmul.msk.f32.gmra.mxu1 %vm810_vm1, %v2235_v53 }
 0x4cc   : > { %2396 = vmatpush.msrb.mxu2 %v2222_v30  ;;  %2437 = vmatpush.msrb.mxu3 %v2223_v32  ;;  %v4210_v32 = vpop.permute.xlu1 %2252 }
 0x4ce   : > { %2397 = vmatpush.msrb.mxu2 %v2218_v41  ;;  %2438 = vmatpush.msrb.mxu3 %v2219_v56 }
 0x4d0   : > { %2398 = vmatpush.msrb.mxu2 %v2214_v49  ;;  %2439 = vmatpush.msrb.mxu3 %v2215_v58 }
 0x4d2   : > { %2399 = vmatpush.msrb.mxu2 %v2210_v4  ;;  %2440 = vmatpush.msrb.mxu3 %v2211_v57 }
 0x4d3   : > { %2934 = vmatmul.msk.f32.gmra.mxu0 %vm810_vm1, %v2236_v26  ;;  %2942 = vmatmul.msk.f32.gmra.mxu1 %vm810_vm1, %v2236_v26 }
 0x4d4   : > { %2400 = vmatpush.msrb.mxu2 %v2206_v3  ;;  %2441 = vmatpush.msrb.mxu3 %v2207_v27 }
 0x4d6   : > { %2401 = vmatpush.msrb.mxu2 %v2202_v51  ;;  %2442 = vmatpush.msrb.mxu3 %v2203_v15 }
 0x4d7   : > { %2946 = vmatmul.msk.f32.vlgmr.msrb.gmra.mxu2 %vm810_vm1, %v4079_v22  ;;  %2954 = vmatmul.msk.f32.vlgmr.msrb.gmra.mxu3 %vm810_vm1, %v4079_v22 }
 0x4db   : > { %2935 = vmatmul.msk.f32.gmra.mxu0 %vm810_vm1, %v2237_v11  ;;  %2943 = vmatmul.msk.f32.gmra.mxu1 %vm810_vm1, %v2237_v11 }
 0x4df   : > { %2947 = vmatmul.msk.f32.gmra.mxu2 %vm810_vm1, %v4088_v24  ;;  %2955 = vmatmul.msk.f32.gmra.mxu3 %vm810_vm1, %v4088_v24  ;;  %v4192_v24 = vpop.permute.xlu2 %2262 }
 0x4e3   : > { %2936 = vmatmul.msk.f32.gmra.mxu0 %vm810_vm1, %v2238_v20  ;;  %2944 = vmatmul.msk.f32.gmra.mxu1 %vm810_vm1, %v2238_v20 }
 0x4e7   : > { %2948 = vmatmul.msk.f32.gmra.mxu2 %vm810_vm1, %v4097_v1  ;;  %2956 = vmatmul.msk.f32.gmra.mxu3 %vm810_vm1, %v4097_v1  ;;  %v4194_v1 = vpop.permute.xlu0 %2257  ;;  %v4212_v48 = vpop.permute.xlu2 %2247 }
 0x4eb   : > { %2937 = vmatmul.msk.f32.gmra.mxu0 %vm810_vm1, %v2239_v33  ;;  %2945 = vmatmul.msk.f32.gmra.mxu1 %vm810_vm1, %v2239_v33 }
 0x4ef   : > { %2949 = vmatmul.msk.f32.gmra.mxu2 %vm810_vm1, %v2235_v53  ;;  %2957 = vmatmul.msk.f32.gmra.mxu3 %vm810_vm1, %v2235_v53  ;;  %v2243_v57 = vpop.permute.xlu0 %2242 }
 0x4f7   : > { %2950 = vmatmul.msk.f32.gmra.mxu2 %vm810_vm1, %v2236_v26  ;;  %2958 = vmatmul.msk.f32.gmra.mxu3 %vm810_vm1, %v2236_v26 }
 0x4ff   : > { %2951 = vmatmul.msk.f32.gmra.mxu2 %vm810_vm1, %v2237_v11  ;;  %2959 = vmatmul.msk.f32.gmra.mxu3 %vm810_vm1, %v2237_v11 }
 0x507   : > { %2952 = vmatmul.msk.f32.gmra.mxu2 %vm810_vm1, %v2238_v20  ;;  %2960 = vmatmul.msk.f32.gmra.mxu3 %vm810_vm1, %v2238_v20 }
 0x50f   : > { %2953 = vmatmul.msk.f32.gmra.mxu2 %vm810_vm1, %v2239_v33  ;;  %2961 = vmatmul.msk.f32.gmra.mxu3 %vm810_vm1, %v2239_v33 }
 0x530   : > { %v4174_v63 = vpop.f32.mrf.mxu0  ;;  %v4176_v36 = vpop.f32.mrf.mxu1 }
 0x531   : > { %v2322_v26 = vadd.f32 %v4174_v63, %v2243_v57  ;;  %v2363_v3 = vadd.f32 %v4176_v36, %v2243_v57 }
 0x533   : > { %v2468_v20 = vmax.f32 %v2322_v26, 0.0  ;;  %v2469_v33 = vmax.f32 %v2363_v3, 0.0 }
 0x538   : > { %v2324_v6 = vpop.f32.mrf.mxu0  ;;  %v2365_v25 = vpop.f32.mrf.mxu1 }
 0x539   : > { %v2325_v58 = vadd.f32 %v2324_v6, %v4212_v48  ;;  %v2366_v45 = vadd.f32 %v2365_v25, %v4212_v48  ;;  %v2500_v6 = vld [vmem:[%s4297_s9] sm:$0x1] }
 0x53b   : > { %v2472_v15 = vmax.f32 %v2325_v58, 0.0  ;;  %v2473_v11 = vmax.f32 %v2366_v45, 0.0 }
 0x540   : > { %v2327_v35 = vpop.f32.mrf.mxu0  ;;  %v2368_v17 = vpop.f32.mrf.mxu1 }
 0x541   : > { %v2328_v37 = vadd.f32 %v2327_v35, %v4210_v32  ;;  %v2369_v41 = vadd.f32 %v2368_v17, %v4210_v32 }
 0x543   : > { %v2476_v27 = vmax.f32 %v2328_v37, 0.0  ;;  %v2477_v51 = vmax.f32 %v2369_v41, 0.0 }
 0x548   : > { %v2330_v62 = vpop.f32.mrf.mxu0  ;;  %v2371_v0 = vpop.f32.mrf.mxu1 }
 0x549   : > { %v2331_v53 = vadd.f32 %v2330_v62, %v4194_v1  ;;  %v2372_v7 = vadd.f32 %v2371_v0, %v4194_v1 }
 0x54b   : > { %v2480_v52 = vmax.f32 %v2331_v53, 0.0  ;;  %v2481_v4 = vmax.f32 %v2372_v7, 0.0 }
 0x550   : > { %v2333_v28 = vpop.f32.mrf.mxu0  ;;  %v2374_v8 = vpop.f32.mrf.mxu1 }
 0x551   : > { %v2334_v23 = vadd.f32 %v2333_v28, %v4192_v24  ;;  %v2375_v42 = vadd.f32 %v2374_v8, %v4192_v24 }
 0x553   : > { %v2484_v56 = vmax.f32 %v2334_v23, 0.0  ;;  %v2485_v47 = vmax.f32 %v2375_v42, 0.0 }
 0x558   : > { %v2336_v13 = vpop.f32.mrf.mxu0  ;;  %v2377_v34 = vpop.f32.mrf.mxu1 }
 0x559   : > { %v2337_v9 = vadd.f32 %v2336_v13, %v4190_v38  ;;  %v2378_v43 = vadd.f32 %v2377_v34, %v4190_v38 }
 0x55a   : > { %v4178_v16 = vpop.f32.mrf.mxu2  ;;  %v4180_v44 = vpop.f32.mrf.mxu3 }
 0x55b   : > { %v2488_v14 = vmax.f32 %v2337_v9, 0.0  ;;  %v2489_v30 = vmax.f32 %v2378_v43, 0.0  ;;  %v2404_v53 = vadd.f32 %v4178_v16, %v2243_v57 }
 0x560   : > { %v2339_v61 = vpop.f32.mrf.mxu0  ;;  %v2380_v21 = vpop.f32.mrf.mxu1 }
 0x561   : > { %v2340_v31 = vadd.f32 %v2339_v61, %v4184_v60  ;;  %v2381_v59 = vadd.f32 %v2380_v21, %v4184_v60 }
 0x562   : > { %v4186_v22 = vpop.f32.mrf.mxu2  ;;  %v4188_v12 = vpop.f32.mrf.mxu3 }
 0x563   : > { %v2492_v19 = vmax.f32 %v2340_v31, 0.0  ;;  %v2493_v40 = vmax.f32 %v2381_v59, 0.0  ;;  %v2407_v42 = vadd.f32 %v4186_v22, %v4212_v48 }
 0x568   : > { %v2342_v50 = vpop.f32.mrf.mxu0  ;;  %v2383_v10 = vpop.f32.mrf.mxu1 }
 0x569   : > { %v2343_v54 = vadd.f32 %v2342_v50, %v4182_v2  ;;  %v2384_v29 = vadd.f32 %v2383_v10, %v4182_v2 }
 0x56a   : > { %v4200_v18 = vpop.f32.mrf.mxu2  ;;  %v4202_v39 = vpop.f32.mrf.mxu3 }
 0x56b   : > { %v2496_v55 = vmax.f32 %v2343_v54, 0.0  ;;  %v2497_v5 = vmax.f32 %v2384_v29, 0.0 }
 0x56d   : > { %2517 = vmatpush.msra.mxu0 %v2496_v55  ;;  %2537 = vmatpush.msra.mxu1 %v2497_v5  ;;  %v2451_v5 = vadd.f32 %v4202_v39, %v4210_v32 }
 0x56f   : > { %2518 = vmatpush.msra.mxu0 %v2492_v19  ;;  %2538 = vmatpush.msra.mxu1 %v2493_v40  ;;  %v2479_v39 = vmax.f32 %v2451_v5, 0.0 }
 0x571   : > { %2519 = vmatpush.msra.mxu0 %v2488_v14  ;;  %2539 = vmatpush.msra.mxu1 %v2489_v30  ;;  %v2474_v14 = vmax.f32 %v2407_v42, 0.0 }
 0x572   : > { %v2412_v46 = vpop.f32.mrf.mxu2  ;;  %v2453_v49 = vpop.f32.mrf.mxu3 }
 0x573   : > { %2520 = vmatpush.msra.mxu0 %v2484_v56  ;;  %2540 = vmatpush.msra.mxu1 %v2485_v47  ;;  %v2454_v43 = vadd.f32 %v2453_v49, %v4194_v1  ;;  %v2603_v56 = vlaneseq }
 0x575   : > { %2521 = vmatpush.msra.mxu0 %v2480_v52  ;;  %2541 = vmatpush.msra.mxu1 %v2481_v4  ;;  %v2483_v40 = vmax.f32 %v2454_v43, 0.0  ;;  %vm2605_vm6 = vcmp.lt.s32.totalorder %v2603_v56, 512 }
 0x577   : > { %2522 = vmatpush.msra.mxu0 %v2476_v27  ;;  %2542 = vmatpush.msra.mxu1 %v2477_v51 }
 0x579   : > { %2523 = vmatpush.msra.mxu0 %v2472_v15  ;;  %2543 = vmatpush.msra.mxu1 %v2473_v11 }
 0x57a   : > { %v2415_v25 = vpop.f32.mrf.mxu2  ;;  %v2456_v63 = vpop.f32.mrf.mxu3 }
 0x57b   : > { %2524 = vmatpush.msra.mxu0 %v2468_v20  ;;  %2544 = vmatpush.msra.mxu1 %v2469_v33  ;;  %v2416_v59 = vadd.f32 %v2415_v25, %v4192_v24  ;;  %v2457_v54 = vadd.f32 %v2456_v63, %v4192_v24 }
 0x57c   : > { %2962 = vmatmul.msk.f32.vlgmr.msra.gmra.mxu0 %vm810_vm1, %v2500_v6  ;;  %2963 = vmatmul.msk.f32.vlgmr.msra.gmra.mxu1 %vm810_vm1, %v2500_v6 }
 0x57d   : > { %v2486_v23 = vmax.f32 %v2416_v59, 0.0  ;;  %v2487_v24 = vmax.f32 %v2457_v54, 0.0 }
 0x582   : > { %v2418_v36 = vpop.f32.mrf.mxu2  ;;  %v2459_v35 = vpop.f32.mrf.mxu3 }
 0x583   : > { %v2419_v21 = vadd.f32 %v2418_v36, %v4190_v38  ;;  %v2460_v50 = vadd.f32 %v2459_v35, %v4190_v38  ;;  %v2410_v38 = vadd.f32 %v4200_v18, %v4210_v32  ;;  %v2445_v18 = vadd.f32 %v4180_v44, %v2243_v57  ;;  %v2504_v44 = vpop.permute.xlu1 %2503 }
 0x585   : > { %v2490_v55 = vmax.f32 %v2419_v21, 0.0  ;;  %v2478_v7 = vmax.f32 %v2410_v38, 0.0  ;;  %v2471_v30 = vmax.f32 %v2445_v18, 0.0 }
 0x58a   : > { %v2421_v17 = vpop.f32.mrf.mxu2  ;;  %v2462_v62 = vpop.f32.mrf.mxu3 }
 0x58b   : > { %v2422_v8 = vadd.f32 %v2421_v17, %v4184_v60  ;;  %v2463_v13 = vadd.f32 %v2462_v62, %v4184_v60  ;;  %v2413_v60 = vadd.f32 %v2412_v46, %v4194_v1  ;;  %v2448_v1 = vadd.f32 %v4188_v12, %v4212_v48 }
 0x58c   : > { %v2470_v12 = vmax.f32 %v2404_v53, 0.0 }
 0x58d   : > { %v2494_v29 = vmax.f32 %v2422_v8, 0.0  ;;  %v2495_v9 = vmax.f32 %v2463_v13, 0.0  ;;  %v2482_v19 = vmax.f32 %v2413_v60, 0.0  ;;  %v2475_v22 = vmax.f32 %v2448_v1, 0.0 }
 0x592   : > { %v2424_v0 = vpop.f32.mrf.mxu2  ;;  %v2465_v28 = vpop.f32.mrf.mxu3 }
 0x593   : > { %v2425_v34 = vadd.f32 %v2424_v0, %v4182_v2  ;;  %v2466_v61 = vadd.f32 %v2465_v28, %v4182_v2  ;;  %v2491_v2 = vmax.f32 %v2460_v50, 0.0 }
 0x595   : > { %v2498_v10 = vmax.f32 %v2425_v34, 0.0  ;;  %v2499_v31 = vmax.f32 %v2466_v61, 0.0 }
 0x597   : > { %2557 = vmatpush.msra.mxu2 %v2498_v10  ;;  %2577 = vmatpush.msra.mxu3 %v2499_v31 }
 0x599   : > { %2558 = vmatpush.msra.mxu2 %v2494_v29  ;;  %2578 = vmatpush.msra.mxu3 %v2495_v9 }
 0x59b   : > { %2559 = vmatpush.msra.mxu2 %v2490_v55  ;;  %2579 = vmatpush.msra.mxu3 %v2491_v2 }
 0x59d   : > { %2560 = vmatpush.msra.mxu2 %v2486_v23  ;;  %2580 = vmatpush.msra.mxu3 %v2487_v24 }
 0x59f   : > { %2561 = vmatpush.msra.mxu2 %v2482_v19  ;;  %2581 = vmatpush.msra.mxu3 %v2483_v40 }
 0x5a1   : > { %2562 = vmatpush.msra.mxu2 %v2478_v7  ;;  %2582 = vmatpush.msra.mxu3 %v2479_v39 }
 0x5a3   : > { %2563 = vmatpush.msra.mxu2 %v2474_v14  ;;  %2583 = vmatpush.msra.mxu3 %v2475_v22 }
 0x5a5   : > { %2564 = vmatpush.msra.mxu2 %v2470_v12  ;;  %2584 = vmatpush.msra.mxu3 %v2471_v30 }
 0x5a6   : > { %2964 = vmatmul.msk.f32.vlgmr.msra.gmra.mxu2 %vm810_vm1, %v2500_v6  ;;  %2965 = vmatmul.msk.f32.vlgmr.msra.gmra.mxu3 %vm810_vm1, %v2500_v6 }
 0x5f9   : > { %v2546_v16 = vpop.f32.mrf.mxu1  ;;  %v2526_v48 = vpop.f32.mrf.mxu0 }
 0x5fa   : > { %v2547_v32 = vadd.f32 %v2546_v16, %v2504_v44  ;;  %v2527_v58 = vadd.f32 %v2526_v48, %v2504_v44 }
 0x5fc   : > { %v2593_v47 = vrot.slane %v2547_v32, 7 }
 0x5fe   : > { %v2597_v4 = vsel %vm2596_vm3, %v2527_v58, %v2593_v47 }
 0x629   : > { %v2566_v37 = vpop.f32.mrf.mxu2  ;;  %v2586_v41 = vpop.f32.mrf.mxu3 }
 0x62a   : > { %v2567_v46 = vadd.f32 %v2566_v37, %v2504_v44  ;;  %v2587_v49 = vadd.f32 %v2586_v41, %v2504_v44 }
 0x62c   : > { %v2594_v45 = vrot.slane %v2567_v46, 6  ;;  %v2595_v52 = vrot.slane %v2587_v49, 5 }
 0x62e   : > { %v2599_v57 = vsel %vm2598_vm4, %v2594_v45, %v2595_v52 }
 0x62f   : > { %v2601_v26 = vsel %vm2600_vm5, %v2597_v4, %v2599_v57 }
 0x630   : > { %2607 = vst.msk [vmem:[%s419_s25] sm:$0xf] %vm2605_vm6, %v2601_v26 }
 0x631   : > { %3062 = shalt.err (!%p3059_p5)
}
 0x632   : > { %2972 = dma.vmem_to_hbm [thread:$0]  (%p3216_p4), %s2624_s12, 64, %s2626_s13, %s2609_s20  }
 0x633 PF: > { %p2978_p6 = scmp.ge.s32.totalorder %s3113_s22, 2  ;;  %s2637_s21 = sand.u32 1, %s3093_s17  }
 0x634   : > { %s2638_s25 = scalar_lea.sflag [#allocation3], %s2637_s21 }
 0x635   : > { %p2975_p7 = pnand %p2978_p6, %p3223_p8 }
 0x637   : > { %p2976_p9 = pneg %p2975_p7 }
 0x639   : > { %3088 = dma.done.wait (%p2976_p9), %s2638_s25, 64  }
 0x63a   : > { %3090 = vsyncadd (%p2976_p9), %s2638_s25, 4294967232  ;;  %s24_s22 = sadd.s32 1, %s3113_s22   ;;  %s4318_s20 = sld [smem:[#allocation5_spill]] }
 0x63b   : > { %p21_p10 = scmp.ge.s32.totalorder %s24_s22, 4   ;;  %s4319_s21 = sld [smem:[#allocation6_spill]] }
 0x63c   : > { %s4320_s17 = smov %s3097_s18  ;;  %s4321_s18 = smov %s3101_s19 }
 0x63d   : > { %s4322_s19 = smov %s3229_s30  ;;  %23 = sbr.rel (!%p21_p10) target bundleno = 4 (0x4), region = 102 }
 0x642   :  { %2644 = vsyncpa [#allocation3], 1 }
 0x643   :  { %2646 = vsyncpa [#allocation3 + $0x1], 1 }

// kernel: tpu_custom_call.1
= control target key start
LH: loop header
LB: loop body
LE: loop exit
PB: predicated region body
PF: predicated region fallthrough
CT: control target
= control target key end

     0   :  { %16 = vsyncpa [#allocation3], 0  ;;  %s4288_s0 = inlined_call_operand.vmem [shape: f32[2,8,512], index: 0, kind: input, shape index: {}]   ;;  %s4289_s1 = inlined_call_operand.vmem [shape: f32[64,8], index: 1, kind: input, shape index: {}]   ;;  %s4290_s2 = inlined_call_operand.vmem [shape: f32[64,64], index: 2, kind: input, shape index: {}]   ;;  %s4291_s3 = inlined_call_operand.vmem [shape: f32[64,64], index: 3, kind: input, shape index: {}]   ;;  %s4292_s4 = inlined_call_operand.vmem [shape: f32[32,64], index: 4, kind: input, shape index: {}]   ;;  %s4293_s5 = inlined_call_operand.vmem [shape: f32[64,32], index: 5, kind: input, shape index: {}]   ;;  %s4294_s6 = inlined_call_operand.vmem [shape: f32[64,8], index: 6, kind: input, shape index: {}]   ;;  %s4295_s7 = inlined_call_operand.vmem [shape: f32[64,64], index: 7, kind: input, shape index: {}]   ;;  %s4296_s8 = inlined_call_operand.vmem [shape: f32[64,64], index: 8, kind: input, shape index: {}]   ;;  %s4297_s9 = inlined_call_operand.vmem [shape: f32[1,64], index: 9, kind: input, shape index: {}]   ;;  %s4298_s10 = inlined_call_operand.vmem [shape: f32[2,424,1], index: 10, kind: input, shape index: {}]   ;;  %s4299_s11 = inlined_call_operand.hbm [shape: f32[2,1,512], index: 11, kind: output, shape index: {}]  }
   0x1   :  { %18 = vsyncpa [#allocation3 + $0x1], 0  ;;  %s3176_s17 = smov 0   ;;  %s3178_s18 = smov 0  }
   0x2   :  { %s3180_s19 = smov 0   ;;  %s3182_s20 = smov 0  }
   0x3   :  { %s3184_s21 = smov 0   ;;  %s3186_s22 = smov 0  }
   0x4 LB: > { %4302 = sst [smem:[#allocation5_spill]] %s3109_s21  ;;  %s2713_s23 = sadd.s32 4294967295, %s3113_s22   ;;  %s3113_s22 = sphi %s3186_s22, %s24_s22   ;;  %s3109_s21 = sphi %s3184_s21, %s4319_s21   ;;  %s3105_s20 = sphi %s3182_s20, %s4318_s20   ;;  %s3101_s19 = sphi %s3180_s19, %s4322_s19   ;;  %s3097_s18 = sphi %s3178_s18, %s4321_s18   ;;  %s3093_s17 = sphi %s3176_s17, %s4320_s17  }
   0x5   : > { %s2714_s24 = sadd.s32 4294967294, %s3113_s22   ;;  %s36_s25 = sadd.s32 1, %s3109_s21 }
   0x6   : > { %s288_s26 = sadd.s32 1, %s3101_s19  ;;  %p38_p0 = scmp.ge.s32.totalorder %s36_s25, 2 }
   0x7   : > { %p298_p1 = scmp.ne.s32.totalorder %s3101_s19, %s3097_s18  ;;  %p299_p2 = scmp.eq.s32.totalorder %s2713_s23, 1 }
   0x8   : > { %p304_p3 = scmp.ne.s32.totalorder %s3097_s18, %s3093_s17  ;;  %s4324_s25 = smov (%p38_p0, %s36_s25), 0 }
   0x9   : > { %4303 = sst [smem:[#allocation6_spill]] %s4324_s25  ;;  %p3216_p4 = por %p299_p2, %p298_p1 }
   0xa   : > { %p305_p5 = scmp.eq.s32.totalorder %s2714_s24, 1  ;;  %s283_s28 = ssub.s32 %s3109_s21, %s4324_s25 }
   0xb   : > { %p2717_p6 = scmp.ge.s32.totalorder %s3113_s22, 1  ;;  %p286_p7 = scmp.eq.s32.totalorder %s283_s28, 0 }
   0xc   : > { %p3223_p8 = por %p305_p5, %p304_p3  ;;  %p371_p9 = scmp.lt.s32.totalorder %s3113_s22, 3 }
   0xd   : > { %s3229_s30 = scalar_select %p286_p7, %s3101_s19, %s288_s26  }
   0xe   : > { %p372_p10 = pnand %p2717_p6, %p371_p9 }
  0x10   : > { %375 = sbr.rel (%p372_p10) target bundleno = 1587 (0x633), region = 64 }
  0x15   : > { %p421_p11 = scmp.lt.s32.totalorder %s3105_s20, 1  ;;  %v3115_v0 = vmov 0   ;;  %v493_v1 = vld [vmem:[%s4289_s1] sm:$0xff]  ;;  %vm541_vm0 = vcmask 64512   ;;  %v494_v12 = vld [vmem:[%s4289_s1 + $0x8] sm:$0xff]  ;;  %v495_v16 = vld [vmem:[%s4289_s1 + $0x10] sm:$0xff] }
  0x16   : > { %3030 = vset.pattern.permute.xlu2 %v3115_v0  ;;  %3029 = vset.pattern.permute.xlu1 %v3115_v0  ;;  %v496_v20 = vld [vmem:[%s4289_s1 + $0x18] sm:$0xff]  ;;  %v497_v24 = vld [vmem:[%s4289_s1 + $0x20] sm:$0xff]  ;;  %v498_v28 = vld [vmem:[%s4289_s1 + $0x28] sm:$0xff]  ;;  %vm810_vm1 = vcmask 523264   ;;  %vm1671_vm2 = vcmask 261120   ;;  %vm2596_vm3 = vcmask 1040384  }
  0x17   : > { %3028 = vset.pattern.permute.xlu0 %v3115_v0  ;;  %s422_s12 = scalar_select %p421_p11, %s3105_s20, 1  ;;  %v499_v32 = vld [vmem:[%s4289_s1 + $0x30] sm:$0xff]  ;;  %v500_v36 = vld [vmem:[%s4289_s1 + $0x38] sm:$0xff]  ;;  %vm2598_vm4 = vcmask 1042434   ;;  %vm2600_vm5 = vcmask 1041408  }
  0x18   : > { %s3055_s24 = scalar_lea.hbm %s4299_s11, 8 }
  0x19   : > { %s2970_s13 = sshll.u32 %s422_s12, 5  ;;  %s2971_s14 = smul.u32 424, %s422_s12 }
  0x1a   : > { %s3236_s23 = scalar_lea.vmem %s4288_s0, %s2970_s13 }
  0x1b   : > { %s3244_s21 = scalar_lea.vmem %s4298_s10, %s2971_s14  ;;  %v489_v2 = vld [vmem:[%s3236_s23] sm:$0xff]  ;;  %v490_v3 = vld [vmem:[%s3236_s23 + $0x8] sm:$0xff]  ;;  %v491_v4 = vld [vmem:[%s3236_s23 + $0x10] sm:$0xff] }
  0x1c   : > { %581 = vmatpush.msra.mxu0 %v489_v2  ;;  %622 = vmatpush.msra.mxu1 %v490_v3  ;;  %v492_v5 = vld [vmem:[%s3236_s23 + $0x18] sm:$0xff]  ;;  %v441_v7 = vld [vmem:[%s3244_s21 + $0x28] sm:$0xff]  ;;  %v442_v9 = vld [vmem:[%s3244_s21 + $0x30] sm:$0xff] }
  0x1d   : > { %v443_v6 = vld [vmem:[%s3244_s21 + $0x38] sm:$0xff]  ;;  %663 = vmatpush.msra.mxu2 %v491_v4  ;;  %704 = vmatpush.msra.mxu3 %v492_v5  ;;  %v440_v10 = vld [vmem:[%s3244_s21 + $0x20] sm:$0xff]  ;;  %v438_v11 = vld [vmem:[%s3244_s21 + $0x10] sm:$0xff] }
  0x1e   : > { %v439_v8 = vld [vmem:[%s3244_s21 + $0x18] sm:$0xff]  ;;  %538 = vperm.xlu0 %3028, %v443_v6   ;;  %528 = vperm.xlu1 %3029, %v441_v7   ;;  %v437_v13 = vld [vmem:[%s3244_s21 + $0x8] sm:$0xff]  ;;  %v436_v14 = vld [vmem:[%s3244_s21] sm:$0xff] }
  0x1f   : > { %518 = vperm.xlu2 %3030, %v439_v8   ;;  %2722 = vmatmul.msk.f32.vlgmr.msra.gmra.mxu0 %vm541_vm0, %v493_v1  ;;  %v451_v15 = vld [vmem:[%s3244_s21 + $0x78] sm:$0xff]  ;;  %v450_v17 = vld [vmem:[%s3244_s21 + $0x70] sm:$0xff]  ;;  %v449_v18 = vld [vmem:[%s3244_s21 + $0x68] sm:$0xff] }
  0x20   : > { %2730 = vmatmul.msk.f32.vlgmr.msra.gmra.mxu1 %vm541_vm0, %v493_v1  ;;  %2738 = vmatmul.msk.f32.vlgmr.msra.gmra.mxu2 %vm541_vm0, %v493_v1  ;;  %v448_v19 = vld [vmem:[%s3244_s21 + $0x60] sm:$0xff]  ;;  %v447_v21 = vld [vmem:[%s3244_s21 + $0x58] sm:$0xff]  ;;  %v446_v22 = vld [vmem:[%s3244_s21 + $0x50] sm:$0xff] }
  0x21   : > { %2746 = vmatmul.msk.f32.vlgmr.msra.gmra.mxu3 %vm541_vm0, %v493_v1  ;;  %v445_v23 = vld [vmem:[%s3244_s21 + $0x48] sm:$0xff]  ;;  %v444_v25 = vld [vmem:[%s3244_s21 + $0x40] sm:$0xff]  ;;  %v459_v26 = vld [vmem:[%s3244_s21 + $0xb8] sm:$0xff] }
  0x22   : > { %v458_v27 = vld [vmem:[%s3244_s21 + $0xb0] sm:$0xff]  ;;  %v457_v29 = vld [vmem:[%s3244_s21 + $0xa8] sm:$0xff]  ;;  %v456_v30 = vld [vmem:[%s3244_s21 + $0xa0] sm:$0xff] }
  0x23   : > { %v455_v31 = vld [vmem:[%s3244_s21 + $0x98] sm:$0xff]  ;;  %v454_v33 = vld [vmem:[%s3244_s21 + $0x90] sm:$0xff]  ;;  %v453_v34 = vld [vmem:[%s3244_s21 + $0x88] sm:$0xff] }
  0x24   : > { %v452_v35 = vld [vmem:[%s3244_s21 + $0x80] sm:$0xff]  ;;  %v463_v37 = vld [vmem:[%s3244_s21 + $0xd8] sm:$0xff]  ;;  %v462_v38 = vld [vmem:[%s3244_s21 + $0xd0] sm:$0xff] }
  0x25   : > { %v461_v39 = vld [vmem:[%s3244_s21 + $0xc8] sm:$0xff]  ;;  %v460_v40 = vld [vmem:[%s3244_s21 + $0xc0] sm:$0xff]  ;;  %v471_v41 = vld [vmem:[%s3244_s21 + $0x118] sm:$0xff] }
  0x26   : > { %533 = vperm.xlu0 %3028, %v442_v9   ;;  %523 = vperm.xlu1 %3029, %v440_v10   ;;  %v470_v42 = vld [vmem:[%s3244_s21 + $0x110] sm:$0xff]  ;;  %v469_v43 = vld [vmem:[%s3244_s21 + $0x108] sm:$0xff]  ;;  %v468_v44 = vld [vmem:[%s3244_s21 + $0x100] sm:$0xff] }
  0x27   : > { %513 = vperm.xlu2 %3030, %v438_v11   ;;  %2723 = vmatmul.msk.f32.gmra.mxu0 %vm541_vm0, %v494_v12  ;;  %v467_v45 = vld [vmem:[%s3244_s21 + $0xf8] sm:$0xff]  ;;  %v466_v46 = vld [vmem:[%s3244_s21 + $0xf0] sm:$0xff]  ;;  %v465_v47 = vld [vmem:[%s3244_s21 + $0xe8] sm:$0xff] }
  0x28   : > { %2731 = vmatmul.msk.f32.gmra.mxu1 %vm541_vm0, %v494_v12  ;;  %2739 = vmatmul.msk.f32.gmra.mxu2 %vm541_vm0, %v494_v12  ;;  %v464_v48 = vld [vmem:[%s3244_s21 + $0xe0] sm:$0xff]  ;;  %v479_v49 = vld [vmem:[%s3244_s21 + $0x158] sm:$0xff]  ;;  %v478_v50 = vld [vmem:[%s3244_s21 + $0x150] sm:$0xff] }
  0x29   : > { %2747 = vmatmul.msk.f32.gmra.mxu3 %vm541_vm0, %v494_v12  ;;  %v477_v51 = vld [vmem:[%s3244_s21 + $0x148] sm:$0xff]  ;;  %v476_v52 = vld [vmem:[%s3244_s21 + $0x140] sm:$0xff]  ;;  %v475_v53 = vld [vmem:[%s3244_s21 + $0x138] sm:$0xff] }
  0x2a   : > { %v474_v54 = vld [vmem:[%s3244_s21 + $0x130] sm:$0xff]  ;;  %v473_v55 = vld [vmem:[%s3244_s21 + $0x128] sm:$0xff]  ;;  %v472_v56 = vld [vmem:[%s3244_s21 + $0x120] sm:$0xff] }
  0x2b   : > { %v487_v57 = vld [vmem:[%s3244_s21 + $0x198] sm:$0xff]  ;;  %v486_v58 = vld [vmem:[%s3244_s21 + $0x190] sm:$0xff]  ;;  %v485_v59 = vld [vmem:[%s3244_s21 + $0x188] sm:$0xff] }
  0x2c   : > { %v484_v60 = vld [vmem:[%s3244_s21 + $0x180] sm:$0xff]  ;;  %v483_v61 = vld [vmem:[%s3244_s21 + $0x178] sm:$0xff]  ;;  %v482_v62 = vld [vmem:[%s3244_s21 + $0x170] sm:$0xff] }
  0x2d   : > { %v481_v0 = vld [vmem:[%s3244_s21 + $0x168] sm:$0xff]  ;;  %v480_v3 = vld [vmem:[%s3244_s21 + $0x160] sm:$0xff] }
  0x2e   : > { %508 = vperm.xlu0 %3028, %v437_v13   ;;  %503 = vperm.xlu1 %3029, %v436_v14   ;;  %v488_v4 = vld [vmem:[%s3244_s21 + $0x1a0] sm:$0xff]  ;;  %s417_s21 = sand.u32 1, %s3097_s18  }
  0x2f   : > { %807 = vperm.xlu2 %3030, %v451_v15   ;;  %2724 = vmatmul.msk.f32.gmra.mxu0 %vm541_vm0, %v495_v16  ;;  %s2718_s16 = sshll.u32 %s417_s21, 2 }
  0x30   : > { %2732 = vmatmul.msk.f32.gmra.mxu1 %vm541_vm0, %v495_v16  ;;  %2740 = vmatmul.msk.f32.gmra.mxu2 %vm541_vm0, %v495_v16  ;;  %s419_s25 = scalar_lea.vmem [#allocation2], %s2718_s16 }
  0x31   : > { %2748 = vmatmul.msk.f32.gmra.mxu3 %vm541_vm0, %v495_v16  ;;  %s2623_s12 = sshll.u32 %s419_s25, 4  ;;  %s2624_s12 = int_to_ptr.vmem [resolvable:$true] %s2623_s12 }
  0x36   : > { %802 = vperm.xlu0 %3028, %v450_v17   ;;  %797 = vperm.xlu1 %3029, %v449_v18  }
  0x37   : > { %792 = vperm.xlu2 %3030, %v448_v19   ;;  %2725 = vmatmul.msk.f32.gmra.mxu0 %vm541_vm0, %v496_v20 }
  0x38   : > { %2733 = vmatmul.msk.f32.gmra.mxu1 %vm541_vm0, %v496_v20  ;;  %2741 = vmatmul.msk.f32.gmra.mxu2 %vm541_vm0, %v496_v20 }
  0x39   : > { %2749 = vmatmul.msk.f32.gmra.mxu3 %vm541_vm0, %v496_v20 }
  0x3e   : > { %787 = vperm.xlu0 %3028, %v447_v21   ;;  %782 = vperm.xlu1 %3029, %v446_v22  }
  0x3f   : > { %777 = vperm.xlu2 %3030, %v445_v23   ;;  %2726 = vmatmul.msk.f32.gmra.mxu0 %vm541_vm0, %v497_v24 }
  0x40   : > { %2734 = vmatmul.msk.f32.gmra.mxu1 %vm541_vm0, %v497_v24  ;;  %2742 = vmatmul.msk.f32.gmra.mxu2 %vm541_vm0, %v497_v24 }
  0x41   : > { %2750 = vmatmul.msk.f32.gmra.mxu3 %vm541_vm0, %v497_v24 }
  0x46   : > { %772 = vperm.xlu0 %3028, %v444_v25   ;;  %1076 = vperm.xlu1 %3029, %v459_v26  }
  0x47   : > { %1071 = vperm.xlu2 %3030, %v458_v27   ;;  %2727 = vmatmul.msk.f32.gmra.mxu0 %vm541_vm0, %v498_v28 }
  0x48   : > { %2735 = vmatmul.msk.f32.gmra.mxu1 %vm541_vm0, %v498_v28  ;;  %2743 = vmatmul.msk.f32.gmra.mxu2 %vm541_vm0, %v498_v28 }
  0x49   : > { %2751 = vmatmul.msk.f32.gmra.mxu3 %vm541_vm0, %v498_v28 }
  0x4e   : > { %1066 = vperm.xlu0 %3028, %v457_v29   ;;  %1061 = vperm.xlu1 %3029, %v456_v30  }
  0x4f   : > { %1056 = vperm.xlu2 %3030, %v455_v31   ;;  %2728 = vmatmul.msk.f32.gmra.mxu0 %vm541_vm0, %v499_v32 }
  0x50   : > { %2736 = vmatmul.msk.f32.gmra.mxu1 %vm541_vm0, %v499_v32  ;;  %2744 = vmatmul.msk.f32.gmra.mxu2 %vm541_vm0, %v499_v32 }
  0x51   : > { %2752 = vmatmul.msk.f32.gmra.mxu3 %vm541_vm0, %v499_v32 }
  0x56   : > { %1051 = vperm.xlu0 %3028, %v454_v33   ;;  %1046 = vperm.xlu1 %3029, %v453_v34  }
  0x57   : > { %1041 = vperm.xlu2 %3030, %v452_v35   ;;  %2729 = vmatmul.msk.f32.gmra.mxu0 %vm541_vm0, %v500_v36 }
  0x58   : > { %2737 = vmatmul.msk.f32.gmra.mxu1 %vm541_vm0, %v500_v36  ;;  %2745 = vmatmul.msk.f32.gmra.mxu2 %vm541_vm0, %v500_v36 }
  0x59   : > { %2753 = vmatmul.msk.f32.gmra.mxu3 %vm541_vm0, %v500_v36 }
  0x5e   : > { %1320 = vperm.xlu0 %3028, %v463_v37   ;;  %1315 = vperm.xlu1 %3029, %v462_v38  }
  0x5f   : > { %1310 = vperm.xlu2 %3030, %v461_v39  }
  0x66   : > { %1305 = vperm.xlu0 %3028, %v460_v40   ;;  %1897 = vperm.xlu1 %3029, %v471_v41  }
  0x67   : > { %1892 = vperm.xlu2 %3030, %v470_v42  }
  0x6e   : > { %1887 = vperm.xlu0 %3028, %v469_v43   ;;  %1882 = vperm.xlu1 %3029, %v468_v44  }
  0x6f   : > { %1877 = vperm.xlu2 %3030, %v467_v45  }
  0x76   : > { %1872 = vperm.xlu0 %3028, %v466_v46   ;;  %1867 = vperm.xlu1 %3029, %v465_v47  }
  0x77   : > { %1862 = vperm.xlu2 %3030, %v464_v48  }
  0x79   : > { %v3382_v30 = vpop.permute.xlu2 %518 }
  0x7e   : > { %2009 = vperm.xlu0 %3028, %v479_v49   ;;  %2004 = vperm.xlu1 %3029, %v478_v50  }
  0x7f   : > { %1999 = vperm.xlu2 %3030, %v477_v51  }
  0x86   : > { %1994 = vperm.xlu0 %3028, %v476_v52   ;;  %1989 = vperm.xlu1 %3029, %v475_v53   ;;  %v514_v53 = vpop.permute.xlu2 %513 }
  0x87   : > { %1984 = vperm.xlu2 %3030, %v474_v54  }
  0x8e   : > { %1979 = vperm.xlu0 %3028, %v473_v55   ;;  %1974 = vperm.xlu1 %3029, %v472_v56  }
  0x8f   : > { %2277 = vperm.xlu2 %3030, %v487_v57  }
  0x90   : > { %v539_v24 = vpop.permute.xlu0 %538  ;;  %v529_v25 = vpop.permute.xlu1 %528 }
  0x96   : > { %2272 = vperm.xlu0 %3028, %v486_v58   ;;  %2267 = vperm.xlu1 %3029, %v485_v59  }
  0x97   : > { %2262 = vperm.xlu2 %3030, %v484_v60  }
  0x98   : > { %v534_v31 = vpop.permute.xlu0 %533  ;;  %v524_v39 = vpop.permute.xlu1 %523 }
  0x9c   : > { %v3353_v63 = vpop.f32.mrf.mxu0 }
  0x9d   : > { %v3356_v1 = vpop.f32.mrf.mxu1 }
  0x9e   : > { %2257 = vperm.xlu0 %3028, %v483_v61   ;;  %2252 = vperm.xlu1 %3029, %v482_v62  }
  0x9f   : > { %2247 = vperm.xlu2 %3030, %v481_v0  }
  0xa3   : > { %v3358_v2 = vpop.f32.mrf.mxu2 }
  0xa4   : > { %v3362_v5 = vpop.f32.mrf.mxu3  ;;  %v3364_v6 = vpop.f32.mrf.mxu0 }
  0xa5   : > { %v3366_v7 = vpop.f32.mrf.mxu1 }
  0xa6   : > { %2242 = vperm.xlu0 %3028, %v480_v3   ;;  %2503 = vperm.xlu1 %3029, %v488_v4   ;;  %v509_v3 = vpop.permute.xlu0 %508 }
  0xab   : > { %v3368_v8 = vpop.f32.mrf.mxu2 }
  0xac   : > { %v3370_v9 = vpop.f32.mrf.mxu3  ;;  %v589_v10 = vpop.f32.mrf.mxu0 }
  0xad   : > { %v630_v11 = vpop.f32.mrf.mxu1  ;;  %v590_v55 = vadd.f32 %v589_v10, %v514_v53 }
  0xae   : > { %v631_v56 = vadd.f32 %v630_v11, %v514_v53  ;;  %v504_v11 = vpop.permute.xlu1 %503 }
  0xb3   : > { %v3372_v12 = vpop.f32.mrf.mxu2 }
  0xb4   : > { %v3374_v13 = vpop.f32.mrf.mxu3  ;;  %v592_v14 = vpop.f32.mrf.mxu0 }
  0xb5   : > { %v633_v15 = vpop.f32.mrf.mxu1  ;;  %v593_v45 = vadd.f32 %v592_v14, %v3382_v30 }
  0xb6   : > { %v634_v49 = vadd.f32 %v633_v15, %v3382_v30 }
  0xb7   : > { %v742_v0 = vmax.f32 %v593_v45, 0.0  ;;  %v765_v45 = vld [vmem:[%s4290_s2 + $0x18] sm:$0xff] }
  0xbb   : > { %v3376_v16 = vpop.f32.mrf.mxu2 }
  0xbc   : > { %v3378_v17 = vpop.f32.mrf.mxu3  ;;  %v595_v18 = vpop.f32.mrf.mxu0 }
  0xbd   : > { %v636_v19 = vpop.f32.mrf.mxu1  ;;  %v596_v46 = vadd.f32 %v595_v18, %v524_v39  ;;  %v743_v18 = vmax.f32 %v634_v49, 0.0  ;;  %v769_v49 = vld [vmem:[%s4290_s2 + $0x38] sm:$0xff] }
  0xbe   : > { %v637_v50 = vadd.f32 %v636_v19, %v524_v39  ;;  %v587_v19 = vadd.f32 %v3364_v6, %v509_v3  ;;  %v675_v6 = vadd.f32 %v3376_v16, %v3382_v30  ;;  %v713_v16 = vadd.f32 %v3374_v13, %v514_v53 }
  0xbf   : > { %v746_v62 = vmax.f32 %v596_v46, 0.0  ;;  %v766_v46 = vld [vmem:[%s4290_s2 + $0x20] sm:$0xff] }
  0xc0   : > { %v747_v14 = vmax.f32 %v637_v50, 0.0 }
  0xc3   : > { %v677_v20 = vpop.f32.mrf.mxu2 }
  0xc4   : > { %v3380_v21 = vpop.f32.mrf.mxu3  ;;  %v598_v22 = vpop.f32.mrf.mxu0 }
  0xc5   : > { %v639_v23 = vpop.f32.mrf.mxu1  ;;  %v599_v35 = vadd.f32 %v598_v22, %v529_v25 }
  0xc6   : > { %v640_v40 = vadd.f32 %v639_v23, %v529_v25  ;;  %v628_v23 = vadd.f32 %v3366_v7, %v509_v3  ;;  %v625_v7 = vadd.f32 %v3356_v1, %v504_v11  ;;  %v669_v1 = vadd.f32 %v3368_v8, %v509_v3 }
  0xc7   : > { %v750_v48 = vmax.f32 %v599_v35, 0.0  ;;  %v707_v8 = vadd.f32 %v3362_v5, %v504_v11  ;;  %v764_v5 = vld [vmem:[%s4290_s2 + $0x10] sm:$0xff] }
  0xc8   : > { %v751_v52 = vmax.f32 %v640_v40, 0.0 }
  0xcb   : > { %v680_v26 = vpop.f32.mrf.mxu2 }
  0xcc   : > { %v721_v27 = vpop.f32.mrf.mxu3  ;;  %v601_v28 = vpop.f32.mrf.mxu0  ;;  %v681_v4 = vadd.f32 %v680_v26, %v529_v25 }
  0xcd   : > { %v642_v29 = vpop.f32.mrf.mxu1  ;;  %v602_v36 = vadd.f32 %v601_v28, %v534_v31  ;;  %v722_v22 = vadd.f32 %v721_v27, %v529_v25  ;;  %v678_v28 = vadd.f32 %v677_v20, %v524_v39  ;;  %v739_v25 = vmax.f32 %v631_v56, 0.0 }
  0xce   : > { %v643_v41 = vadd.f32 %v642_v29, %v534_v31  ;;  %v719_v29 = vadd.f32 %v3380_v21, %v524_v39  ;;  %v752_v27 = vmax.f32 %v681_v4, 0.0  ;;  %v716_v20 = vadd.f32 %v3378_v17, %v3382_v30 }
  0xcf   : > { %v754_v47 = vmax.f32 %v602_v36, 0.0  ;;  %v753_v21 = vmax.f32 %v722_v22, 0.0  ;;  %v748_v35 = vmax.f32 %v678_v28, 0.0  ;;  %v731_v17 = vmax.f32 %v625_v7, 0.0 }
  0xd0   : > { %v755_v51 = vmax.f32 %v643_v41, 0.0  ;;  %v749_v36 = vmax.f32 %v719_v29, 0.0  ;;  %v744_v30 = vmax.f32 %v675_v6, 0.0  ;;  %v745_v13 = vmax.f32 %v716_v20, 0.0 }
  0xd1   : > { %v666_v39 = vadd.f32 %v3358_v2, %v504_v11  ;;  %v741_v41 = vmax.f32 %v713_v16, 0.0  ;;  %v763_v2 = vld [vmem:[%s4290_s2 + $0x8] sm:$0xff] }
  0xd3   : > { %v683_v32 = vpop.f32.mrf.mxu2 }
  0xd4   : > { %v724_v33 = vpop.f32.mrf.mxu3  ;;  %v604_v34 = vpop.f32.mrf.mxu0  ;;  %v684_v57 = vadd.f32 %v683_v32, %v534_v31  ;;  %v584_v32 = vadd.f32 %v3353_v63, %v504_v11  ;;  %v735_v63 = vmax.f32 %v628_v23, 0.0 }
  0xd5   : > { %v605_v37 = vadd.f32 %v604_v34, %v539_v24  ;;  %v645_v38 = vpop.f32.mrf.mxu1  ;;  %v725_v60 = vadd.f32 %v724_v33, %v534_v31  ;;  %v738_v31 = vmax.f32 %v590_v55, 0.0  ;;  %v734_v33 = vmax.f32 %v587_v19, 0.0  ;;  %v808_v11 = vpop.permute.xlu2 %807 }
  0xd6   : > { %v646_v42 = vadd.f32 %v645_v38, %v539_v24  ;;  %v672_v34 = vadd.f32 %v3372_v12, %v514_v53  ;;  %v762_v12 = vld [vmem:[%s4290_s2] sm:$0xff]  ;;  %v710_v38 = vadd.f32 %v3370_v9, %v509_v3  ;;  %v803_v23 = vpop.permute.xlu0 %802 }
  0xd7   : > { %v758_v43 = vmax.f32 %v605_v37, 0.0  ;;  %v757_v26 = vmax.f32 %v725_v60, 0.0  ;;  %v730_v37 = vmax.f32 %v584_v32, 0.0 }
  0xd8   : > { %v759_v44 = vmax.f32 %v646_v42, 0.0  ;;  %v740_v40 = vmax.f32 %v672_v34, 0.0  ;;  %v736_v42 = vmax.f32 %v669_v1, 0.0  ;;  %v737_v9 = vmax.f32 %v710_v38, 0.0 }
  0xd9   : > { %843 = vmatpush.msrb.mxu0 %v758_v43  ;;  %v732_v43 = vmax.f32 %v666_v39, 0.0 }
  0xda   : > { %884 = vmatpush.msrb.mxu1 %v759_v44  ;;  %v733_v44 = vmax.f32 %v707_v8, 0.0 }
  0xdb   : > { %v686_v54 = vpop.f32.mrf.mxu2  ;;  %844 = vmatpush.msrb.mxu0 %v754_v47  ;;  %v767_v47 = vld [vmem:[%s4290_s2 + $0x28] sm:$0xff] }
  0xdc   : > { %v687_v58 = vadd.f32 %v686_v54, %v539_v24  ;;  %v727_v59 = vpop.f32.mrf.mxu3  ;;  %885 = vmatpush.msrb.mxu1 %v755_v51 }
  0xdd   : > { %v728_v61 = vadd.f32 %v727_v59, %v539_v24  ;;  %845 = vmatpush.msrb.mxu0 %v750_v48  ;;  %v756_v24 = vmax.f32 %v684_v57, 0.0  ;;  %v768_v48 = vld [vmem:[%s4290_s2 + $0x30] sm:$0xff]  ;;  %v3483_v32 = vpop.permute.xlu2 %792 }
  0xde   : > { %886 = vmatpush.msrb.mxu1 %v751_v52  ;;  %v760_v15 = vmax.f32 %v687_v58, 0.0  ;;  %v3485_v20 = vpop.permute.xlu0 %787 }
  0xdf   : > { %846 = vmatpush.msrb.mxu0 %v746_v62  ;;  %v761_v10 = vmax.f32 %v728_v61, 0.0 }
  0xe0   : > { %887 = vmatpush.msrb.mxu1 %v747_v14  ;;  %925 = vmatpush.msrb.mxu2 %v760_v15 }
  0xe1   : > { %966 = vmatpush.msrb.mxu3 %v761_v10  ;;  %847 = vmatpush.msrb.mxu0 %v742_v0 }
  0xe2   : > { %888 = vmatpush.msrb.mxu1 %v743_v18  ;;  %926 = vmatpush.msrb.mxu2 %v756_v24 }
  0xe3   : > { %967 = vmatpush.msrb.mxu3 %v757_v26  ;;  %848 = vmatpush.msrb.mxu0 %v738_v31  ;;  %v798_v31 = vpop.permute.xlu1 %797 }
  0xe4   : > { %889 = vmatpush.msrb.mxu1 %v739_v25  ;;  %927 = vmatpush.msrb.mxu2 %v752_v27 }
  0xe5   : > { %968 = vmatpush.msrb.mxu3 %v753_v21  ;;  %849 = vmatpush.msrb.mxu0 %v734_v33 }
  0xe6   : > { %890 = vmatpush.msrb.mxu1 %v735_v63  ;;  %928 = vmatpush.msrb.mxu2 %v748_v35 }
  0xe7   : > { %969 = vmatpush.msrb.mxu3 %v749_v36  ;;  %850 = vmatpush.msrb.mxu0 %v730_v37 }
  0xe8   : > { %891 = vmatpush.msrb.mxu1 %v731_v17  ;;  %929 = vmatpush.msrb.mxu2 %v744_v30 }
  0xe9   : > { %970 = vmatpush.msrb.mxu3 %v745_v13  ;;  %2754 = vmatmul.msk.f32.vlgmr.msrb.gmra.mxu0 %vm810_vm1, %v762_v12 }
  0xea   : > { %2762 = vmatmul.msk.f32.vlgmr.msrb.gmra.mxu1 %vm810_vm1, %v762_v12  ;;  %930 = vmatpush.msrb.mxu2 %v740_v40 }
  0xeb   : > { %971 = vmatpush.msrb.mxu3 %v741_v41  ;;  %v783_v39 = vpop.permute.xlu1 %782 }
  0xec   : > { %931 = vmatpush.msrb.mxu2 %v736_v42 }
  0xed   : > { %972 = vmatpush.msrb.mxu3 %v737_v9  ;;  %v778_v9 = vpop.permute.xlu2 %777 }
  0xee   : > { %932 = vmatpush.msrb.mxu2 %v732_v43 }
  0xef   : > { %973 = vmatpush.msrb.mxu3 %v733_v44  ;;  %2770 = vmatmul.msk.f32.vlgmr.msrb.gmra.mxu2 %vm810_vm1, %v762_v12 }
  0xf0   : > { %2778 = vmatmul.msk.f32.vlgmr.msrb.gmra.mxu3 %vm810_vm1, %v762_v12 }
  0xf1   : > { %2755 = vmatmul.msk.f32.gmra.mxu0 %vm810_vm1, %v763_v2 }
  0xf2   : > { %2763 = vmatmul.msk.f32.gmra.mxu1 %vm810_vm1, %v763_v2 }
  0xf7   : > { %2771 = vmatmul.msk.f32.gmra.mxu2 %vm810_vm1, %v763_v2 }
  0xf8   : > { %2779 = vmatmul.msk.f32.gmra.mxu3 %vm810_vm1, %v763_v2 }
  0xf9   : > { %2756 = vmatmul.msk.f32.gmra.mxu0 %vm810_vm1, %v764_v5 }
  0xfa   : > { %2764 = vmatmul.msk.f32.gmra.mxu1 %vm810_vm1, %v764_v5 }
  0xff   : > { %2772 = vmatmul.msk.f32.gmra.mxu2 %vm810_vm1, %v764_v5 }
 0x100   : > { %2780 = vmatmul.msk.f32.gmra.mxu3 %vm810_vm1, %v764_v5 }
 0x101   : > { %2757 = vmatmul.msk.f32.gmra.mxu0 %vm810_vm1, %v765_v45 }
 0x102   : > { %2765 = vmatmul.msk.f32.gmra.mxu1 %vm810_vm1, %v765_v45 }
 0x107   : > { %2773 = vmatmul.msk.f32.gmra.mxu2 %vm810_vm1, %v765_v45 }
 0x108   : > { %2781 = vmatmul.msk.f32.gmra.mxu3 %vm810_vm1, %v765_v45  ;;  %v773_v45 = vpop.permute.xlu0 %772 }
 0x109   : > { %2758 = vmatmul.msk.f32.gmra.mxu0 %vm810_vm1, %v766_v46 }
 0x10a   : > { %2766 = vmatmul.msk.f32.gmra.mxu1 %vm810_vm1, %v766_v46 }
 0x10f   : > { %2774 = vmatmul.msk.f32.gmra.mxu2 %vm810_vm1, %v766_v46 }
 0x110   : > { %2782 = vmatmul.msk.f32.gmra.mxu3 %vm810_vm1, %v766_v46 }
 0x111   : > { %2759 = vmatmul.msk.f32.gmra.mxu0 %vm810_vm1, %v767_v47 }
 0x112   : > { %2767 = vmatmul.msk.f32.gmra.mxu1 %vm810_vm1, %v767_v47 }
 0x117   : > { %2775 = vmatmul.msk.f32.gmra.mxu2 %vm810_vm1, %v767_v47 }
 0x118   : > { %2783 = vmatmul.msk.f32.gmra.mxu3 %vm810_vm1, %v767_v47 }
 0x119   : > { %2760 = vmatmul.msk.f32.gmra.mxu0 %vm810_vm1, %v768_v48 }
 0x11a   : > { %2768 = vmatmul.msk.f32.gmra.mxu1 %vm810_vm1, %v768_v48 }
 0x11f   : > { %2776 = vmatmul.msk.f32.gmra.mxu2 %vm810_vm1, %v768_v48 }
 0x120   : > { %2784 = vmatmul.msk.f32.gmra.mxu3 %vm810_vm1, %v768_v48 }
 0x121   : > { %2761 = vmatmul.msk.f32.gmra.mxu0 %vm810_vm1, %v769_v49 }
 0x122   : > { %2769 = vmatmul.msk.f32.gmra.mxu1 %vm810_vm1, %v769_v49 }
 0x127   : > { %2777 = vmatmul.msk.f32.gmra.mxu2 %vm810_vm1, %v769_v49 }
 0x128   : > { %2785 = vmatmul.msk.f32.gmra.mxu3 %vm810_vm1, %v769_v49 }
 0x166   : > { %v3457_v50 = vpop.f32.mrf.mxu0 }
 0x167   : > { %v3459_v51 = vpop.f32.mrf.mxu1  ;;  %v853_v49 = vadd.f32 %v3457_v50, %v773_v45 }
 0x169   : > { %v999_v50 = vmax.f32 %v853_v49, 0.0 }
 0x16e   : > { %v855_v52 = vpop.f32.mrf.mxu0 }
 0x16f   : > { %v3461_v53 = vpop.f32.mrf.mxu1  ;;  %v856_v2 = vadd.f32 %v855_v52, %v778_v9 }
 0x170   : > { %v897_v46 = vadd.f32 %v3461_v53, %v778_v9 }
 0x172   : > { %v3463_v54 = vpop.f32.mrf.mxu2  ;;  %v1004_v53 = vmax.f32 %v897_v46, 0.0 }
 0x173   : > { %v3465_v55 = vpop.f32.mrf.mxu3 }
 0x176   : > { %v858_v56 = vpop.f32.mrf.mxu0 }
 0x177   : > { %v899_v57 = vpop.f32.mrf.mxu1  ;;  %v859_v41 = vadd.f32 %v858_v56, %v783_v39 }
 0x178   : > { %v900_v43 = vadd.f32 %v899_v57, %v783_v39  ;;  %v894_v57 = vadd.f32 %v3459_v51, %v773_v45 }
 0x17a   : > { %v3467_v58 = vpop.f32.mrf.mxu2 }
 0x17b   : > { %v3469_v59 = vpop.f32.mrf.mxu3 }
 0x17e   : > { %v861_v60 = vpop.f32.mrf.mxu0 }
 0x17f   : > { %v902_v61 = vpop.f32.mrf.mxu1  ;;  %v862_v38 = vadd.f32 %v861_v60, %v3485_v20  ;;  %v1007_v60 = vmax.f32 %v859_v41, 0.0 }
 0x180   : > { %v903_v40 = vadd.f32 %v902_v61, %v3485_v20 }
 0x181   : > { %v1011_v5 = vmax.f32 %v862_v38, 0.0  ;;  %v1038_v38 = vld [vmem:[%s4291_s3 + $0x38] sm:$0xff] }
 0x182   : > { %v3471_v62 = vpop.f32.mrf.mxu2  ;;  %v1012_v47 = vmax.f32 %v903_v40, 0.0 }
 0x183   : > { %v3473_v0 = vpop.f32.mrf.mxu3 }
 0x186   : > { %v864_v3 = vpop.f32.mrf.mxu0 }
 0x187   : > { %v905_v4 = vpop.f32.mrf.mxu1  ;;  %v865_v37 = vadd.f32 %v864_v3, %v3483_v32 }
 0x188   : > { %v906_v30 = vadd.f32 %v905_v4, %v3483_v32  ;;  %v1008_v4 = vmax.f32 %v900_v43, 0.0 }
 0x189   : > { %v1015_v42 = vmax.f32 %v865_v37, 0.0 }
 0x18a   : > { %v3475_v14 = vpop.f32.mrf.mxu2  ;;  %v1016_v44 = vmax.f32 %v906_v30, 0.0  ;;  %v1036_v30 = vld [vmem:[%s4291_s3 + $0x28] sm:$0xff] }
 0x18b   : > { %v3477_v15 = vpop.f32.mrf.mxu3 }
 0x18e   : > { %v867_v18 = vpop.f32.mrf.mxu0 }
 0x18f   : > { %v908_v19 = vpop.f32.mrf.mxu1  ;;  %v868_v34 = vadd.f32 %v867_v18, %v798_v31 }
 0x190   : > { %v909_v35 = vadd.f32 %v908_v19, %v798_v31  ;;  %v1003_v19 = vmax.f32 %v856_v2, 0.0 }
 0x191   : > { %v1019_v13 = vmax.f32 %v868_v34, 0.0 }
 0x192   : > { %v3479_v22 = vpop.f32.mrf.mxu2  ;;  %v1020_v8 = vmax.f32 %v909_v35, 0.0  ;;  %v935_v35 = vadd.f32 %v3463_v54, %v773_v45 }
 0x193   : > { %v3481_v10 = vpop.f32.mrf.mxu3  ;;  %v947_v51 = vadd.f32 %v3479_v22, %v3483_v32 }
 0x196   : > { %v870_v28 = vpop.f32.mrf.mxu0 }
 0x197   : > { %v911_v24 = vpop.f32.mrf.mxu1  ;;  %v871_v25 = vadd.f32 %v870_v28, %v803_v23 }
 0x198   : > { %v912_v21 = vadd.f32 %v911_v24, %v803_v23 }
 0x199   : > { %v1023_v1 = vmax.f32 %v871_v25, 0.0 }
 0x19a   : > { %v949_v29 = vpop.f32.mrf.mxu2  ;;  %v1024_v12 = vmax.f32 %v912_v21, 0.0 }
 0x19b   : > { %v990_v26 = vpop.f32.mrf.mxu3  ;;  %v950_v24 = vadd.f32 %v949_v29, %v798_v31  ;;  %v1031_v29 = vld [vmem:[%s4291_s3] sm:$0xff] }
 0x19d   : > { %v1021_v21 = vmax.f32 %v950_v24, 0.0 }
 0x19e   : > { %v873_v6 = vpop.f32.mrf.mxu0 }
 0x19f   : > { %v874_v27 = vadd.f32 %v873_v6, %v808_v11  ;;  %v914_v7 = vpop.f32.mrf.mxu1  ;;  %v991_v6 = vadd.f32 %v990_v26, %v798_v31  ;;  %v944_v26 = vadd.f32 %v3475_v14, %v3485_v20  ;;  %v985_v31 = vadd.f32 %v3477_v15, %v3485_v20 }
 0x1a0   : > { %v915_v33 = vadd.f32 %v914_v7, %v808_v11  ;;  %v1000_v7 = vmax.f32 %v894_v57, 0.0  ;;  %v938_v14 = vadd.f32 %v3467_v58, %v778_v9  ;;  %v979_v15 = vadd.f32 %v3469_v59, %v778_v9  ;;  %v3584_v57 = vpop.permute.xlu1 %1076 }
 0x1a1   : > { %v1027_v63 = vmax.f32 %v874_v27, 0.0  ;;  %v1022_v22 = vmax.f32 %v991_v6, 0.0  ;;  %v1013_v20 = vmax.f32 %v944_v26, 0.0  ;;  %v1001_v59 = vmax.f32 %v935_v35, 0.0 }
 0x1a2   : > { %v1028_v16 = vmax.f32 %v915_v33, 0.0  ;;  %v952_v36 = vpop.f32.mrf.mxu2  ;;  %v1017_v33 = vmax.f32 %v947_v51, 0.0  ;;  %v1005_v37 = vmax.f32 %v938_v14, 0.0  ;;  %v1006_v58 = vmax.f32 %v979_v15, 0.0 }
 0x1a3   : > { %v993_v17 = vpop.f32.mrf.mxu3  ;;  %1111 = vmatpush.msra.mxu0 %v1027_v63  ;;  %v953_v61 = vadd.f32 %v952_v36, %v803_v23  ;;  %v1014_v63 = vmax.f32 %v985_v31, 0.0 }
 0x1a4   : > { %1152 = vmatpush.msra.mxu1 %v1028_v16  ;;  %v994_v18 = vadd.f32 %v993_v17, %v803_v23  ;;  %v976_v16 = vadd.f32 %v3465_v55, %v773_v45  ;;  %v1033_v55 = vld [vmem:[%s4291_s3 + $0x10] sm:$0xff]  ;;  %v1035_v17 = vld [vmem:[%s4291_s3 + $0x20] sm:$0xff] }
 0x1a5   : > { %1112 = vmatpush.msra.mxu0 %v1023_v1  ;;  %v1025_v27 = vmax.f32 %v953_v61, 0.0  ;;  %v1034_v1 = vld [vmem:[%s4291_s3 + $0x18] sm:$0xff] }
 0x1a6   : > { %1153 = vmatpush.msra.mxu1 %v1024_v12  ;;  %v1026_v23 = vmax.f32 %v994_v18, 0.0  ;;  %v1002_v54 = vmax.f32 %v976_v16, 0.0  ;;  %v1037_v12 = vld [vmem:[%s4291_s3 + $0x30] sm:$0xff] }
 0x1a7   : > { %1113 = vmatpush.msra.mxu0 %v1019_v13 }
 0x1a8   : > { %1154 = vmatpush.msra.mxu1 %v1020_v8  ;;  %v3594_v24 = vpop.permute.xlu1 %1061 }
 0x1a9   : > { %1114 = vmatpush.msra.mxu0 %v1015_v42 }
 0x1aa   : > { %1155 = vmatpush.msra.mxu1 %v1016_v44  ;;  %v955_v48 = vpop.f32.mrf.mxu2 }
 0x1ab   : > { %v956_v56 = vadd.f32 %v955_v48, %v808_v11  ;;  %v996_v3 = vpop.f32.mrf.mxu3  ;;  %1115 = vmatpush.msra.mxu0 %v1011_v5 }
 0x1ac   : > { %v997_v52 = vadd.f32 %v996_v3, %v808_v11  ;;  %1156 = vmatpush.msra.mxu1 %v1012_v47  ;;  %v988_v11 = vadd.f32 %v3481_v10, %v3483_v32  ;;  %v941_v10 = vadd.f32 %v3471_v62, %v783_v39  ;;  %v982_v32 = vadd.f32 %v3473_v0, %v783_v39  ;;  %v1032_v0 = vld [vmem:[%s4291_s3 + $0x8] sm:$0xff] }
 0x1ad   : > { %v1029_v28 = vmax.f32 %v956_v56, 0.0  ;;  %1116 = vmatpush.msra.mxu0 %v1007_v60 }
 0x1ae   : > { %v1030_v25 = vmax.f32 %v997_v52, 0.0  ;;  %1157 = vmatpush.msra.mxu1 %v1008_v4  ;;  %v1018_v34 = vmax.f32 %v988_v11, 0.0  ;;  %v1009_v36 = vmax.f32 %v941_v10, 0.0  ;;  %v1010_v62 = vmax.f32 %v982_v32, 0.0  ;;  %v3586_v4 = vpop.permute.xlu2 %1071 }
 0x1af   : > { %1117 = vmatpush.msra.mxu0 %v1003_v19  ;;  %1193 = vmatpush.msra.mxu2 %v1029_v28 }
 0x1b0   : > { %1158 = vmatpush.msra.mxu1 %v1004_v53  ;;  %1234 = vmatpush.msra.mxu3 %v1030_v25  ;;  %v3592_v53 = vpop.permute.xlu0 %1066  ;;  %v3610_v16 = vpop.permute.xlu1 %1046 }
 0x1b1   : > { %1118 = vmatpush.msra.mxu0 %v999_v50  ;;  %1194 = vmatpush.msra.mxu2 %v1025_v27 }
 0x1b2   : > { %1159 = vmatpush.msra.mxu1 %v1000_v7  ;;  %1235 = vmatpush.msra.mxu3 %v1026_v23 }
 0x1b3   : > { %2786 = vmatmul.msk.f32.vlgmr.msra.gmra.mxu0 %vm810_vm1, %v1031_v29  ;;  %2794 = vmatmul.msk.f32.vlgmr.msra.gmra.mxu1 %vm810_vm1, %v1031_v29 }
 0x1b4   : > { %1195 = vmatpush.msra.mxu2 %v1021_v21  ;;  %1236 = vmatpush.msra.mxu3 %v1022_v22 }
 0x1b6   : > { %1196 = vmatpush.msra.mxu2 %v1017_v33  ;;  %1237 = vmatpush.msra.mxu3 %v1018_v34  ;;  %v3596_v50 = vpop.permute.xlu2 %1056 }
 0x1b8   : > { %1197 = vmatpush.msra.mxu2 %v1013_v20  ;;  %1238 = vmatpush.msra.mxu3 %v1014_v63  ;;  %v3608_v35 = vpop.permute.xlu0 %1051 }
 0x1ba   : > { %1198 = vmatpush.msra.mxu2 %v1009_v36  ;;  %1239 = vmatpush.msra.mxu3 %v1010_v62 }
 0x1bb   : > { %2787 = vmatmul.msk.f32.gmra.mxu0 %vm810_vm1, %v1032_v0  ;;  %2795 = vmatmul.msk.f32.gmra.mxu1 %vm810_vm1, %v1032_v0 }
 0x1bc   : > { %1199 = vmatpush.msra.mxu2 %v1005_v37  ;;  %1240 = vmatpush.msra.mxu3 %v1006_v58 }
 0x1be   : > { %1200 = vmatpush.msra.mxu2 %v1001_v59  ;;  %1241 = vmatpush.msra.mxu3 %v1002_v54 }
 0x1bf   : > { %2802 = vmatmul.msk.f32.vlgmr.msra.gmra.mxu2 %vm810_vm1, %v1031_v29  ;;  %2810 = vmatmul.msk.f32.vlgmr.msra.gmra.mxu3 %vm810_vm1, %v1031_v29 }
 0x1c3   : > { %2788 = vmatmul.msk.f32.gmra.mxu0 %vm810_vm1, %v1033_v55  ;;  %2796 = vmatmul.msk.f32.gmra.mxu1 %vm810_vm1, %v1033_v55 }
 0x1c7   : > { %2803 = vmatmul.msk.f32.gmra.mxu2 %vm810_vm1, %v1032_v0  ;;  %2811 = vmatmul.msk.f32.gmra.mxu3 %vm810_vm1, %v1032_v0 }
 0x1cb   : > { %2789 = vmatmul.msk.f32.gmra.mxu0 %vm810_vm1, %v1034_v1  ;;  %2797 = vmatmul.msk.f32.gmra.mxu1 %vm810_vm1, %v1034_v1 }
 0x1cf   : > { %2804 = vmatmul.msk.f32.gmra.mxu2 %vm810_vm1, %v1033_v55  ;;  %2812 = vmatmul.msk.f32.gmra.mxu3 %vm810_vm1, %v1033_v55 }
 0x1d3   : > { %2790 = vmatmul.msk.f32.gmra.mxu0 %vm810_vm1, %v1035_v17  ;;  %2798 = vmatmul.msk.f32.gmra.mxu1 %vm810_vm1, %v1035_v17 }
 0x1d7   : > { %2805 = vmatmul.msk.f32.gmra.mxu2 %vm810_vm1, %v1034_v1  ;;  %2813 = vmatmul.msk.f32.gmra.mxu3 %vm810_vm1, %v1034_v1 }
 0x1db   : > { %2791 = vmatmul.msk.f32.gmra.mxu0 %vm810_vm1, %v1036_v30  ;;  %2799 = vmatmul.msk.f32.gmra.mxu1 %vm810_vm1, %v1036_v30 }
 0x1df   : > { %2806 = vmatmul.msk.f32.gmra.mxu2 %vm810_vm1, %v1035_v17  ;;  %2814 = vmatmul.msk.f32.gmra.mxu3 %vm810_vm1, %v1035_v17 }
 0x1e3   : > { %2792 = vmatmul.msk.f32.gmra.mxu0 %vm810_vm1, %v1037_v12  ;;  %2800 = vmatmul.msk.f32.gmra.mxu1 %vm810_vm1, %v1037_v12 }
 0x1e7   : > { %2807 = vmatmul.msk.f32.gmra.mxu2 %vm810_vm1, %v1036_v30  ;;  %2815 = vmatmul.msk.f32.gmra.mxu3 %vm810_vm1, %v1036_v30  ;;  %v1042_v30 = vpop.permute.xlu2 %1041 }
 0x1eb   : > { %2793 = vmatmul.msk.f32.gmra.mxu0 %vm810_vm1, %v1038_v38  ;;  %2801 = vmatmul.msk.f32.gmra.mxu1 %vm810_vm1, %v1038_v38 }
 0x1ef   : > { %2808 = vmatmul.msk.f32.gmra.mxu2 %vm810_vm1, %v1037_v12  ;;  %2816 = vmatmul.msk.f32.gmra.mxu3 %vm810_vm1, %v1037_v12 }
 0x1f7   : > { %2809 = vmatmul.msk.f32.gmra.mxu2 %vm810_vm1, %v1038_v38  ;;  %2817 = vmatmul.msk.f32.gmra.mxu3 %vm810_vm1, %v1038_v38 }
 0x230   : > { %v3564_v13 = vpop.f32.mrf.mxu0  ;;  %v3566_v39 = vpop.f32.mrf.mxu1 }
 0x231   : > { %v1121_v12 = vadd.f32 %v3564_v13, %v1042_v30  ;;  %v1162_v38 = vadd.f32 %v3566_v39, %v1042_v30 }
 0x238   : > { %v1123_v40 = vpop.f32.mrf.mxu0  ;;  %v1164_v8 = vpop.f32.mrf.mxu1 }
 0x239   : > { %v1124_v54 = vadd.f32 %v1123_v40, %v3610_v16  ;;  %v1165_v55 = vadd.f32 %v1164_v8, %v3610_v16  ;;  %v1267_v40 = vmax.f32 %v1121_v12, 0.0  ;;  %v3621_v8 = vld [vmem:[%s4292_s4] sm:$0xff]  ;;  %v1321_v12 = vpop.permute.xlu0 %1320 }
 0x240   : > { %v1126_v41 = vpop.f32.mrf.mxu0  ;;  %v1167_v42 = vpop.f32.mrf.mxu1 }
 0x241   : > { %v1127_v36 = vadd.f32 %v1126_v41, %v3608_v35  ;;  %v1168_v62 = vadd.f32 %v1167_v42, %v3608_v35 }
 0x242   : > { %v3568_v9 = vpop.f32.mrf.mxu2  ;;  %v3570_v43 = vpop.f32.mrf.mxu3 }
 0x243   : > { %v1275_v41 = vmax.f32 %v1127_v36, 0.0  ;;  %v1276_v42 = vmax.f32 %v1168_v62, 0.0  ;;  %v1478_v36 = vld [vmem:[%s4294_s6 + $0x18] sm:$0xff]  ;;  %v1479_v62 = vld [vmem:[%s4294_s6 + $0x20] sm:$0xff] }
 0x248   : > { %v1129_v44 = vpop.f32.mrf.mxu0  ;;  %v1170_v2 = vpop.f32.mrf.mxu1 }
 0x249   : > { %v1130_v14 = vadd.f32 %v1129_v44, %v3596_v50  ;;  %v1171_v15 = vadd.f32 %v1170_v2, %v3596_v50  ;;  %v1271_v44 = vmax.f32 %v1124_v54, 0.0  ;;  %v1272_v2 = vmax.f32 %v1165_v55, 0.0 }
 0x24a   : > { %v3572_v5 = vpop.f32.mrf.mxu2  ;;  %v3574_v45 = vpop.f32.mrf.mxu3 }
 0x24b   : > { %v1279_v1 = vmax.f32 %v1130_v14, 0.0  ;;  %v1280_v17 = vmax.f32 %v1171_v15, 0.0 }
 0x250   : > { %v1132_v46 = vpop.f32.mrf.mxu0  ;;  %v1173_v47 = vpop.f32.mrf.mxu1 }
 0x251   : > { %v1133_v10 = vadd.f32 %v1132_v46, %v3594_v24  ;;  %v1174_v32 = vadd.f32 %v1173_v47, %v3594_v24  ;;  %v1268_v46 = vmax.f32 %v1162_v38, 0.0  ;;  %v1316_v38 = vpop.permute.xlu1 %1315 }
 0x252   : > { %v3576_v48 = vpop.f32.mrf.mxu2  ;;  %v3578_v49 = vpop.f32.mrf.mxu3 }
 0x253   : > { %v1283_v0 = vmax.f32 %v1133_v10, 0.0  ;;  %v1284_v37 = vmax.f32 %v1174_v32, 0.0 }
 0x258   : > { %v1135_v60 = vpop.f32.mrf.mxu0  ;;  %v1176_v61 = vpop.f32.mrf.mxu1 }
 0x259   : > { %v1136_v26 = vadd.f32 %v1135_v60, %v3592_v53  ;;  %v1177_v31 = vadd.f32 %v1176_v61, %v3592_v53 }
 0x25a   : > { %v3580_v56 = vpop.f32.mrf.mxu2  ;;  %v3582_v3 = vpop.f32.mrf.mxu3 }
 0x25b   : > { %v1287_v20 = vmax.f32 %v1136_v26, 0.0  ;;  %v1288_v63 = vmax.f32 %v1177_v31, 0.0 }
 0x260   : > { %v1138_v18 = vpop.f32.mrf.mxu0  ;;  %v1179_v52 = vpop.f32.mrf.mxu1 }
 0x261   : > { %v1139_v27 = vadd.f32 %v1138_v18, %v3586_v4  ;;  %v1180_v7 = vadd.f32 %v1179_v52, %v3586_v4 }
 0x262   : > { %v3588_v19 = vpop.f32.mrf.mxu2  ;;  %v3590_v28 = vpop.f32.mrf.mxu3 }
 0x263   : > { %v1291_v33 = vmax.f32 %v1139_v27, 0.0  ;;  %v1292_v34 = vmax.f32 %v1180_v7, 0.0  ;;  %v3031_v7 = vld [vmem:[%s3236_s23] sm:$0xff] }
 0x268   : > { %v1141_v6 = vpop.f32.mrf.mxu0  ;;  %v1182_v25 = vpop.f32.mrf.mxu1 }
 0x269   : > { %v1142_v51 = vadd.f32 %v1141_v6, %v3584_v57  ;;  %v1183_v11 = vadd.f32 %v1182_v25, %v3584_v57 }
 0x26a   : > { %v1217_v23 = vpop.f32.mrf.mxu2  ;;  %v1258_v29 = vpop.f32.mrf.mxu3 }
 0x26b   : > { %v1295_v21 = vmax.f32 %v1142_v51, 0.0  ;;  %v1296_v22 = vmax.f32 %v1183_v11, 0.0  ;;  %v1218_v52 = vadd.f32 %v1217_v23, %v3592_v53  ;;  %v1259_v6 = vadd.f32 %v1258_v29, %v3592_v53 }
 0x26c   : > { %v1256_v51 = vadd.f32 %v3590_v28, %v3594_v24  ;;  %v1212_v23 = vadd.f32 %v3580_v56, %v3596_v50  ;;  %v1253_v53 = vadd.f32 %v3582_v3, %v3596_v50  ;;  %v1209_v28 = vadd.f32 %v3576_v48, %v3608_v35 }
 0x26d   : > { %1343 = vmatpush.msrb.mxu0 %v1295_v21  ;;  %1372 = vmatpush.msrb.mxu1 %v1296_v22  ;;  %v1289_v29 = vmax.f32 %v1218_v52, 0.0  ;;  %v1290_v31 = vmax.f32 %v1259_v6, 0.0  ;;  %v1206_v56 = vadd.f32 %v3572_v5, %v3610_v16  ;;  %v1247_v3 = vadd.f32 %v3574_v45, %v3610_v16  ;;  %v1301_v5 = vld [vmem:[%s4292_s4 + $0x10] sm:$0xff]  ;;  %v1306_v52 = vpop.permute.xlu0 %1305 }
 0x26e   : > { %v1286_v22 = vmax.f32 %v1256_v51, 0.0  ;;  %v1281_v50 = vmax.f32 %v1212_v23, 0.0  ;;  %v1282_v10 = vmax.f32 %v1253_v53, 0.0  ;;  %v1203_v48 = vadd.f32 %v3568_v9, %v1042_v30  ;;  %v3033_v9 = vld [vmem:[%s3236_s23 + $0x10] sm:$0xff]  ;;  %v1467_v53 = vld [vmem:[%s4293_s5] sm:$0xff] }
 0x26f   : > { %1344 = vmatpush.msrb.mxu0 %v1291_v33  ;;  %1373 = vmatpush.msrb.mxu1 %v1292_v34  ;;  %v1277_v32 = vmax.f32 %v1209_v28, 0.0  ;;  %v1273_v34 = vmax.f32 %v1206_v56, 0.0  ;;  %v1274_v14 = vmax.f32 %v1247_v3, 0.0  ;;  %v1477_v16 = vld [vmem:[%s4294_s6 + $0x10] sm:$0xff] }
 0x270   : > { %v1269_v45 = vmax.f32 %v1203_v48, 0.0 }
 0x271   : > { %1345 = vmatpush.msrb.mxu0 %v1287_v20  ;;  %1374 = vmatpush.msrb.mxu1 %v1288_v63  ;;  %v1302_v20 = vld [vmem:[%s4292_s4 + $0x18] sm:$0xff]  ;;  %v1475_v63 = vld [vmem:[%s4294_s6] sm:$0xff] }
 0x272   : > { %v1220_v58 = vpop.f32.mrf.mxu2  ;;  %v1261_v59 = vpop.f32.mrf.mxu3 }
 0x273   : > { %1346 = vmatpush.msrb.mxu0 %v1283_v0  ;;  %1375 = vmatpush.msrb.mxu1 %v1284_v37  ;;  %v1221_v13 = vadd.f32 %v1220_v58, %v3586_v4  ;;  %v1262_v60 = vadd.f32 %v1261_v59, %v3586_v4  ;;  %v3032_v4 = vld [vmem:[%s3236_s23 + $0x8] sm:$0xff]  ;;  %v1481_v37 = vld [vmem:[%s4294_s6 + $0x30] sm:$0xff]  ;;  %v1482_v58 = vld [vmem:[%s4294_s6 + $0x38] sm:$0xff] }
 0x274   : > { %v1480_v0 = vld [vmem:[%s4294_s6 + $0x28] sm:$0xff] }
 0x275   : > { %1347 = vmatpush.msrb.mxu0 %v1279_v1  ;;  %1376 = vmatpush.msrb.mxu1 %v1280_v17  ;;  %v1293_v11 = vmax.f32 %v1221_v13, 0.0  ;;  %v1294_v26 = vmax.f32 %v1262_v60, 0.0 }
 0x277   : > { %1348 = vmatpush.msrb.mxu0 %v1275_v41  ;;  %1377 = vmatpush.msrb.mxu1 %v1276_v42 }
 0x279   : > { %1349 = vmatpush.msrb.mxu0 %v1271_v44  ;;  %1378 = vmatpush.msrb.mxu1 %v1272_v2 }
 0x27a   : > { %v1223_v39 = vpop.f32.mrf.mxu2  ;;  %v1264_v47 = vpop.f32.mrf.mxu3 }
 0x27b   : > { %v1224_v61 = vadd.f32 %v1223_v39, %v3584_v57  ;;  %v1265_v18 = vadd.f32 %v1264_v47, %v3584_v57  ;;  %1350 = vmatpush.msrb.mxu0 %v1267_v40  ;;  %1379 = vmatpush.msrb.mxu1 %v1268_v46  ;;  %v1215_v57 = vadd.f32 %v3588_v19, %v3594_v24  ;;  %v1300_v19 = vld [vmem:[%s4292_s4 + $0x8] sm:$0xff]  ;;  %v1311_v39 = vpop.permute.xlu2 %1310 }
 0x27c   : > { %2818 = vmatmul.msk.f32.vlgmr.msrb.gmra.mxu0 %vm810_vm1, %v3621_v8  ;;  %2822 = vmatmul.msk.f32.vlgmr.msrb.gmra.mxu1 %vm810_vm1, %v3621_v8  ;;  %v1250_v24 = vadd.f32 %v3578_v49, %v3608_v35  ;;  %v1244_v49 = vadd.f32 %v3570_v43, %v1042_v30  ;;  %v3034_v43 = vld [vmem:[%s3236_s23 + $0x18] sm:$0xff]  ;;  %v1476_v35 = vld [vmem:[%s4294_s6 + $0x8] sm:$0xff]  ;;  %s2967_s23 = sshll.u32 %s3105_s20, 2  ;;  %s2609_s20 = scalar_lea.sflag [#allocation3], %s417_s21 }
 0x27d   : > { %v1297_v25 = vmax.f32 %v1224_v61, 0.0  ;;  %v1298_v27 = vmax.f32 %v1265_v18, 0.0  ;;  %1522 = vmatpush.msra.mxu0 %v3031_v7  ;;  %1563 = vmatpush.msra.mxu1 %v3032_v4  ;;  %v1285_v21 = vmax.f32 %v1215_v57, 0.0  ;;  %s2621_s28 = scalar_lea.hbm %s4299_s11, %s2967_s23 }
 0x27e   : > { %v1278_v33 = vmax.f32 %v1250_v24, 0.0  ;;  %v1270_v15 = vmax.f32 %v1244_v49, 0.0  ;;  %s2625_s13 = sshll.u32 %s2621_s28, 4  ;;  %s2626_s13 = int_to_ptr.hbm [resolvable:$true] %s2625_s13 }
 0x27f   : > { %1401 = vmatpush.msrb.mxu2 %v1297_v25  ;;  %1430 = vmatpush.msrb.mxu3 %v1298_v27  ;;  %s3049_s14 = sshra.s32 %s2626_s13, 4  ;;  %s3050_s14 = int_to_ptr.hbm [resolvable:$true] %s3049_s14 }
 0x280   : > { %s3051_s15 = scalar_lea.hbm %s3050_s14, 4  ;;  %p3056_p1 = scmp.lt.s32.totalorder %s3050_s14, %s4299_s11 }
 0x281   : > { %1402 = vmatpush.msrb.mxu2 %v1293_v11  ;;  %1431 = vmatpush.msrb.mxu3 %v1294_v26  ;;  %p3052_p12 = scmp.ne.s32.totalorder %s3050_s14, %s3051_s15  ;;  %p3057_p2 = scmp.lt.s32.totalorder %s3055_s24, %s3051_s15 }
 0x283   : > { %1403 = vmatpush.msrb.mxu2 %v1289_v29  ;;  %1432 = vmatpush.msrb.mxu3 %v1290_v31  ;;  %p3053_p13 = pnand %p3052_p12, %p3216_p4  ;;  %p3058_p3 = por %p3057_p2, %p3056_p1 }
 0x284   : > { %2819 = vmatmul.msk.f32.gmra.mxu0 %vm810_vm1, %v1300_v19  ;;  %2823 = vmatmul.msk.f32.gmra.mxu1 %vm810_vm1, %v1300_v19 }
 0x285   : > { %1404 = vmatpush.msrb.mxu2 %v1285_v21  ;;  %1433 = vmatpush.msrb.mxu3 %v1286_v22  ;;  %v1469_v21 = vld [vmem:[%s4293_s5 + $0x10] sm:$0xff]  ;;  %p3054_p0 = pneg %p3053_p13 }
 0x287   : > { %1405 = vmatpush.msrb.mxu2 %v1281_v50  ;;  %1434 = vmatpush.msrb.mxu3 %v1282_v10  ;;  %p3059_p5 = pnand %p3058_p3, %p3054_p0 }
 0x289   : > { %1406 = vmatpush.msrb.mxu2 %v1277_v32  ;;  %1435 = vmatpush.msrb.mxu3 %v1278_v33 }
 0x28b   : > { %1407 = vmatpush.msrb.mxu2 %v1273_v34  ;;  %1436 = vmatpush.msrb.mxu3 %v1274_v14 }
 0x28c   : > { %2820 = vmatmul.msk.f32.gmra.mxu0 %vm810_vm1, %v1301_v5  ;;  %2824 = vmatmul.msk.f32.gmra.mxu1 %vm810_vm1, %v1301_v5 }
 0x28d   : > { %1408 = vmatpush.msrb.mxu2 %v1269_v45  ;;  %1437 = vmatpush.msrb.mxu3 %v1270_v15 }
 0x28e   : > { %2826 = vmatmul.msk.f32.vlgmr.msrb.gmra.mxu2 %vm810_vm1, %v3621_v8  ;;  %2830 = vmatmul.msk.f32.vlgmr.msrb.gmra.mxu3 %vm810_vm1, %v3621_v8 }
 0x28f   : > { %1604 = vmatpush.msra.mxu2 %v3033_v9  ;;  %1645 = vmatpush.msra.mxu3 %v3034_v43 }
 0x294   : > { %2821 = vmatmul.msk.f32.gmra.mxu0 %vm810_vm1, %v1302_v20  ;;  %2825 = vmatmul.msk.f32.gmra.mxu1 %vm810_vm1, %v1302_v20 }
 0x296   : > { %2827 = vmatmul.msk.f32.gmra.mxu2 %vm810_vm1, %v1300_v19  ;;  %2831 = vmatmul.msk.f32.gmra.mxu3 %vm810_vm1, %v1300_v19  ;;  %v1468_v19 = vld [vmem:[%s4293_s5 + $0x8] sm:$0xff] }
 0x29c   : > { %2834 = vmatmul.msk.f32.vlgmr.msra.gmra.mxu0 %vm541_vm0, %v1475_v63  ;;  %2842 = vmatmul.msk.f32.vlgmr.msra.gmra.mxu1 %vm541_vm0, %v1475_v63 }
 0x29e   : > { %2828 = vmatmul.msk.f32.gmra.mxu2 %vm810_vm1, %v1301_v5  ;;  %2832 = vmatmul.msk.f32.gmra.mxu3 %vm810_vm1, %v1301_v5 }
 0x2a4   : > { %2835 = vmatmul.msk.f32.gmra.mxu0 %vm541_vm0, %v1476_v35  ;;  %2843 = vmatmul.msk.f32.gmra.mxu1 %vm541_vm0, %v1476_v35 }
 0x2a6   : > { %2829 = vmatmul.msk.f32.gmra.mxu2 %vm810_vm1, %v1302_v20  ;;  %2833 = vmatmul.msk.f32.gmra.mxu3 %vm810_vm1, %v1302_v20  ;;  %v1470_v20 = vld [vmem:[%s4293_s5 + $0x18] sm:$0xff] }
 0x2ac   : > { %2836 = vmatmul.msk.f32.gmra.mxu0 %vm541_vm0, %v1477_v16  ;;  %2844 = vmatmul.msk.f32.gmra.mxu1 %vm541_vm0, %v1477_v16 }
 0x2ae   : > { %2850 = vmatmul.msk.f32.vlgmr.msra.gmra.mxu2 %vm541_vm0, %v1475_v63  ;;  %2858 = vmatmul.msk.f32.vlgmr.msra.gmra.mxu3 %vm541_vm0, %v1475_v63  ;;  %v1471_v63 = vld [vmem:[%s4293_s5 + $0x20] sm:$0xff] }
 0x2b4   : > { %2837 = vmatmul.msk.f32.gmra.mxu0 %vm541_vm0, %v1478_v36  ;;  %2845 = vmatmul.msk.f32.gmra.mxu1 %vm541_vm0, %v1478_v36 }
 0x2b6   : > { %2851 = vmatmul.msk.f32.gmra.mxu2 %vm541_vm0, %v1476_v35  ;;  %2859 = vmatmul.msk.f32.gmra.mxu3 %vm541_vm0, %v1476_v35  ;;  %v1472_v35 = vld [vmem:[%s4293_s5 + $0x28] sm:$0xff] }
 0x2bc   : > { %2838 = vmatmul.msk.f32.gmra.mxu0 %vm541_vm0, %v1479_v62  ;;  %2846 = vmatmul.msk.f32.gmra.mxu1 %vm541_vm0, %v1479_v62 }
 0x2be   : > { %2852 = vmatmul.msk.f32.gmra.mxu2 %vm541_vm0, %v1477_v16  ;;  %2860 = vmatmul.msk.f32.gmra.mxu3 %vm541_vm0, %v1477_v16 }
 0x2c4   : > { %2839 = vmatmul.msk.f32.gmra.mxu0 %vm541_vm0, %v1480_v0  ;;  %2847 = vmatmul.msk.f32.gmra.mxu1 %vm541_vm0, %v1480_v0 }
 0x2c6   : > { %2853 = vmatmul.msk.f32.gmra.mxu2 %vm541_vm0, %v1478_v36  ;;  %2861 = vmatmul.msk.f32.gmra.mxu3 %vm541_vm0, %v1478_v36 }
 0x2cc   : > { %2840 = vmatmul.msk.f32.gmra.mxu0 %vm541_vm0, %v1481_v37  ;;  %2848 = vmatmul.msk.f32.gmra.mxu1 %vm541_vm0, %v1481_v37 }
 0x2ce   : > { %2854 = vmatmul.msk.f32.gmra.mxu2 %vm541_vm0, %v1479_v62  ;;  %2862 = vmatmul.msk.f32.gmra.mxu3 %vm541_vm0, %v1479_v62  ;;  %v1473_v62 = vld [vmem:[%s4293_s5 + $0x30] sm:$0xff] }
 0x2d4   : > { %2841 = vmatmul.msk.f32.gmra.mxu0 %vm541_vm0, %v1482_v58  ;;  %2849 = vmatmul.msk.f32.gmra.mxu1 %vm541_vm0, %v1482_v58 }
 0x2d6   : > { %2855 = vmatmul.msk.f32.gmra.mxu2 %vm541_vm0, %v1480_v0  ;;  %2863 = vmatmul.msk.f32.gmra.mxu3 %vm541_vm0, %v1480_v0  ;;  %v1474_v0 = vld [vmem:[%s4293_s5 + $0x38] sm:$0xff] }
 0x2de   : > { %2856 = vmatmul.msk.f32.gmra.mxu2 %vm541_vm0, %v1481_v37  ;;  %2864 = vmatmul.msk.f32.gmra.mxu3 %vm541_vm0, %v1481_v37 }
 0x2e6   : > { %2857 = vmatmul.msk.f32.gmra.mxu2 %vm541_vm0, %v1482_v58  ;;  %2865 = vmatmul.msk.f32.gmra.mxu3 %vm541_vm0, %v1482_v58 }
 0x2f9   : > { %v1352_v59 = vpop.f32.mrf.mxu0  ;;  %v1381_v54 = vpop.f32.mrf.mxu1 }
 0x2fa   : > { %v1353_v6 = vadd.f32 %v1352_v59, %v1306_v52  ;;  %v1382_v25 = vadd.f32 %v1381_v54, %v1306_v52 }
 0x2fc   : > { %v1451_v51 = vmax.f32 %v1353_v6, 0.0  ;;  %v1452_v11 = vmax.f32 %v1382_v25, 0.0 }
 0x301   : > { %v1355_v55 = vpop.f32.mrf.mxu0  ;;  %v1384_v1 = vpop.f32.mrf.mxu1 }
 0x302   : > { %v1356_v47 = vadd.f32 %v1355_v55, %v1311_v39  ;;  %v1385_v60 = vadd.f32 %v1384_v1, %v1311_v39 }
 0x304   : > { %v1455_v4 = vmax.f32 %v1356_v47, 0.0  ;;  %v1456_v57 = vmax.f32 %v1385_v60, 0.0 }
 0x309   : > { %v1358_v17 = vpop.f32.mrf.mxu0  ;;  %v1387_v30 = vpop.f32.mrf.mxu1 }
 0x30a   : > { %v1359_v44 = vadd.f32 %v1358_v17, %v1316_v38  ;;  %v1388_v2 = vadd.f32 %v1387_v30, %v1316_v38 }
 0x30c   : > { %v1459_v27 = vmax.f32 %v1359_v44, 0.0  ;;  %v1460_v7 = vmax.f32 %v1388_v2, 0.0 }
 0x311   : > { %v1361_v41 = vpop.f32.mrf.mxu0  ;;  %v1390_v42 = vpop.f32.mrf.mxu1 }
 0x312   : > { %v1362_v40 = vadd.f32 %v1361_v41, %v1321_v12  ;;  %v1391_v46 = vadd.f32 %v1390_v42, %v1321_v12  ;;  %v1410_v8 = vpop.f32.mrf.mxu2  ;;  %v1439_v13 = vpop.f32.mrf.mxu3 }
 0x313   : > { %v1411_v33 = vadd.f32 %v1410_v8, %v1306_v52  ;;  %v1440_v34 = vadd.f32 %v1439_v13, %v1306_v52 }
 0x314   : > { %v1463_v61 = vmax.f32 %v1362_v40, 0.0  ;;  %v1464_v18 = vmax.f32 %v1391_v46, 0.0 }
 0x315   : > { %v1453_v9 = vmax.f32 %v1411_v33, 0.0  ;;  %v1454_v43 = vmax.f32 %v1440_v34, 0.0 }
 0x316   : > { %1708 = vmatpush.msrb.mxu0 %v1463_v61  ;;  %1749 = vmatpush.msrb.mxu1 %v1464_v18 }
 0x318   : > { %1709 = vmatpush.msrb.mxu0 %v1459_v27  ;;  %1750 = vmatpush.msrb.mxu1 %v1460_v7 }
 0x319   : > { %v3772_v16 = vpop.f32.mrf.mxu0  ;;  %v3774_v36 = vpop.f32.mrf.mxu1 }
 0x31a   : > { %v1413_v26 = vpop.f32.mrf.mxu2  ;;  %v1442_v23 = vpop.f32.mrf.mxu3  ;;  %1710 = vmatpush.msrb.mxu0 %v1455_v4  ;;  %1751 = vmatpush.msrb.mxu1 %v1456_v57 }
 0x31b   : > { %v1414_v10 = vadd.f32 %v1413_v26, %v1311_v39  ;;  %v1443_v48 = vadd.f32 %v1442_v23, %v1311_v39 }
 0x31c   : > { %1711 = vmatpush.msrb.mxu0 %v1451_v51  ;;  %1752 = vmatpush.msrb.mxu1 %v1452_v11 }
 0x31d   : > { %2866 = vmatmul.msk.f32.vlgmr.msrb.gmra.mxu0 %vm1671_vm2, %v1467_v53  ;;  %2874 = vmatmul.msk.f32.vlgmr.msrb.gmra.mxu1 %vm1671_vm2, %v1467_v53  ;;  %v1457_v45 = vmax.f32 %v1414_v10, 0.0  ;;  %v1458_v15 = vmax.f32 %v1443_v48, 0.0  ;;  %v3852_v48 = vpop.permute.xlu1 %1897 }
 0x321   : > { %v3786_v37 = vpop.f32.mrf.mxu0  ;;  %v3788_v58 = vpop.f32.mrf.mxu1 }
 0x322   : > { %v1416_v29 = vpop.f32.mrf.mxu2  ;;  %v1445_v31 = vpop.f32.mrf.mxu3 }
 0x323   : > { %v1417_v22 = vadd.f32 %v1416_v29, %v1316_v38  ;;  %v1446_v56 = vadd.f32 %v1445_v31, %v1316_v38 }
 0x325   : > { %2867 = vmatmul.msk.f32.gmra.mxu0 %vm1671_vm2, %v1468_v19  ;;  %2875 = vmatmul.msk.f32.gmra.mxu1 %vm1671_vm2, %v1468_v19  ;;  %v1461_v14 = vmax.f32 %v1417_v22, 0.0  ;;  %v1462_v5 = vmax.f32 %v1446_v56, 0.0 }
 0x329   : > { %v3794_v59 = vpop.f32.mrf.mxu0  ;;  %v3796_v54 = vpop.f32.mrf.mxu1 }
 0x32a   : > { %v1419_v28 = vpop.f32.mrf.mxu2  ;;  %v1448_v24 = vpop.f32.mrf.mxu3 }
 0x32b   : > { %v1420_v3 = vadd.f32 %v1419_v28, %v1321_v12  ;;  %v1449_v50 = vadd.f32 %v1448_v24, %v1321_v12 }
 0x32d   : > { %v1465_v49 = vmax.f32 %v1420_v3, 0.0  ;;  %v1466_v32 = vmax.f32 %v1449_v50, 0.0  ;;  %2868 = vmatmul.msk.f32.gmra.mxu0 %vm1671_vm2, %v1469_v21  ;;  %2876 = vmatmul.msk.f32.gmra.mxu1 %vm1671_vm2, %v1469_v21 }
 0x32f   : > { %1790 = vmatpush.msrb.mxu2 %v1465_v49  ;;  %1831 = vmatpush.msrb.mxu3 %v1466_v32 }
 0x331   : > { %1791 = vmatpush.msrb.mxu2 %v1461_v14  ;;  %1832 = vmatpush.msrb.mxu3 %v1462_v5  ;;  %v3802_v55 = vpop.f32.mrf.mxu0  ;;  %v3804_v1 = vpop.f32.mrf.mxu1 }
 0x332   : > { %v3806_v17 = vpop.f32.mrf.mxu2  ;;  %v3808_v30 = vpop.f32.mrf.mxu3 }
 0x333   : > { %1792 = vmatpush.msrb.mxu2 %v1457_v45  ;;  %1833 = vmatpush.msrb.mxu3 %v1458_v15  ;;  %4306 = vst [vmem:[#allocation7_spill] sm:$0xff] %v3806_v17  ;;  %v3858_v14 = vpop.permute.xlu2 %1892  ;;  %v3860_v5 = vpop.permute.xlu0 %1887 }
 0x334   : > { %4307 = vst [vmem:[#allocation8_spill] sm:$0xff] %v3808_v30  ;;  %v3866_v30 = vpop.permute.xlu1 %1882 }
 0x335   : > { %1793 = vmatpush.msrb.mxu2 %v1453_v9  ;;  %1834 = vmatpush.msrb.mxu3 %v1454_v43 }
 0x336   : > { %2869 = vmatmul.msk.f32.gmra.mxu0 %vm1671_vm2, %v1470_v20  ;;  %2877 = vmatmul.msk.f32.gmra.mxu1 %vm1671_vm2, %v1470_v20 }
 0x337   : > { %2882 = vmatmul.msk.f32.vlgmr.msrb.gmra.mxu2 %vm1671_vm2, %v1467_v53  ;;  %2890 = vmatmul.msk.f32.vlgmr.msrb.gmra.mxu3 %vm1671_vm2, %v1467_v53 }
 0x339   : > { %v1536_v12 = vpop.f32.mrf.mxu0  ;;  %v1577_v38 = vpop.f32.mrf.mxu1 }
 0x33a   : > { %v3812_v41 = vpop.f32.mrf.mxu2  ;;  %v3814_v42 = vpop.f32.mrf.mxu3 }
 0x33b   : > { %4308 = vst [vmem:[#allocation9_spill] sm:$0xff] %v3814_v42 }
 0x33e   : > { %2870 = vmatmul.msk.f32.gmra.mxu0 %vm1671_vm2, %v1471_v63  ;;  %2878 = vmatmul.msk.f32.gmra.mxu1 %vm1671_vm2, %v1471_v63 }
 0x33f   : > { %2883 = vmatmul.msk.f32.gmra.mxu2 %vm1671_vm2, %v1468_v19  ;;  %2891 = vmatmul.msk.f32.gmra.mxu3 %vm1671_vm2, %v1468_v19 }
 0x341   : > { %v1539_v44 = vpop.f32.mrf.mxu0  ;;  %v1580_v2 = vpop.f32.mrf.mxu1 }
 0x342   : > { %v3816_v40 = vpop.f32.mrf.mxu2  ;;  %v3818_v46 = vpop.f32.mrf.mxu3 }
 0x346   : > { %2871 = vmatmul.msk.f32.gmra.mxu0 %vm1671_vm2, %v1472_v35  ;;  %2879 = vmatmul.msk.f32.gmra.mxu1 %vm1671_vm2, %v1472_v35 }
 0x347   : > { %2884 = vmatmul.msk.f32.gmra.mxu2 %vm1671_vm2, %v1469_v21  ;;  %2892 = vmatmul.msk.f32.gmra.mxu3 %vm1671_vm2, %v1469_v21 }
 0x349   : > { %v1542_v8 = vpop.f32.mrf.mxu0  ;;  %v1583_v13 = vpop.f32.mrf.mxu1 }
 0x34a   : > { %v3820_v39 = vpop.f32.mrf.mxu2  ;;  %v3822_v47 = vpop.f32.mrf.mxu3 }
 0x34e   : > { %2872 = vmatmul.msk.f32.gmra.mxu0 %vm1671_vm2, %v1473_v62  ;;  %2880 = vmatmul.msk.f32.gmra.mxu1 %vm1671_vm2, %v1473_v62 }
 0x34f   : > { %2885 = vmatmul.msk.f32.gmra.mxu2 %vm1671_vm2, %v1470_v20  ;;  %2893 = vmatmul.msk.f32.gmra.mxu3 %vm1671_vm2, %v1470_v20 }
 0x351   : > { %v1545_v60 = vpop.f32.mrf.mxu0  ;;  %v1586_v61 = vpop.f32.mrf.mxu1 }
 0x352   : > { %v3824_v18 = vpop.f32.mrf.mxu2  ;;  %v3826_v52 = vpop.f32.mrf.mxu3 }
 0x356   : > { %2873 = vmatmul.msk.f32.gmra.mxu0 %vm1671_vm2, %v1474_v0  ;;  %2881 = vmatmul.msk.f32.gmra.mxu1 %vm1671_vm2, %v1474_v0 }
 0x357   : > { %2886 = vmatmul.msk.f32.gmra.mxu2 %vm1671_vm2, %v1471_v63  ;;  %2894 = vmatmul.msk.f32.gmra.mxu3 %vm1671_vm2, %v1471_v63 }
 0x35a   : > { %v3832_v27 = vpop.f32.mrf.mxu2  ;;  %v3834_v7 = vpop.f32.mrf.mxu3 }
 0x35f   : > { %2887 = vmatmul.msk.f32.gmra.mxu2 %vm1671_vm2, %v1472_v35  ;;  %2895 = vmatmul.msk.f32.gmra.mxu3 %vm1671_vm2, %v1472_v35 }
 0x362   : > { %v3836_v51 = vpop.f32.mrf.mxu2  ;;  %v3838_v11 = vpop.f32.mrf.mxu3 }
 0x367   : > { %2888 = vmatmul.msk.f32.gmra.mxu2 %vm1671_vm2, %v1473_v62  ;;  %2896 = vmatmul.msk.f32.gmra.mxu3 %vm1671_vm2, %v1473_v62 }
 0x36a   : > { %v3840_v53 = vpop.f32.mrf.mxu2  ;;  %v3842_v29 = vpop.f32.mrf.mxu3 }
 0x36f   : > { %2889 = vmatmul.msk.f32.gmra.mxu2 %vm1671_vm2, %v1474_v0  ;;  %2897 = vmatmul.msk.f32.gmra.mxu3 %vm1671_vm2, %v1474_v0 }
 0x39a   : > { %v3828_v6 = vpop.f32.mrf.mxu0  ;;  %v3830_v25 = vpop.f32.mrf.mxu1 }
 0x3a2   : > { %v1716_v4 = vpop.f32.mrf.mxu0  ;;  %v1757_v57 = vpop.f32.mrf.mxu1 }
 0x3aa   : > { %v1719_v26 = vpop.f32.mrf.mxu0  ;;  %v1760_v23 = vpop.f32.mrf.mxu1 }
 0x3b3   : > { %v1722_v31 = vpop.f32.mrf.mxu0  ;;  %v1763_v19 = vpop.f32.mrf.mxu1 }
 0x3ba   : > { %v3844_v28 = vpop.f32.mrf.mxu2  ;;  %v3846_v24 = vpop.f32.mrf.mxu3 }
 0x3bb   : > { %4309 = vst [vmem:[#allocation10_spill] sm:$0xff] %v3844_v28  ;;  %v1725_v21 = vpop.f32.mrf.mxu0  ;;  %v1766_v22 = vpop.f32.mrf.mxu1 }
 0x3bc   : > { %4310 = vst [vmem:[#allocation11_spill] sm:$0xff] %v3846_v24  ;;  %v1726_v28 = vadd.f32 %v1725_v21, %v1536_v12  ;;  %v1767_v17 = vadd.f32 %v1766_v22, %v1577_v38  ;;  %v1761_v21 = vadd.f32 %v1760_v23, %v3796_v54 }
 0x3be   : > { %v1916_v22 = vadd.f32 %v3866_v30, %v1726_v28  ;;  %v3898_v28 = vpop.permute.xlu1 %1867 }
 0x3c2   : > { %v3848_v56 = vpop.f32.mrf.mxu2  ;;  %v3850_v3 = vpop.f32.mrf.mxu3 }
 0x3c3   : > { %4311 = vst [vmem:[#allocation12_spill] sm:$0xff] %v3850_v3  ;;  %v1728_v50 = vpop.f32.mrf.mxu0  ;;  %v1769_v10 = vpop.f32.mrf.mxu1 }
 0x3c4   : > { %v1729_v35 = vadd.f32 %v1728_v50, %v1539_v44  ;;  %v1770_v62 = vadd.f32 %v1769_v10, %v1580_v2  ;;  %v1764_v44 = vadd.f32 %v1763_v19, %v3804_v1  ;;  %v1717_v1 = vadd.f32 %v1716_v4, %v3786_v37 }
 0x3c5   : > { %v1755_v19 = vadd.f32 %v3830_v25, %v3774_v36  ;;  %v1948_v4 = vmax.f32 %v1916_v22, 0.0 }
 0x3c6   : > { %v1920_v2 = vadd.f32 %v3860_v5, %v1729_v35 }
 0x3ca   : > { %v3854_v49 = vpop.f32.mrf.mxu2  ;;  %v3856_v32 = vpop.f32.mrf.mxu3 }
 0x3cb   : > { %v1731_v33 = vpop.f32.mrf.mxu0  ;;  %v1772_v34 = vpop.f32.mrf.mxu1 }
 0x3cc   : > { %v1732_v45 = vadd.f32 %v1731_v33, %v1542_v8  ;;  %v1773_v15 = vadd.f32 %v1772_v34, %v1583_v13  ;;  %v3872_v33 = vpop.permute.xlu2 %1877  ;;  %v1723_v34 = vadd.f32 %v1722_v31, %v3802_v55  ;;  %v1758_v31 = vadd.f32 %v1757_v57, %v3788_v58 }
 0x3cd   : > { %v1913_v54 = vadd.f32 %v3872_v33, %v1764_v44 }
 0x3ce   : > { %v1924_v3 = vadd.f32 %v3858_v14, %v1732_v45  ;;  %v1925_v42 = vadd.f32 %v3858_v14, %v1773_v15  ;;  %v1905_v15 = vadd.f32 %v3898_v28, %v1758_v31 }
 0x3d0   : > { %v1956_v50 = vmax.f32 %v1924_v3, 0.0  ;;  %v1957_v10 = vmax.f32 %v1925_v42, 0.0  ;;  %v1714_v42 = vadd.f32 %v3828_v6, %v3772_v16  ;;  %v1904_v3 = vadd.f32 %v3898_v28, %v1717_v1 }
 0x3d2   : > { %v3862_v9 = vpop.f32.mrf.mxu2  ;;  %v3864_v43 = vpop.f32.mrf.mxu3 }
 0x3d3   : > { %v1734_v20 = vpop.f32.mrf.mxu0  ;;  %v1775_v63 = vpop.f32.mrf.mxu1 }
 0x3d4   : > { %v1735_v0 = vadd.f32 %v1734_v20, %v1545_v60  ;;  %v1776_v24 = vadd.f32 %v1775_v63, %v1586_v61  ;;  %v1921_v60 = vadd.f32 %v3860_v5, %v1770_v62  ;;  %v1720_v61 = vadd.f32 %v1719_v26, %v3794_v59  ;;  %v3902_v16 = vpop.permute.xlu2 %1862 }
 0x3d5   : > { %v1912_v59 = vadd.f32 %v3872_v33, %v1723_v34  ;;  %v1952_v26 = vmax.f32 %v1920_v2, 0.0  ;;  %v1945_v63 = vmax.f32 %v1913_v54, 0.0  ;;  %v1900_v36 = vadd.f32 %v3902_v16, %v1714_v42  ;;  %v3909_v2 = vld [vmem:[%s4295_s7] sm:$0xff]  ;;  %v4313_v42 = vld [vmem:[#allocation12_spill] sm:$0xff] }
 0x3d6   : > { %v1928_v8 = vadd.f32 %v3852_v48, %v1735_v0  ;;  %v1929_v13 = vadd.f32 %v3852_v48, %v1776_v24  ;;  %v1917_v24 = vadd.f32 %v3866_v30, %v1767_v17  ;;  %v1953_v23 = vmax.f32 %v1921_v60, 0.0  ;;  %v3890_v17 = vpop.permute.xlu0 %1872 }
 0x3d7   : > { %v1908_v37 = vadd.f32 %v3890_v17, %v1720_v61  ;;  %v1909_v58 = vadd.f32 %v3890_v17, %v1761_v21  ;;  %v1944_v20 = vmax.f32 %v1912_v59, 0.0  ;;  %v1901_v6 = vadd.f32 %v3902_v16, %v1755_v19 }
 0x3d8   : > { %v1960_v12 = vmax.f32 %v1928_v8, 0.0  ;;  %v1961_v38 = vmax.f32 %v1929_v13, 0.0  ;;  %v1949_v57 = vmax.f32 %v1917_v24, 0.0  ;;  %v1936_v8 = vmax.f32 %v1904_v3, 0.0 }
 0x3d9   : > { %v1940_v25 = vmax.f32 %v1908_v37, 0.0  ;;  %v1941_v35 = vmax.f32 %v1909_v58, 0.0  ;;  %v1937_v13 = vmax.f32 %v1905_v15, 0.0  ;;  %v1932_v34 = vmax.f32 %v1900_v36, 0.0  ;;  %v4315_v37 = vld [vmem:[#allocation10_spill] sm:$0xff]  ;;  %v4317_v58 = vld [vmem:[#allocation11_spill] sm:$0xff] }
 0x3da   : > { %v3882_v45 = vpop.f32.mrf.mxu2  ;;  %v3884_v55 = vpop.f32.mrf.mxu3  ;;  %2044 = vmatpush.msra.mxu0 %v1960_v12  ;;  %2085 = vmatpush.msra.mxu1 %v1961_v38  ;;  %v1933_v44 = vmax.f32 %v1901_v6, 0.0  ;;  %v3918_v38 = vld [vmem:[%s4295_s7 + $0x8] sm:$0xff] }
 0x3dc   : > { %2045 = vmatpush.msra.mxu0 %v1956_v50  ;;  %2086 = vmatpush.msra.mxu1 %v1957_v10 }
 0x3de   : > { %2046 = vmatpush.msra.mxu0 %v1952_v26  ;;  %2087 = vmatpush.msra.mxu1 %v1953_v23  ;;  %v4312_v23 = vld [vmem:[#allocation9_spill] sm:$0xff] }
 0x3df   : > { %v1840_v19 = vadd.f32 %v4313_v42, %v4312_v23 }
 0x3e0   : > { %2047 = vmatpush.msra.mxu0 %v1948_v4  ;;  %2088 = vmatpush.msra.mxu1 %v1949_v57 }
 0x3e2   : > { %v1810_v62 = vpop.f32.mrf.mxu2  ;;  %v1851_v0 = vpop.f32.mrf.mxu3  ;;  %2048 = vmatpush.msra.mxu0 %v1944_v20  ;;  %2089 = vmatpush.msra.mxu1 %v1945_v63  ;;  %v1907_v63 = vadd.f32 %v3898_v28, %v1840_v19 }
 0x3e3   : > { %v1811_v50 = vadd.f32 %v1810_v62, %v3832_v27  ;;  %v1852_v10 = vadd.f32 %v1851_v0, %v3834_v7  ;;  %v1805_v7 = vadd.f32 %v3862_v9, %v3820_v39  ;;  %v1843_v39 = vadd.f32 %v3856_v32, %v3818_v46  ;;  %v4314_v32 = vld [vmem:[#allocation7_spill] sm:$0xff] }
 0x3e4   : > { %2049 = vmatpush.msra.mxu0 %v1940_v25  ;;  %2090 = vmatpush.msra.mxu1 %v1941_v35  ;;  %v1967_v25 = vld [vmem:[%s4295_s7 + $0x18] sm:$0xff] }
 0x3e5   : > { %v1911_v3 = vadd.f32 %v3890_v17, %v1843_v39 }
 0x3e6   : > { %2050 = vmatpush.msra.mxu0 %v1936_v8  ;;  %2091 = vmatpush.msra.mxu1 %v1937_v13  ;;  %v1939_v8 = vmax.f32 %v1907_v63, 0.0 }
 0x3e7   : > { %v1943_v0 = vmax.f32 %v1911_v3, 0.0 }
 0x3e8   : > { %2051 = vmatpush.msra.mxu0 %v1932_v34  ;;  %2092 = vmatpush.msra.mxu1 %v1933_v44  ;;  %v1969_v44 = vld [vmem:[%s4295_s7 + $0x28] sm:$0xff] }
 0x3e9   : > { %2898 = vmatmul.msk.f32.vlgmr.msra.gmra.mxu0 %vm810_vm1, %v3909_v2  ;;  %2906 = vmatmul.msk.f32.vlgmr.msra.gmra.mxu1 %vm810_vm1, %v3909_v2 }
 0x3ea   : > { %v1813_v60 = vpop.f32.mrf.mxu2  ;;  %v1854_v12 = vpop.f32.mrf.mxu3 }
 0x3eb   : > { %v1814_v61 = vadd.f32 %v1813_v60, %v3836_v51  ;;  %v1855_v21 = vadd.f32 %v1854_v12, %v3838_v11  ;;  %v1808_v51 = vadd.f32 %v3882_v45, %v3824_v18  ;;  %v1849_v11 = vadd.f32 %v3884_v55, %v3826_v52  ;;  %v1971_v60 = vld [vmem:[%s4295_s7 + $0x38] sm:$0xff] }
 0x3ec   : > { %v1923_v18 = vadd.f32 %v3860_v5, %v1852_v10 }
 0x3ed   : > { %v1926_v59 = vadd.f32 %v3858_v14, %v1814_v61  ;;  %v1927_v54 = vadd.f32 %v3858_v14, %v1855_v21  ;;  %v3947_v14 = vld [vmem:[%s4295_s7 + $0x10] sm:$0xff]  ;;  %v1918_v9 = vadd.f32 %v3866_v30, %v1808_v51 }
 0x3ef   : > { %v1959_v55 = vmax.f32 %v1927_v54, 0.0  ;;  %v1950_v15 = vmax.f32 %v1918_v9, 0.0 }
 0x3f1   : > { %2899 = vmatmul.msk.f32.gmra.mxu0 %vm810_vm1, %v3918_v38  ;;  %2907 = vmatmul.msk.f32.gmra.mxu1 %vm810_vm1, %v3918_v38 }
 0x3f2   : > { %v1816_v22 = vpop.f32.mrf.mxu2  ;;  %v1857_v24 = vpop.f32.mrf.mxu3 }
 0x3f3   : > { %v1817_v1 = vadd.f32 %v1816_v22, %v3840_v53  ;;  %v1858_v31 = vadd.f32 %v1857_v24, %v3842_v29  ;;  %v1846_v53 = vadd.f32 %v3864_v43, %v3822_v47  ;;  %v1922_v29 = vadd.f32 %v3860_v5, %v1811_v50 }
 0x3f4   : > { %v1919_v47 = vadd.f32 %v3866_v30, %v1849_v11  ;;  %v1958_v43 = vmax.f32 %v1926_v59, 0.0  ;;  %v1799_v5 = vadd.f32 %v3848_v56, %v3812_v41  ;;  %v1796_v41 = vadd.f32 %v4315_v37, %v4314_v32  ;;  %v4316_v56 = vld [vmem:[#allocation8_spill] sm:$0xff] }
 0x3f5   : > { %v1930_v26 = vadd.f32 %v3852_v48, %v1817_v1  ;;  %v1931_v27 = vadd.f32 %v3852_v48, %v1858_v31  ;;  %v1802_v48 = vadd.f32 %v3854_v49, %v3816_v40  ;;  %v1914_v40 = vadd.f32 %v3872_v33, %v1805_v7  ;;  %v4034_v7 = vpop.permute.xlu0 %2009 }
 0x3f6   : > { %v1915_v30 = vadd.f32 %v3872_v33, %v1846_v53  ;;  %v1954_v46 = vmax.f32 %v1922_v29, 0.0  ;;  %v1955_v49 = vmax.f32 %v1923_v18, 0.0  ;;  %v1837_v4 = vadd.f32 %v4317_v58, %v4316_v56  ;;  %v4036_v53 = vpop.permute.xlu1 %2004 }
 0x3f7   : > { %v1962_v45 = vmax.f32 %v1930_v26, 0.0  ;;  %v1963_v52 = vmax.f32 %v1931_v27, 0.0  ;;  %v1910_v57 = vadd.f32 %v3890_v17, %v1802_v48  ;;  %v1951_v20 = vmax.f32 %v1919_v47, 0.0 }
 0x3f8   : > { %v1906_v33 = vadd.f32 %v3898_v28, %v1799_v5  ;;  %v1946_v36 = vmax.f32 %v1914_v40, 0.0  ;;  %v1947_v6 = vmax.f32 %v1915_v30, 0.0  ;;  %v1902_v35 = vadd.f32 %v3902_v16, %v1796_v41 }
 0x3f9   : > { %2126 = vmatpush.msra.mxu2 %v1962_v45  ;;  %2167 = vmatpush.msra.mxu3 %v1963_v52  ;;  %v1903_v17 = vadd.f32 %v3902_v16, %v1837_v4  ;;  %v1942_v62 = vmax.f32 %v1910_v57, 0.0  ;;  %v1968_v16 = vld [vmem:[%s4295_s7 + $0x20] sm:$0xff] }
 0x3fa   : > { %2900 = vmatmul.msk.f32.gmra.mxu0 %vm810_vm1, %v3947_v14  ;;  %2908 = vmatmul.msk.f32.gmra.mxu1 %vm810_vm1, %v3947_v14  ;;  %v1938_v28 = vmax.f32 %v1906_v33, 0.0  ;;  %v1934_v13 = vmax.f32 %v1902_v35, 0.0 }
 0x3fb   : > { %2127 = vmatpush.msra.mxu2 %v1958_v43  ;;  %2168 = vmatpush.msra.mxu3 %v1959_v55  ;;  %v1935_v34 = vmax.f32 %v1903_v17, 0.0 }
 0x3fd   : > { %2128 = vmatpush.msra.mxu2 %v1954_v46  ;;  %2169 = vmatpush.msra.mxu3 %v1955_v49  ;;  %v4044_v48 = vpop.permute.xlu0 %1994 }
 0x3fe   : > { %v4046_v47 = vpop.permute.xlu1 %1989 }
 0x3ff   : > { %2129 = vmatpush.msra.mxu2 %v1950_v15  ;;  %2170 = vmatpush.msra.mxu3 %v1951_v20 }
 0x401   : > { %2130 = vmatpush.msra.mxu2 %v1946_v36  ;;  %2171 = vmatpush.msra.mxu3 %v1947_v6 }
 0x402   : > { %2901 = vmatmul.msk.f32.gmra.mxu0 %vm810_vm1, %v1967_v25  ;;  %2909 = vmatmul.msk.f32.gmra.mxu1 %vm810_vm1, %v1967_v25 }
 0x403   : > { %2131 = vmatpush.msra.mxu2 %v1942_v62  ;;  %2172 = vmatpush.msra.mxu3 %v1943_v0 }
 0x405   : > { %2132 = vmatpush.msra.mxu2 %v1938_v28  ;;  %2173 = vmatpush.msra.mxu3 %v1939_v8  ;;  %v4066_v6 = vpop.permute.xlu0 %1979 }
 0x407   : > { %2133 = vmatpush.msra.mxu2 %v1934_v13  ;;  %2174 = vmatpush.msra.mxu3 %v1935_v34 }
 0x408   : > { %2914 = vmatmul.msk.f32.vlgmr.msra.gmra.mxu2 %vm810_vm1, %v3909_v2  ;;  %2922 = vmatmul.msk.f32.vlgmr.msra.gmra.mxu3 %vm810_vm1, %v3909_v2  ;;  %v1970_v2 = vld [vmem:[%s4295_s7 + $0x30] sm:$0xff] }
 0x40a   : > { %2902 = vmatmul.msk.f32.gmra.mxu0 %vm810_vm1, %v1968_v16  ;;  %2910 = vmatmul.msk.f32.gmra.mxu1 %vm810_vm1, %v1968_v16 }
 0x410   : > { %2915 = vmatmul.msk.f32.gmra.mxu2 %vm810_vm1, %v3918_v38  ;;  %2923 = vmatmul.msk.f32.gmra.mxu3 %vm810_vm1, %v3918_v38 }
 0x412   : > { %2903 = vmatmul.msk.f32.gmra.mxu0 %vm810_vm1, %v1969_v44  ;;  %2911 = vmatmul.msk.f32.gmra.mxu1 %vm810_vm1, %v1969_v44 }
 0x418   : > { %2916 = vmatmul.msk.f32.gmra.mxu2 %vm810_vm1, %v3947_v14  ;;  %2924 = vmatmul.msk.f32.gmra.mxu3 %vm810_vm1, %v3947_v14  ;;  %v4042_v14 = vpop.permute.xlu2 %1999 }
 0x41a   : > { %2904 = vmatmul.msk.f32.gmra.mxu0 %vm810_vm1, %v1970_v2  ;;  %2912 = vmatmul.msk.f32.gmra.mxu1 %vm810_vm1, %v1970_v2 }
 0x420   : > { %2917 = vmatmul.msk.f32.gmra.mxu2 %vm810_vm1, %v1967_v25  ;;  %2925 = vmatmul.msk.f32.gmra.mxu3 %vm810_vm1, %v1967_v25  ;;  %v4062_v15 = vpop.permute.xlu2 %1984  ;;  %v4068_v25 = vpop.permute.xlu1 %1974 }
 0x422   : > { %2905 = vmatmul.msk.f32.gmra.mxu0 %vm810_vm1, %v1971_v60  ;;  %2913 = vmatmul.msk.f32.gmra.mxu1 %vm810_vm1, %v1971_v60 }
 0x428   : > { %2918 = vmatmul.msk.f32.gmra.mxu2 %vm810_vm1, %v1968_v16  ;;  %2926 = vmatmul.msk.f32.gmra.mxu3 %vm810_vm1, %v1968_v16 }
 0x430   : > { %2919 = vmatmul.msk.f32.gmra.mxu2 %vm810_vm1, %v1969_v44  ;;  %2927 = vmatmul.msk.f32.gmra.mxu3 %vm810_vm1, %v1969_v44 }
 0x438   : > { %2920 = vmatmul.msk.f32.gmra.mxu2 %vm810_vm1, %v1970_v2  ;;  %2928 = vmatmul.msk.f32.gmra.mxu3 %vm810_vm1, %v1970_v2 }
 0x440   : > { %2921 = vmatmul.msk.f32.gmra.mxu2 %vm810_vm1, %v1971_v60  ;;  %2929 = vmatmul.msk.f32.gmra.mxu3 %vm810_vm1, %v1971_v60 }
 0x466   : > { %v4022_v12 = vpop.f32.mrf.mxu0  ;;  %v4024_v38 = vpop.f32.mrf.mxu1 }
 0x467   : > { %v2054_v13 = vadd.f32 %v4022_v12, %v4068_v25  ;;  %v2095_v34 = vadd.f32 %v4024_v38, %v4068_v25 }
 0x46e   : > { %v2056_v61 = vpop.f32.mrf.mxu0  ;;  %v2097_v21 = vpop.f32.mrf.mxu1 }
 0x46f   : > { %v2057_v35 = vadd.f32 %v2056_v61, %v4066_v6  ;;  %v2098_v17 = vadd.f32 %v2097_v21, %v4066_v6  ;;  %v2200_v61 = vmax.f32 %v2054_v13, 0.0  ;;  %v2201_v21 = vmax.f32 %v2095_v34, 0.0 }
 0x471   : > { %v2204_v2 = vmax.f32 %v2057_v35, 0.0  ;;  %v2205_v60 = vmax.f32 %v2098_v17, 0.0 }
 0x477   : > { %v2059_v22 = vpop.f32.mrf.mxu0  ;;  %v2100_v24 = vpop.f32.mrf.mxu1 }
 0x478   : > { %v2060_v20 = vadd.f32 %v2059_v22, %v4062_v15  ;;  %v2101_v33 = vadd.f32 %v2100_v24, %v4062_v15  ;;  %v4079_v22 = vld [vmem:[%s4296_s8] sm:$0xff]  ;;  %v4088_v24 = vld [vmem:[%s4296_s8 + $0x8] sm:$0xff] }
 0x47a   : > { %v2208_v16 = vmax.f32 %v2060_v20, 0.0  ;;  %v2209_v44 = vmax.f32 %v2101_v33, 0.0  ;;  %v2238_v20 = vld [vmem:[%s4296_s8 + $0x30] sm:$0xff]  ;;  %v2239_v33 = vld [vmem:[%s4296_s8 + $0x38] sm:$0xff] }
 0x47f   : > { %v2062_v50 = vpop.f32.mrf.mxu0  ;;  %v2103_v10 = vpop.f32.mrf.mxu1 }
 0x480   : > { %v2063_v58 = vadd.f32 %v2062_v50, %v4046_v47  ;;  %v2104_v4 = vadd.f32 %v2103_v10, %v4046_v47 }
 0x482   : > { %v2212_v62 = vmax.f32 %v2063_v58, 0.0  ;;  %v2213_v0 = vmax.f32 %v2104_v4, 0.0 }
 0x487   : > { %v2065_v1 = vpop.f32.mrf.mxu0  ;;  %v2106_v31 = vpop.f32.mrf.mxu1 }
 0x488   : > { %v2066_v32 = vadd.f32 %v2065_v1, %v4044_v48  ;;  %v2107_v37 = vadd.f32 %v2106_v31, %v4044_v48  ;;  %v4097_v1 = vld [vmem:[%s4296_s8 + $0x10] sm:$0xff] }
 0x48a   : > { %v2216_v63 = vmax.f32 %v2066_v32, 0.0  ;;  %v2217_v36 = vmax.f32 %v2107_v37, 0.0 }
 0x48b   : > { %v4026_v51 = vpop.f32.mrf.mxu2  ;;  %v4028_v11 = vpop.f32.mrf.mxu3 }
 0x48f   : > { %v2068_v59 = vpop.f32.mrf.mxu0  ;;  %v2109_v54 = vpop.f32.mrf.mxu1 }
 0x490   : > { %v2069_v42 = vadd.f32 %v2068_v59, %v4042_v14  ;;  %v2110_v19 = vadd.f32 %v2109_v54, %v4042_v14 }
 0x492   : > { %v2220_v57 = vmax.f32 %v2069_v42, 0.0  ;;  %v2221_v3 = vmax.f32 %v2110_v19, 0.0 }
 0x493   : > { %v4030_v26 = vpop.f32.mrf.mxu2  ;;  %v4032_v27 = vpop.f32.mrf.mxu3 }
 0x497   : > { %v2071_v29 = vpop.f32.mrf.mxu0  ;;  %v2112_v18 = vpop.f32.mrf.mxu1 }
 0x498   : > { %v2072_v43 = vadd.f32 %v2071_v29, %v4036_v53  ;;  %v2113_v55 = vadd.f32 %v2112_v18, %v4036_v53 }
 0x49a   : > { %v2224_v41 = vmax.f32 %v2072_v43, 0.0  ;;  %v2225_v56 = vmax.f32 %v2113_v55, 0.0 }
 0x49b   : > { %v4038_v45 = vpop.f32.mrf.mxu2  ;;  %v4040_v52 = vpop.f32.mrf.mxu3 }
 0x49c   : > { %v2183_v37 = vadd.f32 %v4040_v52, %v4062_v15  ;;  %v2177_v52 = vadd.f32 %v4028_v11, %v4068_v25  ;;  %v2237_v11 = vld [vmem:[%s4296_s8 + $0x28] sm:$0xff] }
 0x49f   : > { %v2074_v39 = vpop.f32.mrf.mxu0  ;;  %v2115_v9 = vpop.f32.mrf.mxu1 }
 0x4a0   : > { %v2075_v5 = vadd.f32 %v2074_v39, %v4034_v7  ;;  %v2116_v23 = vadd.f32 %v2115_v9, %v4034_v7 }
 0x4a2   : > { %v2228_v40 = vmax.f32 %v2075_v5, 0.0  ;;  %v2229_v30 = vmax.f32 %v2116_v23, 0.0 }
 0x4a3   : > { %v4054_v46 = vpop.f32.mrf.mxu2  ;;  %v4056_v49 = vpop.f32.mrf.mxu3 }
 0x4a4   : > { %2312 = vmatpush.msrb.mxu0 %v2228_v40  ;;  %2353 = vmatpush.msrb.mxu1 %v2229_v30 }
 0x4a6   : > { %2313 = vmatpush.msrb.mxu0 %v2224_v41  ;;  %2354 = vmatpush.msrb.mxu1 %v2225_v56 }
 0x4a8   : > { %2314 = vmatpush.msrb.mxu0 %v2220_v57  ;;  %2355 = vmatpush.msrb.mxu1 %v2221_v3  ;;  %v2211_v57 = vmax.f32 %v2183_v37, 0.0 }
 0x4aa   : > { %2315 = vmatpush.msrb.mxu0 %v2216_v63  ;;  %2356 = vmatpush.msrb.mxu1 %v2217_v36 }
 0x4ab   : > { %v2147_v28 = vpop.f32.mrf.mxu2  ;;  %v2188_v8 = vpop.f32.mrf.mxu3 }
 0x4ac   : > { %2316 = vmatpush.msrb.mxu0 %v2212_v62  ;;  %2357 = vmatpush.msrb.mxu1 %v2213_v0  ;;  %v2148_v23 = vadd.f32 %v2147_v28, %v4044_v48  ;;  %v2189_v42 = vadd.f32 %v2188_v8, %v4044_v48  ;;  %v2142_v48 = vadd.f32 %v4038_v45, %v4062_v15  ;;  %v2203_v15 = vmax.f32 %v2177_v52, 0.0 }
 0x4ad   : > { %v2136_v45 = vadd.f32 %v4026_v51, %v4068_v25 }
 0x4ae   : > { %2317 = vmatpush.msrb.mxu0 %v2208_v16  ;;  %2358 = vmatpush.msrb.mxu1 %v2209_v44  ;;  %v2218_v41 = vmax.f32 %v2148_v23, 0.0  ;;  %v2219_v56 = vmax.f32 %v2189_v42, 0.0  ;;  %v2210_v4 = vmax.f32 %v2142_v48, 0.0 }
 0x4af   : > { %v2202_v51 = vmax.f32 %v2136_v45, 0.0 }
 0x4b0   : > { %2318 = vmatpush.msrb.mxu0 %v2204_v2  ;;  %2359 = vmatpush.msrb.mxu1 %v2205_v60  ;;  %v4182_v2 = vpop.permute.xlu2 %2277  ;;  %v4184_v60 = vpop.permute.xlu0 %2272 }
 0x4b2   : > { %2319 = vmatpush.msrb.mxu0 %v2200_v61  ;;  %2360 = vmatpush.msrb.mxu1 %v2201_v21 }
 0x4b3   : > { %v2150_v12 = vpop.f32.mrf.mxu2  ;;  %v2191_v38 = vpop.f32.mrf.mxu3  ;;  %2930 = vmatmul.msk.f32.vlgmr.msrb.gmra.mxu0 %vm810_vm1, %v4079_v22  ;;  %2938 = vmatmul.msk.f32.vlgmr.msrb.gmra.mxu1 %vm810_vm1, %v4079_v22 }
 0x4b4   : > { %v2151_v9 = vadd.f32 %v2150_v12, %v4042_v14  ;;  %v2192_v43 = vadd.f32 %v2191_v38, %v4042_v14  ;;  %v2186_v14 = vadd.f32 %v4056_v49, %v4046_v47  ;;  %v4190_v38 = vpop.permute.xlu1 %2267 }
 0x4b6   : > { %v2222_v30 = vmax.f32 %v2151_v9, 0.0  ;;  %v2223_v32 = vmax.f32 %v2192_v43, 0.0  ;;  %v2215_v58 = vmax.f32 %v2186_v14, 0.0 }
 0x4bb   : > { %v2153_v50 = vpop.f32.mrf.mxu2  ;;  %v2194_v10 = vpop.f32.mrf.mxu3  ;;  %2931 = vmatmul.msk.f32.gmra.mxu0 %vm810_vm1, %v4088_v24  ;;  %2939 = vmatmul.msk.f32.gmra.mxu1 %vm810_vm1, %v4088_v24 }
 0x4bc   : > { %v2154_v54 = vadd.f32 %v2153_v50, %v4036_v53  ;;  %v2195_v29 = vadd.f32 %v2194_v10, %v4036_v53  ;;  %v2235_v53 = vld [vmem:[%s4296_s8 + $0x18] sm:$0xff] }
 0x4be   : > { %v2226_v19 = vmax.f32 %v2154_v54, 0.0  ;;  %v2227_v40 = vmax.f32 %v2195_v29, 0.0 }
 0x4c3   : > { %v2156_v31 = vpop.f32.mrf.mxu2  ;;  %v2197_v59 = vpop.f32.mrf.mxu3  ;;  %2932 = vmatmul.msk.f32.gmra.mxu0 %vm810_vm1, %v4097_v1  ;;  %2940 = vmatmul.msk.f32.gmra.mxu1 %vm810_vm1, %v4097_v1 }
 0x4c4   : > { %v2157_v18 = vadd.f32 %v2156_v31, %v4034_v7  ;;  %v2198_v39 = vadd.f32 %v2197_v59, %v4034_v7  ;;  %v2145_v7 = vadd.f32 %v4054_v46, %v4046_v47  ;;  %v2139_v47 = vadd.f32 %v4030_v26, %v4066_v6  ;;  %v2236_v26 = vld [vmem:[%s4296_s8 + $0x20] sm:$0xff] }
 0x4c5   : > { %v2180_v46 = vadd.f32 %v4032_v27, %v4066_v6 }
 0x4c6   : > { %v2230_v55 = vmax.f32 %v2157_v18, 0.0  ;;  %v2231_v5 = vmax.f32 %v2198_v39, 0.0  ;;  %v2214_v49 = vmax.f32 %v2145_v7, 0.0  ;;  %v2206_v3 = vmax.f32 %v2139_v47, 0.0 }
 0x4c7   : > { %v2207_v27 = vmax.f32 %v2180_v46, 0.0 }
 0x4c8   : > { %2394 = vmatpush.msrb.mxu2 %v2230_v55  ;;  %2435 = vmatpush.msrb.mxu3 %v2231_v5 }
 0x4ca   : > { %2395 = vmatpush.msrb.mxu2 %v2226_v19  ;;  %2436 = vmatpush.msrb.mxu3 %v2227_v40 }
 0x4cb   : > { %2933 = vmatmul.msk.f32.gmra.mxu0 %vm810_vm1, %v2235_v53  ;;  %2941 = vmatmul.msk.f32.gmra.mxu1 %vm810_vm1, %v2235_v53 }
 0x4cc   : > { %2396 = vmatpush.msrb.mxu2 %v2222_v30  ;;  %2437 = vmatpush.msrb.mxu3 %v2223_v32  ;;  %v4210_v32 = vpop.permute.xlu1 %2252 }
 0x4ce   : > { %2397 = vmatpush.msrb.mxu2 %v2218_v41  ;;  %2438 = vmatpush.msrb.mxu3 %v2219_v56 }
 0x4d0   : > { %2398 = vmatpush.msrb.mxu2 %v2214_v49  ;;  %2439 = vmatpush.msrb.mxu3 %v2215_v58 }
 0x4d2   : > { %2399 = vmatpush.msrb.mxu2 %v2210_v4  ;;  %2440 = vmatpush.msrb.mxu3 %v2211_v57 }
 0x4d3   : > { %2934 = vmatmul.msk.f32.gmra.mxu0 %vm810_vm1, %v2236_v26  ;;  %2942 = vmatmul.msk.f32.gmra.mxu1 %vm810_vm1, %v2236_v26 }
 0x4d4   : > { %2400 = vmatpush.msrb.mxu2 %v2206_v3  ;;  %2441 = vmatpush.msrb.mxu3 %v2207_v27 }
 0x4d6   : > { %2401 = vmatpush.msrb.mxu2 %v2202_v51  ;;  %2442 = vmatpush.msrb.mxu3 %v2203_v15 }
 0x4d7   : > { %2946 = vmatmul.msk.f32.vlgmr.msrb.gmra.mxu2 %vm810_vm1, %v4079_v22  ;;  %2954 = vmatmul.msk.f32.vlgmr.msrb.gmra.mxu3 %vm810_vm1, %v4079_v22 }
 0x4db   : > { %2935 = vmatmul.msk.f32.gmra.mxu0 %vm810_vm1, %v2237_v11  ;;  %2943 = vmatmul.msk.f32.gmra.mxu1 %vm810_vm1, %v2237_v11 }
 0x4df   : > { %2947 = vmatmul.msk.f32.gmra.mxu2 %vm810_vm1, %v4088_v24  ;;  %2955 = vmatmul.msk.f32.gmra.mxu3 %vm810_vm1, %v4088_v24  ;;  %v4192_v24 = vpop.permute.xlu2 %2262 }
 0x4e3   : > { %2936 = vmatmul.msk.f32.gmra.mxu0 %vm810_vm1, %v2238_v20  ;;  %2944 = vmatmul.msk.f32.gmra.mxu1 %vm810_vm1, %v2238_v20 }
 0x4e7   : > { %2948 = vmatmul.msk.f32.gmra.mxu2 %vm810_vm1, %v4097_v1  ;;  %2956 = vmatmul.msk.f32.gmra.mxu3 %vm810_vm1, %v4097_v1  ;;  %v4194_v1 = vpop.permute.xlu0 %2257  ;;  %v4212_v48 = vpop.permute.xlu2 %2247 }
 0x4eb   : > { %2937 = vmatmul.msk.f32.gmra.mxu0 %vm810_vm1, %v2239_v33  ;;  %2945 = vmatmul.msk.f32.gmra.mxu1 %vm810_vm1, %v2239_v33 }
 0x4ef   : > { %2949 = vmatmul.msk.f32.gmra.mxu2 %vm810_vm1, %v2235_v53  ;;  %2957 = vmatmul.msk.f32.gmra.mxu3 %vm810_vm1, %v2235_v53  ;;  %v2243_v57 = vpop.permute.xlu0 %2242 }
 0x4f7   : > { %2950 = vmatmul.msk.f32.gmra.mxu2 %vm810_vm1, %v2236_v26  ;;  %2958 = vmatmul.msk.f32.gmra.mxu3 %vm810_vm1, %v2236_v26 }
 0x4ff   : > { %2951 = vmatmul.msk.f32.gmra.mxu2 %vm810_vm1, %v2237_v11  ;;  %2959 = vmatmul.msk.f32.gmra.mxu3 %vm810_vm1, %v2237_v11 }
 0x507   : > { %2952 = vmatmul.msk.f32.gmra.mxu2 %vm810_vm1, %v2238_v20  ;;  %2960 = vmatmul.msk.f32.gmra.mxu3 %vm810_vm1, %v2238_v20 }
 0x50f   : > { %2953 = vmatmul.msk.f32.gmra.mxu2 %vm810_vm1, %v2239_v33  ;;  %2961 = vmatmul.msk.f32.gmra.mxu3 %vm810_vm1, %v2239_v33 }
 0x530   : > { %v4174_v63 = vpop.f32.mrf.mxu0  ;;  %v4176_v36 = vpop.f32.mrf.mxu1 }
 0x531   : > { %v2322_v26 = vadd.f32 %v4174_v63, %v2243_v57  ;;  %v2363_v3 = vadd.f32 %v4176_v36, %v2243_v57 }
 0x533   : > { %v2468_v20 = vmax.f32 %v2322_v26, 0.0  ;;  %v2469_v33 = vmax.f32 %v2363_v3, 0.0 }
 0x538   : > { %v2324_v6 = vpop.f32.mrf.mxu0  ;;  %v2365_v25 = vpop.f32.mrf.mxu1 }
 0x539   : > { %v2325_v58 = vadd.f32 %v2324_v6, %v4212_v48  ;;  %v2366_v45 = vadd.f32 %v2365_v25, %v4212_v48  ;;  %v2500_v6 = vld [vmem:[%s4297_s9] sm:$0x1] }
 0x53b   : > { %v2472_v15 = vmax.f32 %v2325_v58, 0.0  ;;  %v2473_v11 = vmax.f32 %v2366_v45, 0.0 }
 0x540   : > { %v2327_v35 = vpop.f32.mrf.mxu0  ;;  %v2368_v17 = vpop.f32.mrf.mxu1 }
 0x541   : > { %v2328_v37 = vadd.f32 %v2327_v35, %v4210_v32  ;;  %v2369_v41 = vadd.f32 %v2368_v17, %v4210_v32 }
 0x543   : > { %v2476_v27 = vmax.f32 %v2328_v37, 0.0  ;;  %v2477_v51 = vmax.f32 %v2369_v41, 0.0 }
 0x548   : > { %v2330_v62 = vpop.f32.mrf.mxu0  ;;  %v2371_v0 = vpop.f32.mrf.mxu1 }
 0x549   : > { %v2331_v53 = vadd.f32 %v2330_v62, %v4194_v1  ;;  %v2372_v7 = vadd.f32 %v2371_v0, %v4194_v1 }
 0x54b   : > { %v2480_v52 = vmax.f32 %v2331_v53, 0.0  ;;  %v2481_v4 = vmax.f32 %v2372_v7, 0.0 }
 0x550   : > { %v2333_v28 = vpop.f32.mrf.mxu0  ;;  %v2374_v8 = vpop.f32.mrf.mxu1 }
 0x551   : > { %v2334_v23 = vadd.f32 %v2333_v28, %v4192_v24  ;;  %v2375_v42 = vadd.f32 %v2374_v8, %v4192_v24 }
 0x553   : > { %v2484_v56 = vmax.f32 %v2334_v23, 0.0  ;;  %v2485_v47 = vmax.f32 %v2375_v42, 0.0 }
 0x558   : > { %v2336_v13 = vpop.f32.mrf.mxu0  ;;  %v2377_v34 = vpop.f32.mrf.mxu1 }
 0x559   : > { %v2337_v9 = vadd.f32 %v2336_v13, %v4190_v38  ;;  %v2378_v43 = vadd.f32 %v2377_v34, %v4190_v38 }
 0x55a   : > { %v4178_v16 = vpop.f32.mrf.mxu2  ;;  %v4180_v44 = vpop.f32.mrf.mxu3 }
 0x55b   : > { %v2488_v14 = vmax.f32 %v2337_v9, 0.0  ;;  %v2489_v30 = vmax.f32 %v2378_v43, 0.0  ;;  %v2404_v53 = vadd.f32 %v4178_v16, %v2243_v57 }
 0x560   : > { %v2339_v61 = vpop.f32.mrf.mxu0  ;;  %v2380_v21 = vpop.f32.mrf.mxu1 }
 0x561   : > { %v2340_v31 = vadd.f32 %v2339_v61, %v4184_v60  ;;  %v2381_v59 = vadd.f32 %v2380_v21, %v4184_v60 }
 0x562   : > { %v4186_v22 = vpop.f32.mrf.mxu2  ;;  %v4188_v12 = vpop.f32.mrf.mxu3 }
 0x563   : > { %v2492_v19 = vmax.f32 %v2340_v31, 0.0  ;;  %v2493_v40 = vmax.f32 %v2381_v59, 0.0  ;;  %v2407_v42 = vadd.f32 %v4186_v22, %v4212_v48 }
 0x568   : > { %v2342_v50 = vpop.f32.mrf.mxu0  ;;  %v2383_v10 = vpop.f32.mrf.mxu1 }
 0x569   : > { %v2343_v54 = vadd.f32 %v2342_v50, %v4182_v2  ;;  %v2384_v29 = vadd.f32 %v2383_v10, %v4182_v2 }
 0x56a   : > { %v4200_v18 = vpop.f32.mrf.mxu2  ;;  %v4202_v39 = vpop.f32.mrf.mxu3 }
 0x56b   : > { %v2496_v55 = vmax.f32 %v2343_v54, 0.0  ;;  %v2497_v5 = vmax.f32 %v2384_v29, 0.0 }
 0x56d   : > { %2517 = vmatpush.msra.mxu0 %v2496_v55  ;;  %2537 = vmatpush.msra.mxu1 %v2497_v5  ;;  %v2451_v5 = vadd.f32 %v4202_v39, %v4210_v32 }
 0x56f   : > { %2518 = vmatpush.msra.mxu0 %v2492_v19  ;;  %2538 = vmatpush.msra.mxu1 %v2493_v40  ;;  %v2479_v39 = vmax.f32 %v2451_v5, 0.0 }
 0x571   : > { %2519 = vmatpush.msra.mxu0 %v2488_v14  ;;  %2539 = vmatpush.msra.mxu1 %v2489_v30  ;;  %v2474_v14 = vmax.f32 %v2407_v42, 0.0 }
 0x572   : > { %v2412_v46 = vpop.f32.mrf.mxu2  ;;  %v2453_v49 = vpop.f32.mrf.mxu3 }
 0x573   : > { %2520 = vmatpush.msra.mxu0 %v2484_v56  ;;  %2540 = vmatpush.msra.mxu1 %v2485_v47  ;;  %v2454_v43 = vadd.f32 %v2453_v49, %v4194_v1  ;;  %v2603_v56 = vlaneseq }
 0x575   : > { %2521 = vmatpush.msra.mxu0 %v2480_v52  ;;  %2541 = vmatpush.msra.mxu1 %v2481_v4  ;;  %v2483_v40 = vmax.f32 %v2454_v43, 0.0  ;;  %vm2605_vm6 = vcmp.lt.s32.totalorder %v2603_v56, 512 }
 0x577   : > { %2522 = vmatpush.msra.mxu0 %v2476_v27  ;;  %2542 = vmatpush.msra.mxu1 %v2477_v51 }
 0x579   : > { %2523 = vmatpush.msra.mxu0 %v2472_v15  ;;  %2543 = vmatpush.msra.mxu1 %v2473_v11 }
 0x57a   : > { %v2415_v25 = vpop.f32.mrf.mxu2  ;;  %v2456_v63 = vpop.f32.mrf.mxu3 }
 0x57b   : > { %2524 = vmatpush.msra.mxu0 %v2468_v20  ;;  %2544 = vmatpush.msra.mxu1 %v2469_v33  ;;  %v2416_v59 = vadd.f32 %v2415_v25, %v4192_v24  ;;  %v2457_v54 = vadd.f32 %v2456_v63, %v4192_v24 }
 0x57c   : > { %2962 = vmatmul.msk.f32.vlgmr.msra.gmra.mxu0 %vm810_vm1, %v2500_v6  ;;  %2963 = vmatmul.msk.f32.vlgmr.msra.gmra.mxu1 %vm810_vm1, %v2500_v6 }
 0x57d   : > { %v2486_v23 = vmax.f32 %v2416_v59, 0.0  ;;  %v2487_v24 = vmax.f32 %v2457_v54, 0.0 }
 0x582   : > { %v2418_v36 = vpop.f32.mrf.mxu2  ;;  %v2459_v35 = vpop.f32.mrf.mxu3 }
 0x583   : > { %v2419_v21 = vadd.f32 %v2418_v36, %v4190_v38  ;;  %v2460_v50 = vadd.f32 %v2459_v35, %v4190_v38  ;;  %v2410_v38 = vadd.f32 %v4200_v18, %v4210_v32  ;;  %v2445_v18 = vadd.f32 %v4180_v44, %v2243_v57  ;;  %v2504_v44 = vpop.permute.xlu1 %2503 }
 0x585   : > { %v2490_v55 = vmax.f32 %v2419_v21, 0.0  ;;  %v2478_v7 = vmax.f32 %v2410_v38, 0.0  ;;  %v2471_v30 = vmax.f32 %v2445_v18, 0.0 }
 0x58a   : > { %v2421_v17 = vpop.f32.mrf.mxu2  ;;  %v2462_v62 = vpop.f32.mrf.mxu3 }
 0x58b   : > { %v2422_v8 = vadd.f32 %v2421_v17, %v4184_v60  ;;  %v2463_v13 = vadd.f32 %v2462_v62, %v4184_v60  ;;  %v2413_v60 = vadd.f32 %v2412_v46, %v4194_v1  ;;  %v2448_v1 = vadd.f32 %v4188_v12, %v4212_v48 }
 0x58c   : > { %v2470_v12 = vmax.f32 %v2404_v53, 0.0 }
 0x58d   : > { %v2494_v29 = vmax.f32 %v2422_v8, 0.0  ;;  %v2495_v9 = vmax.f32 %v2463_v13, 0.0  ;;  %v2482_v19 = vmax.f32 %v2413_v60, 0.0  ;;  %v2475_v22 = vmax.f32 %v2448_v1, 0.0 }
 0x592   : > { %v2424_v0 = vpop.f32.mrf.mxu2  ;;  %v2465_v28 = vpop.f32.mrf.mxu3 }
 0x593   : > { %v2425_v34 = vadd.f32 %v2424_v0, %v4182_v2  ;;  %v2466_v61 = vadd.f32 %v2465_v28, %v4182_v2  ;;  %v2491_v2 = vmax.f32 %v2460_v50, 0.0 }
 0x595   : > { %v2498_v10 = vmax.f32 %v2425_v34, 0.0  ;;  %v2499_v31 = vmax.f32 %v2466_v61, 0.0 }
 0x597   : > { %2557 = vmatpush.msra.mxu2 %v2498_v10  ;;  %2577 = vmatpush.msra.mxu3 %v2499_v31 }
 0x599   : > { %2558 = vmatpush.msra.mxu2 %v2494_v29  ;;  %2578 = vmatpush.msra.mxu3 %v2495_v9 }
 0x59b   : > { %2559 = vmatpush.msra.mxu2 %v2490_v55  ;;  %2579 = vmatpush.msra.mxu3 %v2491_v2 }
 0x59d   : > { %2560 = vmatpush.msra.mxu2 %v2486_v23  ;;  %2580 = vmatpush.msra.mxu3 %v2487_v24 }
 0x59f   : > { %2561 = vmatpush.msra.mxu2 %v2482_v19  ;;  %2581 = vmatpush.msra.mxu3 %v2483_v40 }
 0x5a1   : > { %2562 = vmatpush.msra.mxu2 %v2478_v7  ;;  %2582 = vmatpush.msra.mxu3 %v2479_v39 }
 0x5a3   : > { %2563 = vmatpush.msra.mxu2 %v2474_v14  ;;  %2583 = vmatpush.msra.mxu3 %v2475_v22 }
 0x5a5   : > { %2564 = vmatpush.msra.mxu2 %v2470_v12  ;;  %2584 = vmatpush.msra.mxu3 %v2471_v30 }
 0x5a6   : > { %2964 = vmatmul.msk.f32.vlgmr.msra.gmra.mxu2 %vm810_vm1, %v2500_v6  ;;  %2965 = vmatmul.msk.f32.vlgmr.msra.gmra.mxu3 %vm810_vm1, %v2500_v6 }
 0x5f9   : > { %v2546_v16 = vpop.f32.mrf.mxu1  ;;  %v2526_v48 = vpop.f32.mrf.mxu0 }
 0x5fa   : > { %v2547_v32 = vadd.f32 %v2546_v16, %v2504_v44  ;;  %v2527_v58 = vadd.f32 %v2526_v48, %v2504_v44 }
 0x5fc   : > { %v2593_v47 = vrot.slane %v2547_v32, 7 }
 0x5fe   : > { %v2597_v4 = vsel %vm2596_vm3, %v2527_v58, %v2593_v47 }
 0x629   : > { %v2566_v37 = vpop.f32.mrf.mxu2  ;;  %v2586_v41 = vpop.f32.mrf.mxu3 }
 0x62a   : > { %v2567_v46 = vadd.f32 %v2566_v37, %v2504_v44  ;;  %v2587_v49 = vadd.f32 %v2586_v41, %v2504_v44 }
 0x62c   : > { %v2594_v45 = vrot.slane %v2567_v46, 6  ;;  %v2595_v52 = vrot.slane %v2587_v49, 5 }
 0x62e   : > { %v2599_v57 = vsel %vm2598_vm4, %v2594_v45, %v2595_v52 }
 0x62f   : > { %v2601_v26 = vsel %vm2600_vm5, %v2597_v4, %v2599_v57 }
 0x630   : > { %2607 = vst.msk [vmem:[%s419_s25] sm:$0xf] %vm2605_vm6, %v2601_v26 }
 0x631   : > { %3062 = shalt.err (!%p3059_p5)
}
 0x632   : > { %2972 = dma.vmem_to_hbm [thread:$0]  (%p3216_p4), %s2624_s12, 64, %s2626_s13, %s2609_s20  }
 0x633 PF: > { %p2978_p6 = scmp.ge.s32.totalorder %s3113_s22, 2  ;;  %s2637_s21 = sand.u32 1, %s3093_s17  }
 0x634   : > { %s2638_s25 = scalar_lea.sflag [#allocation3], %s2637_s21 }
 0x635   : > { %p2975_p7 = pnand %p2978_p6, %p3223_p8 }
 0x637   : > { %p2976_p9 = pneg %p2975_p7 }
 0x639   : > { %3088 = dma.done.wait (%p2976_p9), %s2638_s25, 64  }
 0x63a   : > { %3090 = vsyncadd (%p2976_p9), %s2638_s25, 4294967232  ;;  %s24_s22 = sadd.s32 1, %s3113_s22   ;;  %s4318_s20 = sld [smem:[#allocation5_spill]] }
 0x63b   : > { %p21_p10 = scmp.ge.s32.totalorder %s24_s22, 4   ;;  %s4319_s21 = sld [smem:[#allocation6_spill]] }
 0x63c   : > { %s4320_s17 = smov %s3097_s18  ;;  %s4321_s18 = smov %s3101_s19 }
 0x63d   : > { %s4322_s19 = smov %s3229_s30  ;;  %23 = sbr.rel (!%p21_p10) target bundleno = 4 (0x4), region = 102 }
 0x642   :  { %2644 = vsyncpa [#allocation3], 1 }
 0x643   :  { %2646 = vsyncpa [#allocation3 + $0x1], 1 }

</bundles_post_ra>
